<compile_context>
chip_gen: v5e
topology: v5e:2x2
jax: 0.10.0
libtpu: 0.0.40
codegen_flags: <defaults>
</compile_context>

<pallas_src>
import functools

import jax
import jax.numpy as jnp
from jax import lax
from jax.experimental import pallas as pl
from jax.experimental.pallas import tpu as pltpu


def _ru(x, m):
    return ((x + m - 1) // m) * m


_PADL = 8  # left halo padding in the x1 scratch -> 8-sublane-aligned interior stores


# ----------------------------- fused Pallas kernel -----------------------------

def _sse_fused_kernel(x_ref, b1_ref, bias1_ref, w9_ref, bdw_ref, bcat_ref,
                      bcatb_ref, o_ref, x1pad_ref, *, H, W, strip):
    """Fused SSEBlock for one batch item.

    x_ref    : (1, H, W, Kp0)  bf16   input (channels zero-padded to Kp0)
    b1_ref   : (Kp0, Np1)      bf16   pwc1 weights (BN scale folded)
    bias1_ref: (1, Np1)        f32    pwc1 folded BN bias
    w9_ref   : (9, Np1)        f32    3x3 depthwise taps (BN scale folded)
    bdw_ref  : (1, Np1)        f32    depthwise folded BN bias
    bcat_ref : (2*Np1, Ncat)   bf16   block-diagonal [pwc2 | dwc.pwc] weights
    bcatb_ref: (1, Ncat)       f32    packed [pwc2 | dwc.pwc] biases
    o_ref    : (1, H, W, Ncat) bf16   lanes [0:2*cout] = cat(out1, out2)
    x1pad_ref: VMEM scratch (H+2, Wp, Np1) bf16, zero halo around x1
    """
    Np1 = b1_ref.shape[1]
    Ncat = o_ref.shape[3]
    Kp0 = x_ref.shape[3]
    n_strips = H // strip
    Ms = strip * W

    # Zero the halo scratch (cheap; keeps the border zero on every core).
    x1pad_ref[...] = jnp.zeros_like(x1pad_ref)

    # ---- Phase 1: pwc1 (1x1 conv + folded BN + ReLU) per row strip -> scratch
    def pwc1_strip(s, carry):
        r0 = s * strip
        xs = x_ref[0, pl.ds(r0, strip), :, :].reshape(Ms, Kp0)
        y = jnp.dot(xs, b1_ref[...], preferred_element_type=jnp.float32)
        y = jnp.maximum(y + bias1_ref[...], 0.0).astype(jnp.bfloat16)
        x1pad_ref[pl.ds(r0 + 1, strip), _PADL:_PADL + W, :] = y.reshape(strip, W, Np1)
        return carry

    lax.fori_loop(0, n_strips, pwc1_strip, 0, unroll=True)

    # ---- Phase 2: depthwise 3x3 + ReLU, then packed dual 1x1 GEMM + concat
    def out_strip(s, carry):
        r0 = s * strip

        # depthwise 3x3 with strip-sized f32 accumulator
        acc = jnp.zeros((strip, W, Np1), jnp.float32)
        for dy in range(3):
            for dx in range(3):
                c0 = _PADL - 1 + dx
                tap = x1pad_ref[pl.ds(r0 + dy, strip), c0:c0 + W, :]
                acc = acc + tap.astype(jnp.float32) * w9_ref[3 * dy + dx, :]
        dwa = jnp.maximum(acc + bdw_ref[...], 0.0).astype(jnp.bfloat16)
        dwa = dwa.reshape(Ms, Np1)

        # re-read x1 strip (aligned) and run the block-diagonal dual GEMM
        x1s = x1pad_ref[pl.ds(r0 + 1, strip), _PADL:_PADL + W, :].reshape(Ms, Np1)
        a_cat = jnp.concatenate([x1s, dwa], axis=-1)            # (Ms, 2*Np1)
        y = jnp.dot(a_cat, bcat_ref[...], preferred_element_type=jnp.float32)
        y = jnp.maximum(y + bcatb_ref[...], 0.0)
        o_ref[0, pl.ds(r0, strip), :, :] = y.reshape(strip, W, Ncat).astype(o_ref.dtype)
        return carry

    lax.fori_loop(0, n_strips, out_strip, 0, unroll=True)


# ----------------------------- SSEBlock forward -----------------------------

def sse_block_forward(x_nchw, params, *, oup):
    """Pallas SSEBlock forward.  x_nchw: (N, Cin, H, W) f32 -> (N, 8*oup, H, W) f32."""
    N, C, H, W = x_nchw.shape
    cout = 4 * oup
    Kp0, Np1 = params["B1"].shape
    Ncat = params["Bcat"].shape[1]

    strip = 8 if H % 8 == 0 else H
    assert W % 8 == 0 and H % strip == 0, (H, W)

    # NCHW -> NHWC once; bf16 activations; pad input channels to Kp0 once.
    x = jnp.transpose(x_nchw, (0, 2, 3, 1)).astype(jnp.bfloat16)
    if C < Kp0:
        x = jnp.pad(x, ((0, 0), (0, 0), (0, 0), (0, Kp0 - C)))

    kernel = functools.partial(_sse_fused_kernel, H=H, W=W, strip=strip)
    out = pl.pallas_call(
        kernel,
        out_shape=jax.ShapeDtypeStruct((N, H, W, Ncat), jnp.bfloat16),
        grid=(N,),
        in_specs=[
            pl.BlockSpec((1, H, W, Kp0), lambda n: (n, 0, 0, 0)),
            pl.BlockSpec((Kp0, Np1), lambda n: (0, 0)),
            pl.BlockSpec((1, Np1), lambda n: (0, 0)),
            pl.BlockSpec((9, Np1), lambda n: (0, 0)),
            pl.BlockSpec((1, Np1), lambda n: (0, 0)),
            pl.BlockSpec((2 * Np1, Ncat), lambda n: (0, 0)),
            pl.BlockSpec((1, Ncat), lambda n: (0, 0)),
        ],
        out_specs=pl.BlockSpec((1, H, W, Ncat), lambda n: (n, 0, 0, 0)),
        scratch_shapes=[pltpu.VMEM((H + 2, _ru(_PADL + W + 1, 8), Np1), jnp.bfloat16)],
        compiler_params=pltpu.CompilerParams(dimension_semantics=("parallel",)),
    )(x, params["B1"], params["bias1"], params["W9"], params["bias_dw"],
      params["Bcat"], params["bias_cat"])

    # lanes [0:2*cout] already hold cat(out1, out2); upcast rides the transpose.
    y = out[..., : 2 * cout].astype(jnp.float32)
    return jnp.transpose(y, (0, 3, 1, 2))


# ----------------------------- params: init / fold / pack -----------------------------

def _fold_bn(gamma, beta, mean, var, eps=1e-5):
    s = gamma / jnp.sqrt(var + eps)
    return s, beta - mean * s


def _init_conv_bn_raw(key, cin, cout, k, groups=1):
    kw, kg, kb, km, kv = jax.random.split(key, 5)
    fan = (cin // groups) * k * k
    w = jax.random.normal(kw, (cout, cin // groups, k, k), jnp.float32) / jnp.sqrt(float(fan))
    return {
        "w": w,
        "gamma": 1.0 + 0.1 * jax.random.normal(kg, (cout,), jnp.float32),
        "beta": 0.1 * jax.random.normal(kb, (cout,), jnp.float32),
        "mean": 0.1 * jax.random.normal(km, (cout,), jnp.float32),
        "var": 1.0 + 0.5 * jax.random.uniform(kv, (cout,), jnp.float32),
    }


def init_sse_raw(key, inp, oup):
    out_channel = oup * 4
    k1, k2, k3, k4 = jax.random.split(key, 4)
    return {
        "pwc1": _init_conv_bn_raw(k1, inp, oup, 1),
        "pwc2": _init_conv_bn_raw(k2, oup, out_channel, 1),
        "dwc_dw": _init_conv_bn_raw(k3, oup, oup, 3, groups=oup),
        "dwc_pw": _init_conv_bn_raw(k4, oup, out_channel, 1),
    }


def pack_sse_params(raw, inp, oup):
    """Fold BN (scale into weights, in f32) and pre-pad / pre-pack everything ONCE."""
    cout = 4 * oup
    Kp0, Np1, Ncat = _ru(inp, 128), _ru(oup, 128), _ru(2 * cout, 128)

    # pwc1: scale folded into bf16 GEMM weights, bias kept in f32.
    s1, b1 = _fold_bn(raw["pwc1"]["gamma"], raw["pwc1"]["beta"],
                      raw["pwc1"]["mean"], raw["pwc1"]["var"])
    w1 = raw["pwc1"]["w"][:, :, 0, 0]                                   # (oup, inp)
    B1 = jnp.zeros((Kp0, Np1), jnp.float32).at[:inp, :oup].set((w1 * s1[:, None]).T)
    bias1 = jnp.zeros((1, Np1), jnp.float32).at[0, :oup].set(b1)

    # depthwise 3x3: scale folded into taps.
    sdw, bdw = _fold_bn(raw["dwc_dw"]["gamma"], raw["dwc_dw"]["beta"],
                        raw["dwc_dw"]["mean"], raw["dwc_dw"]["var"])
    w9 = jnp.transpose(raw["dwc_dw"]["w"][:, 0], (1, 2, 0)).reshape(9, oup) * sdw
    W9 = jnp.zeros((9, Np1), jnp.float32).at[:, :oup].set(w9)
    bias_dw = jnp.zeros((1, Np1), jnp.float32).at[0, :oup].set(bdw)

    # packed block-diagonal dual pointwise:
    #   rows [0:oup]        x cols [0:cout]       -> pwc2
    #   rows [Np1:Np1+oup]  x cols [cout:2*cout]  -> dwc.pwc
    s2, b2 = _fold_bn(raw["pwc2"]["gamma"], raw["pwc2"]["beta"],
                      raw["pwc2"]["mean"], raw["pwc2"]["var"])
    s3, b3 = _fold_bn(raw["dwc_pw"]["gamma"], raw["dwc_pw"]["beta"],
                      raw["dwc_pw"]["mean"], raw["dwc_pw"]["var"])
    w2 = raw["pwc2"]["w"][:, :, 0, 0]                                   # (cout, oup)
    w3 = raw["dwc_pw"]["w"][:, :, 0, 0]
    Bcat = jnp.zeros((2 * Np1, Ncat), jnp.float32)
    Bcat = Bcat.at[:oup, :cout].set((w2 * s2[:, None]).T)
    Bcat = Bcat.at[Np1:Np1 + oup, cout:2 * cout].set((w3 * s3[:, None]).T)
    bias_cat = jnp.zeros((1, Ncat), jnp.float32)
    bias_cat = bias_cat.at[0, :cout].set(b2).at[0, cout:2 * cout].set(b3)

    return {
        "B1": B1.astype(jnp.bfloat16), "bias1": bias1,
        "W9": W9, "bias_dw": bias_dw,
        "Bcat": Bcat.astype(jnp.bfloat16), "bias_cat": bias_cat,
    }


# ----------------------------- pure-JAX reference -----------------------------

def sse_block_reference(x, raw, oup):
    def cbr(h, p, k, groups=1):
        pad = (k - 1) // 2
        y = lax.conv_general_dilated(
            h.astype(jnp.float32), p["w"].astype(jnp.float32),
            window_strides=(1, 1), padding=((pad, pad), (pad, pad)),
            dimension_numbers=("NCHW", "OIHW", "NCHW"),
            feature_group_count=groups)
        s, b = _fold_bn(p["gamma"], p["beta"], p["mean"], p["var"])
        return jnp.maximum(y * s[None, :, None, None] + b[None, :, None, None], 0.0)

    x1 = cbr(x, raw["pwc1"], 1)
    out1 = cbr(x1, raw["pwc2"], 1)
    t = cbr(x1, raw["dwc_dw"], 3, groups=oup)
    out2 = cbr(t, raw["dwc_pw"], 1)
    return jnp.concatenate([out1, out2], axis=1)


# ----------------------------- main -----------------------------

if __name__ == "__main__":
    key = jax.random.PRNGKey(0)
    kx, kp = jax.random.split(key)

    N, Cin, H, W = 2, 16, 16, 16
    oup = 8                                   # SSEBlock(inp=16, oup=8) -> 64 out channels

    x = jax.random.normal(kx, (N, Cin, H, W), jnp.float32)
    raw = init_sse_raw(kp, Cin, oup)
    packed = pack_sse_params(raw, Cin, oup)

    fwd = jax.jit(functools.partial(sse_block_forward, oup=oup))
    out = fwd(x, packed)
    jax.block_until_ready(out)

    assert out.shape == (N, 8 * oup, H, W), out.shape
    assert bool(jnp.all(jnp.isfinite(out)))

    ref = sse_block_reference(x, raw, oup)
    max_err = float(jnp.max(jnp.abs(out - ref)))
    ref_scale = float(jnp.max(jnp.abs(ref))) + 1e-6
    assert max_err < 0.05 * ref_scale, (max_err, ref_scale)

    print("KERNEL_OK")
</pallas_src>

<mosaic_0001>
module attributes {stable_mosaic.version = 11 : i64} {
  func.func @_sse_fused_kernel(%arg0: i32, %arg1: memref<1x16x16x128xbf16, #tpu.memory_space<vmem>>, %arg2: memref<128x128xbf16, #tpu.memory_space<vmem>>, %arg3: memref<1x128xf32, #tpu.memory_space<vmem>>, %arg4: memref<9x128xf32, #tpu.memory_space<vmem>>, %arg5: memref<1x128xf32, #tpu.memory_space<vmem>>, %arg6: memref<256x128xbf16, #tpu.memory_space<vmem>>, %arg7: memref<1x128xf32, #tpu.memory_space<vmem>>, %arg8: memref<1x16x16x128xbf16, #tpu.memory_space<vmem>>, %arg9: memref<18x32x128xbf16, #tpu.memory_space<vmem>>) attributes {dimension_semantics = [#tpu.dimension_semantics<parallel>], iteration_bounds = array<i64: 2>, scalar_prefetch = 0 : i64, scratch_operands = 1 : i64, tpu.core_type = #tpu.core_type<tc>, window_params = [{transform_indices = @transform_0, window_bounds = array<i64: 1, 16, 16, 128>}, {pipeline_mode = #tpu.pipeline_mode<synchronous>, transform_indices = @transform_1, window_bounds = array<i64: 128, 128>}, {pipeline_mode = #tpu.pipeline_mode<synchronous>, transform_indices = @transform_2, window_bounds = array<i64: 1, 128>}, {pipeline_mode = #tpu.pipeline_mode<synchronous>, transform_indices = @transform_3, window_bounds = array<i64: 9, 128>}, {pipeline_mode = #tpu.pipeline_mode<synchronous>, transform_indices = @transform_4, window_bounds = array<i64: 1, 128>}, {pipeline_mode = #tpu.pipeline_mode<synchronous>, transform_indices = @transform_5, window_bounds = array<i64: 256, 128>}, {pipeline_mode = #tpu.pipeline_mode<synchronous>, transform_indices = @transform_6, window_bounds = array<i64: 1, 128>}, {transform_indices = @transform_7, window_bounds = array<i64: 1, 16, 16, 128>}]} {
    %cst = arith.constant 0.000000e+00 : bf16
    %0 = vector.broadcast %cst : bf16 to vector<18x32x128xbf16>
    %c0 = arith.constant 0 : index
    %c0_0 = arith.constant 0 : index
    %c0_1 = arith.constant 0 : index
    %1 = vector.load %arg9[%c0, %c0_0, %c0_1] : memref<18x32x128xbf16, #tpu.memory_space<vmem>>, vector<18x32x128xbf16>
    tpu.vector_store %arg9[%c0, %c0_0, %c0_1], %0 {strides = array<i32>} : memref<18x32x128xbf16, #tpu.memory_space<vmem>>, vector<18x32x128xbf16>,
    %c0_i32 = arith.constant 0 : i32
    %c8_i32 = arith.constant 8 : i32
    %2 = arith.muli %c0_i32, %c8_i32 : i32
    %c0_2 = arith.constant 0 : index
    %3 = arith.index_cast %2 : i32 to index
    %c0_3 = arith.constant 0 : index
    %c0_4 = arith.constant 0 : index
    %4 = vector.load %arg1[%c0_2, %3, %c0_3, %c0_4] : memref<1x16x16x128xbf16, #tpu.memory_space<vmem>>, vector<1x8x16x128xbf16>
    %5 = vector.shape_cast %4 : vector<1x8x16x128xbf16> to vector<8x16x128xbf16>
    %6 = vector.shape_cast %5 : vector<8x16x128xbf16> to vector<128x128xbf16>
    %c0_5 = arith.constant 0 : index
    %c0_6 = arith.constant 0 : index
    %7 = vector.load %arg2[%c0_5, %c0_6] : memref<128x128xbf16, #tpu.memory_space<vmem>>, vector<128x128xbf16>
    %cst_7 = arith.constant dense<0.000000e+00> : vector<128x128xf32>
    %8 = tpu.matmul %6, %7, %cst_7 {dimension_numbers = #tpu.dot_dimension_numbers<[1], [0], [0], [1], [0, 0, 1, 1], [], []>} : vector<128x128xbf16>, vector<128x128xbf16>, vector<128x128xf32> -> vector<128x128xf32>
    %c0_8 = arith.constant 0 : index
    %c0_9 = arith.constant 0 : index
    %9 = vector.load %arg3[%c0_8, %c0_9] : memref<1x128xf32, #tpu.memory_space<vmem>>, vector<1x128xf32>
    %10 = vector.broadcast %9 : vector<1x128xf32> to vector<128x128xf32>
    %11 = arith.addf %8, %10 : vector<128x128xf32>
    %cst_10 = arith.constant 0.000000e+00 : f32
    %12 = vector.broadcast %cst_10 : f32 to vector<128x128xf32>
    %13 = arith.maximumf %11, %12 : vector<128x128xf32>
    %14 = arith.truncf %13 : vector<128x128xf32> to vector<128x128xbf16>
    %15 = vector.shape_cast %14 : vector<128x128xbf16> to vector<8x16x128xbf16>
    %c1_i32 = arith.constant 1 : i32
    %16 = arith.addi %2, %c1_i32 : i32
    %17 = arith.index_cast %16 : i32 to index
    %c8 = arith.constant 8 : index
    %c0_11 = arith.constant 0 : index
    %18 = vector.load %arg9[%17, %c8, %c0_11] : memref<18x32x128xbf16, #tpu.memory_space<vmem>>, vector<8x16x128xbf16>
    tpu.vector_store %arg9[%17, %c8, %c0_11], %15 {strides = array<i32>} : memref<18x32x128xbf16, #tpu.memory_space<vmem>>, vector<8x16x128xbf16>,
    %c1_i32_12 = arith.constant 1 : i32
    %c8_i32_13 = arith.constant 8 : i32
    %19 = arith.muli %c1_i32_12, %c8_i32_13 : i32
    %c0_14 = arith.constant 0 : index
    %20 = arith.index_cast %19 : i32 to index
    %c0_15 = arith.constant 0 : index
    %c0_16 = arith.constant 0 : index
    %21 = vector.load %arg1[%c0_14, %20, %c0_15, %c0_16] : memref<1x16x16x128xbf16, #tpu.memory_space<vmem>>, vector<1x8x16x128xbf16>
    %22 = vector.shape_cast %21 : vector<1x8x16x128xbf16> to vector<8x16x128xbf16>
    %23 = vector.shape_cast %22 : vector<8x16x128xbf16> to vector<128x128xbf16>
    %c0_17 = arith.constant 0 : index
    %c0_18 = arith.constant 0 : index
    %24 = vector.load %arg2[%c0_17, %c0_18] : memref<128x128xbf16, #tpu.memory_space<vmem>>, vector<128x128xbf16>
    %cst_19 = arith.constant dense<0.000000e+00> : vector<128x128xf32>
    %25 = tpu.matmul %23, %24, %cst_19 {dimension_numbers = #tpu.dot_dimension_numbers<[1], [0], [0], [1], [0, 0, 1, 1], [], []>} : vector<128x128xbf16>, vector<128x128xbf16>, vector<128x128xf32> -> vector<128x128xf32>
    %c0_20 = arith.constant 0 : index
    %c0_21 = arith.constant 0 : index
    %26 = vector.load %arg3[%c0_20, %c0_21] : memref<1x128xf32, #tpu.memory_space<vmem>>, vector<1x128xf32>
    %27 = vector.broadcast %26 : vector<1x128xf32> to vector<128x128xf32>
    %28 = arith.addf %25, %27 : vector<128x128xf32>
    %cst_22 = arith.constant 0.000000e+00 : f32
    %29 = vector.broadcast %cst_22 : f32 to vector<128x128xf32>
    %30 = arith.maximumf %28, %29 : vector<128x128xf32>
    %31 = arith.truncf %30 : vector<128x128xf32> to vector<128x128xbf16>
    %32 = vector.shape_cast %31 : vector<128x128xbf16> to vector<8x16x128xbf16>
    %c1_i32_23 = arith.constant 1 : i32
    %33 = arith.addi %19, %c1_i32_23 : i32
    %34 = arith.index_cast %33 : i32 to index
    %c8_24 = arith.constant 8 : index
    %c0_25 = arith.constant 0 : index
    %35 = vector.load %arg9[%34, %c8_24, %c0_25] : memref<18x32x128xbf16, #tpu.memory_space<vmem>>, vector<8x16x128xbf16>
    tpu.vector_store %arg9[%34, %c8_24, %c0_25], %32 {strides = array<i32>} : memref<18x32x128xbf16, #tpu.memory_space<vmem>>, vector<8x16x128xbf16>,
    %c2_i32 = arith.constant 2 : i32
    %c0_i32_26 = arith.constant 0 : i32
    %c8_i32_27 = arith.constant 8 : i32
    %36 = arith.muli %c0_i32_26, %c8_i32_27 : i32
    %cst_28 = arith.constant 0.000000e+00 : f32
    %37 = vector.broadcast %cst_28 : f32 to vector<8x16x128xf32>
    %c0_i32_29 = arith.constant 0 : i32
    %38 = arith.addi %36, %c0_i32_29 : i32
    %39 = arith.index_cast %38 : i32 to index
    %c7 = arith.constant 7 : index
    %c0_30 = arith.constant 0 : index
    %40 = vector.load %arg9[%39, %c7, %c0_30] : memref<18x32x128xbf16, #tpu.memory_space<vmem>>, vector<8x16x128xbf16>
    %41 = arith.extf %40 : vector<8x16x128xbf16> to vector<8x16x128xf32>
    %c0_31 = arith.constant 0 : index
    %c0_32 = arith.constant 0 : index
    %42 = vector.load %arg4[%c0_31, %c0_32] : memref<9x128xf32, #tpu.memory_space<vmem>>, vector<1x128xf32>
    %43 = vector.shape_cast %42 : vector<1x128xf32> to vector<128xf32>
    %44 = vector.shape_cast %43 : vector<128xf32> to vector<1x1x128xf32>
    %45 = vector.broadcast %44 : vector<1x1x128xf32> to vector<8x16x128xf32>
    %46 = arith.mulf %41, %45 : vector<8x16x128xf32>
    %47 = arith.addf %37, %46 : vector<8x16x128xf32>
    %c0_i32_33 = arith.constant 0 : i32
    %48 = arith.addi %36, %c0_i32_33 : i32
    %49 = arith.index_cast %48 : i32 to index
    %c8_34 = arith.constant 8 : index
    %c0_35 = arith.constant 0 : index
    %50 = vector.load %arg9[%49, %c8_34, %c0_35] : memref<18x32x128xbf16, #tpu.memory_space<vmem>>, vector<8x16x128xbf16>
    %51 = arith.extf %50 : vector<8x16x128xbf16> to vector<8x16x128xf32>
    %c1 = arith.constant 1 : index
    %c0_36 = arith.constant 0 : index
    %52 = vector.load %arg4[%c1, %c0_36] : memref<9x128xf32, #tpu.memory_space<vmem>>, vector<1x128xf32>
    %53 = vector.shape_cast %52 : vector<1x128xf32> to vector<128xf32>
    %54 = vector.shape_cast %53 : vector<128xf32> to vector<1x1x128xf32>
    %55 = vector.broadcast %54 : vector<1x1x128xf32> to vector<8x16x128xf32>
    %56 = arith.mulf %51, %55 : vector<8x16x128xf32>
    %57 = arith.addf %47, %56 : vector<8x16x128xf32>
    %c0_i32_37 = arith.constant 0 : i32
    %58 = arith.addi %36, %c0_i32_37 : i32
    %59 = arith.index_cast %58 : i32 to index
    %c9 = arith.constant 9 : index
    %c0_38 = arith.constant 0 : index
    %60 = vector.load %arg9[%59, %c9, %c0_38] : memref<18x32x128xbf16, #tpu.memory_space<vmem>>, vector<8x16x128xbf16>
    %61 = arith.extf %60 : vector<8x16x128xbf16> to vector<8x16x128xf32>
    %c2 = arith.constant 2 : index
    %c0_39 = arith.constant 0 : index
    %62 = vector.load %arg4[%c2, %c0_39] : memref<9x128xf32, #tpu.memory_space<vmem>>, vector<1x128xf32>
    %63 = vector.shape_cast %62 : vector<1x128xf32> to vector<128xf32>
    %64 = vector.shape_cast %63 : vector<128xf32> to vector<1x1x128xf32>
    %65 = vector.broadcast %64 : vector<1x1x128xf32> to vector<8x16x128xf32>
    %66 = arith.mulf %61, %65 : vector<8x16x128xf32>
    %67 = arith.addf %57, %66 : vector<8x16x128xf32>
    %c1_i32_40 = arith.constant 1 : i32
    %68 = arith.addi %36, %c1_i32_40 : i32
    %69 = arith.index_cast %68 : i32 to index
    %c7_41 = arith.constant 7 : index
    %c0_42 = arith.constant 0 : index
    %70 = vector.load %arg9[%69, %c7_41, %c0_42] : memref<18x32x128xbf16, #tpu.memory_space<vmem>>, vector<8x16x128xbf16>
    %71 = arith.extf %70 : vector<8x16x128xbf16> to vector<8x16x128xf32>
    %c3 = arith.constant 3 : index
    %c0_43 = arith.constant 0 : index
    %72 = vector.load %arg4[%c3, %c0_43] : memref<9x128xf32, #tpu.memory_space<vmem>>, vector<1x128xf32>
    %73 = vector.shape_cast %72 : vector<1x128xf32> to vector<128xf32>
    %74 = vector.shape_cast %73 : vector<128xf32> to vector<1x1x128xf32>
    %75 = vector.broadcast %74 : vector<1x1x128xf32> to vector<8x16x128xf32>
    %76 = arith.mulf %71, %75 : vector<8x16x128xf32>
    %77 = arith.addf %67, %76 : vector<8x16x128xf32>
    %c1_i32_44 = arith.constant 1 : i32
    %78 = arith.addi %36, %c1_i32_44 : i32
    %79 = arith.index_cast %78 : i32 to index
    %c8_45 = arith.constant 8 : index
    %c0_46 = arith.constant 0 : index
    %80 = vector.load %arg9[%79, %c8_45, %c0_46] : memref<18x32x128xbf16, #tpu.memory_space<vmem>>, vector<8x16x128xbf16>
    %81 = arith.extf %80 : vector<8x16x128xbf16> to vector<8x16x128xf32>
    %c4 = arith.constant 4 : index
    %c0_47 = arith.constant 0 : index
    %82 = vector.load %arg4[%c4, %c0_47] : memref<9x128xf32, #tpu.memory_space<vmem>>, vector<1x128xf32>
    %83 = vector.shape_cast %82 : vector<1x128xf32> to vector<128xf32>
    %84 = vector.shape_cast %83 : vector<128xf32> to vector<1x1x128xf32>
    %85 = vector.broadcast %84 : vector<1x1x128xf32> to vector<8x16x128xf32>
    %86 = arith.mulf %81, %85 : vector<8x16x128xf32>
    %87 = arith.addf %77, %86 : vector<8x16x128xf32>
    %c1_i32_48 = arith.constant 1 : i32
    %88 = arith.addi %36, %c1_i32_48 : i32
    %89 = arith.index_cast %88 : i32 to index
    %c9_49 = arith.constant 9 : index
    %c0_50 = arith.constant 0 : index
    %90 = vector.load %arg9[%89, %c9_49, %c0_50] : memref<18x32x128xbf16, #tpu.memory_space<vmem>>, vector<8x16x128xbf16>
    %91 = arith.extf %90 : vector<8x16x128xbf16> to vector<8x16x128xf32>
    %c5 = arith.constant 5 : index
    %c0_51 = arith.constant 0 : index
    %92 = vector.load %arg4[%c5, %c0_51] : memref<9x128xf32, #tpu.memory_space<vmem>>, vector<1x128xf32>
    %93 = vector.shape_cast %92 : vector<1x128xf32> to vector<128xf32>
    %94 = vector.shape_cast %93 : vector<128xf32> to vector<1x1x128xf32>
    %95 = vector.broadcast %94 : vector<1x1x128xf32> to vector<8x16x128xf32>
    %96 = arith.mulf %91, %95 : vector<8x16x128xf32>
    %97 = arith.addf %87, %96 : vector<8x16x128xf32>
    %c2_i32_52 = arith.constant 2 : i32
    %98 = arith.addi %36, %c2_i32_52 : i32
    %99 = arith.index_cast %98 : i32 to index
    %c7_53 = arith.constant 7 : index
    %c0_54 = arith.constant 0 : index
    %100 = vector.load %arg9[%99, %c7_53, %c0_54] : memref<18x32x128xbf16, #tpu.memory_space<vmem>>, vector<8x16x128xbf16>
    %101 = arith.extf %100 : vector<8x16x128xbf16> to vector<8x16x128xf32>
    %c6 = arith.constant 6 : index
    %c0_55 = arith.constant 0 : index
    %102 = vector.load %arg4[%c6, %c0_55] : memref<9x128xf32, #tpu.memory_space<vmem>>, vector<1x128xf32>
    %103 = vector.shape_cast %102 : vector<1x128xf32> to vector<128xf32>
    %104 = vector.shape_cast %103 : vector<128xf32> to vector<1x1x128xf32>
    %105 = vector.broadcast %104 : vector<1x1x128xf32> to vector<8x16x128xf32>
    %106 = arith.mulf %101, %105 : vector<8x16x128xf32>
    %107 = arith.addf %97, %106 : vector<8x16x128xf32>
    %c2_i32_56 = arith.constant 2 : i32
    %108 = arith.addi %36, %c2_i32_56 : i32
    %109 = arith.index_cast %108 : i32 to index
    %c8_57 = arith.constant 8 : index
    %c0_58 = arith.constant 0 : index
    %110 = vector.load %arg9[%109, %c8_57, %c0_58] : memref<18x32x128xbf16, #tpu.memory_space<vmem>>, vector<8x16x128xbf16>
    %111 = arith.extf %110 : vector<8x16x128xbf16> to vector<8x16x128xf32>
    %c7_59 = arith.constant 7 : index
    %c0_60 = arith.constant 0 : index
    %112 = vector.load %arg4[%c7_59, %c0_60] : memref<9x128xf32, #tpu.memory_space<vmem>>, vector<1x128xf32>
    %113 = vector.shape_cast %112 : vector<1x128xf32> to vector<128xf32>
    %114 = vector.shape_cast %113 : vector<128xf32> to vector<1x1x128xf32>
    %115 = vector.broadcast %114 : vector<1x1x128xf32> to vector<8x16x128xf32>
    %116 = arith.mulf %111, %115 : vector<8x16x128xf32>
    %117 = arith.addf %107, %116 : vector<8x16x128xf32>
    %c2_i32_61 = arith.constant 2 : i32
    %118 = arith.addi %36, %c2_i32_61 : i32
    %119 = arith.index_cast %118 : i32 to index
    %c9_62 = arith.constant 9 : index
    %c0_63 = arith.constant 0 : index
    %120 = vector.load %arg9[%119, %c9_62, %c0_63] : memref<18x32x128xbf16, #tpu.memory_space<vmem>>, vector<8x16x128xbf16>
    %121 = arith.extf %120 : vector<8x16x128xbf16> to vector<8x16x128xf32>
    %c8_64 = arith.constant 8 : index
    %c0_65 = arith.constant 0 : index
    %122 = vector.load %arg4[%c8_64, %c0_65] : memref<9x128xf32, #tpu.memory_space<vmem>>, vector<1x128xf32>
    %123 = vector.shape_cast %122 : vector<1x128xf32> to vector<128xf32>
    %124 = vector.shape_cast %123 : vector<128xf32> to vector<1x1x128xf32>
    %125 = vector.broadcast %124 : vector<1x1x128xf32> to vector<8x16x128xf32>
    %126 = arith.mulf %121, %125 : vector<8x16x128xf32>
    %127 = arith.addf %117, %126 : vector<8x16x128xf32>
    %c0_66 = arith.constant 0 : index
    %c0_67 = arith.constant 0 : index
    %128 = vector.load %arg5[%c0_66, %c0_67] : memref<1x128xf32, #tpu.memory_space<vmem>>, vector<1x128xf32>
    %129 = vector.shape_cast %128 : vector<1x128xf32> to vector<1x1x128xf32>
    %130 = vector.broadcast %129 : vector<1x1x128xf32> to vector<8x16x128xf32>
    %131 = arith.addf %127, %130 : vector<8x16x128xf32>
    %cst_68 = arith.constant 0.000000e+00 : f32
    %132 = vector.broadcast %cst_68 : f32 to vector<8x16x128xf32>
    %133 = arith.maximumf %131, %132 : vector<8x16x128xf32>
    %134 = arith.truncf %133 : vector<8x16x128xf32> to vector<8x16x128xbf16>
    %135 = vector.shape_cast %134 : vector<8x16x128xbf16> to vector<128x128xbf16>
    %c1_i32_69 = arith.constant 1 : i32
    %136 = arith.addi %36, %c1_i32_69 : i32
    %137 = arith.index_cast %136 : i32 to index
    %c8_70 = arith.constant 8 : index
    %c0_71 = arith.constant 0 : index
    %138 = vector.load %arg9[%137, %c8_70, %c0_71] : memref<18x32x128xbf16, #tpu.memory_space<vmem>>, vector<8x16x128xbf16>
    %139 = vector.shape_cast %138 : vector<8x16x128xbf16> to vector<128x128xbf16>
    %140 = tpu.concatenate %139, %135 in 1 : vector<128x128xbf16>, vector<128x128xbf16> -> vector<128x256xbf16>
    %c0_72 = arith.constant 0 : index
    %c0_73 = arith.constant 0 : index
    %141 = vector.load %arg6[%c0_72, %c0_73] : memref<256x128xbf16, #tpu.memory_space<vmem>>, vector<256x128xbf16>
    %cst_74 = arith.constant dense<0.000000e+00> : vector<128x128xf32>
    %142 = tpu.matmul %140, %141, %cst_74 {dimension_numbers = #tpu.dot_dimension_numbers<[1], [0], [0], [1], [0, 0, 1, 1], [], []>} : vector<128x256xbf16>, vector<256x128xbf16>, vector<128x128xf32> -> vector<128x128xf32>
    %c0_75 = arith.constant 0 : index
    %c0_76 = arith.constant 0 : index
    %143 = vector.load %arg7[%c0_75, %c0_76] : memref<1x128xf32, #tpu.memory_space<vmem>>, vector<1x128xf32>
    %144 = vector.broadcast %143 : vector<1x128xf32> to vector<128x128xf32>
    %145 = arith.addf %142, %144 : vector<128x128xf32>
    %cst_77 = arith.constant 0.000000e+00 : f32
    %146 = vector.broadcast %cst_77 : f32 to vector<128x128xf32>
    %147 = arith.maximumf %145, %146 : vector<128x128xf32>
    %148 = vector.shape_cast %147 : vector<128x128xf32> to vector<8x16x128xf32>
    %149 = arith.truncf %148 : vector<8x16x128xf32> to vector<8x16x128xbf16>
    %c0_78 = arith.constant 0 : index
    %150 = arith.index_cast %36 : i32 to index
    %c0_79 = arith.constant 0 : index
    %c0_80 = arith.constant 0 : index
    %151 = vector.load %arg8[%c0_78, %150, %c0_79, %c0_80] : memref<1x16x16x128xbf16, #tpu.memory_space<vmem>>, vector<1x8x16x128xbf16>
    %152 = vector.shape_cast %151 : vector<1x8x16x128xbf16> to vector<8x16x128xbf16>
    %153 = vector.shape_cast %149 : vector<8x16x128xbf16> to vector<1x8x16x128xbf16>
    tpu.vector_store %arg8[%c0_78, %150, %c0_79, %c0_80], %153 {strides = array<i32>} : memref<1x16x16x128xbf16, #tpu.memory_space<vmem>>, vector<1x8x16x128xbf16>,
    %c1_i32_81 = arith.constant 1 : i32
    %c8_i32_82 = arith.constant 8 : i32
    %154 = arith.muli %c1_i32_81, %c8_i32_82 : i32
    %cst_83 = arith.constant 0.000000e+00 : f32
    %155 = vector.broadcast %cst_83 : f32 to vector<8x16x128xf32>
    %c0_i32_84 = arith.constant 0 : i32
    %156 = arith.addi %154, %c0_i32_84 : i32
    %157 = arith.index_cast %156 : i32 to index
    %c7_85 = arith.constant 7 : index
    %c0_86 = arith.constant 0 : index
    %158 = vector.load %arg9[%157, %c7_85, %c0_86] : memref<18x32x128xbf16, #tpu.memory_space<vmem>>, vector<8x16x128xbf16>
    %159 = arith.extf %158 : vector<8x16x128xbf16> to vector<8x16x128xf32>
    %c0_87 = arith.constant 0 : index
    %c0_88 = arith.constant 0 : index
    %160 = vector.load %arg4[%c0_87, %c0_88] : memref<9x128xf32, #tpu.memory_space<vmem>>, vector<1x128xf32>
    %161 = vector.shape_cast %160 : vector<1x128xf32> to vector<128xf32>
    %162 = vector.shape_cast %161 : vector<128xf32> to vector<1x1x128xf32>
    %163 = vector.broadcast %162 : vector<1x1x128xf32> to vector<8x16x128xf32>
    %164 = arith.mulf %159, %163 : vector<8x16x128xf32>
    %165 = arith.addf %155, %164 : vector<8x16x128xf32>
    %c0_i32_89 = arith.constant 0 : i32
    %166 = arith.addi %154, %c0_i32_89 : i32
    %167 = arith.index_cast %166 : i32 to index
    %c8_90 = arith.constant 8 : index
    %c0_91 = arith.constant 0 : index
    %168 = vector.load %arg9[%167, %c8_90, %c0_91] : memref<18x32x128xbf16, #tpu.memory_space<vmem>>, vector<8x16x128xbf16>
    %169 = arith.extf %168 : vector<8x16x128xbf16> to vector<8x16x128xf32>
    %c1_92 = arith.constant 1 : index
    %c0_93 = arith.constant 0 : index
    %170 = vector.load %arg4[%c1_92, %c0_93] : memref<9x128xf32, #tpu.memory_space<vmem>>, vector<1x128xf32>
    %171 = vector.shape_cast %170 : vector<1x128xf32> to vector<128xf32>
    %172 = vector.shape_cast %171 : vector<128xf32> to vector<1x1x128xf32>
    %173 = vector.broadcast %172 : vector<1x1x128xf32> to vector<8x16x128xf32>
    %174 = arith.mulf %169, %173 : vector<8x16x128xf32>
    %175 = arith.addf %165, %174 : vector<8x16x128xf32>
    %c0_i32_94 = arith.constant 0 : i32
    %176 = arith.addi %154, %c0_i32_94 : i32
    %177 = arith.index_cast %176 : i32 to index
    %c9_95 = arith.constant 9 : index
    %c0_96 = arith.constant 0 : index
    %178 = vector.load %arg9[%177, %c9_95, %c0_96] : memref<18x32x128xbf16, #tpu.memory_space<vmem>>, vector<8x16x128xbf16>
    %179 = arith.extf %178 : vector<8x16x128xbf16> to vector<8x16x128xf32>
    %c2_97 = arith.constant 2 : index
    %c0_98 = arith.constant 0 : index
    %180 = vector.load %arg4[%c2_97, %c0_98] : memref<9x128xf32, #tpu.memory_space<vmem>>, vector<1x128xf32>
    %181 = vector.shape_cast %180 : vector<1x128xf32> to vector<128xf32>
    %182 = vector.shape_cast %181 : vector<128xf32> to vector<1x1x128xf32>
    %183 = vector.broadcast %182 : vector<1x1x128xf32> to vector<8x16x128xf32>
    %184 = arith.mulf %179, %183 : vector<8x16x128xf32>
    %185 = arith.addf %175, %184 : vector<8x16x128xf32>
    %c1_i32_99 = arith.constant 1 : i32
    %186 = arith.addi %154, %c1_i32_99 : i32
    %187 = arith.index_cast %186 : i32 to index
    %c7_100 = arith.constant 7 : index
    %c0_101 = arith.constant 0 : index
    %188 = vector.load %arg9[%187, %c7_100, %c0_101] : memref<18x32x128xbf16, #tpu.memory_space<vmem>>, vector<8x16x128xbf16>
    %189 = arith.extf %188 : vector<8x16x128xbf16> to vector<8x16x128xf32>
    %c3_102 = arith.constant 3 : index
    %c0_103 = arith.constant 0 : index
    %190 = vector.load %arg4[%c3_102, %c0_103] : memref<9x128xf32, #tpu.memory_space<vmem>>, vector<1x128xf32>
    %191 = vector.shape_cast %190 : vector<1x128xf32> to vector<128xf32>
    %192 = vector.shape_cast %191 : vector<128xf32> to vector<1x1x128xf32>
    %193 = vector.broadcast %192 : vector<1x1x128xf32> to vector<8x16x128xf32>
    %194 = arith.mulf %189, %193 : vector<8x16x128xf32>
    %195 = arith.addf %185, %194 : vector<8x16x128xf32>
    %c1_i32_104 = arith.constant 1 : i32
    %196 = arith.addi %154, %c1_i32_104 : i32
    %197 = arith.index_cast %196 : i32 to index
    %c8_105 = arith.constant 8 : index
    %c0_106 = arith.constant 0 : index
    %198 = vector.load %arg9[%197, %c8_105, %c0_106] : memref<18x32x128xbf16, #tpu.memory_space<vmem>>, vector<8x16x128xbf16>
    %199 = arith.extf %198 : vector<8x16x128xbf16> to vector<8x16x128xf32>
    %c4_107 = arith.constant 4 : index
    %c0_108 = arith.constant 0 : index
    %200 = vector.load %arg4[%c4_107, %c0_108] : memref<9x128xf32, #tpu.memory_space<vmem>>, vector<1x128xf32>
    %201 = vector.shape_cast %200 : vector<1x128xf32> to vector<128xf32>
    %202 = vector.shape_cast %201 : vector<128xf32> to vector<1x1x128xf32>
    %203 = vector.broadcast %202 : vector<1x1x128xf32> to vector<8x16x128xf32>
    %204 = arith.mulf %199, %203 : vector<8x16x128xf32>
    %205 = arith.addf %195, %204 : vector<8x16x128xf32>
    %c1_i32_109 = arith.constant 1 : i32
    %206 = arith.addi %154, %c1_i32_109 : i32
    %207 = arith.index_cast %206 : i32 to index
    %c9_110 = arith.constant 9 : index
    %c0_111 = arith.constant 0 : index
    %208 = vector.load %arg9[%207, %c9_110, %c0_111] : memref<18x32x128xbf16, #tpu.memory_space<vmem>>, vector<8x16x128xbf16>
    %209 = arith.extf %208 : vector<8x16x128xbf16> to vector<8x16x128xf32>
    %c5_112 = arith.constant 5 : index
    %c0_113 = arith.constant 0 : index
    %210 = vector.load %arg4[%c5_112, %c0_113] : memref<9x128xf32, #tpu.memory_space<vmem>>, vector<1x128xf32>
    %211 = vector.shape_cast %210 : vector<1x128xf32> to vector<128xf32>
    %212 = vector.shape_cast %211 : vector<128xf32> to vector<1x1x128xf32>
    %213 = vector.broadcast %212 : vector<1x1x128xf32> to vector<8x16x128xf32>
    %214 = arith.mulf %209, %213 : vector<8x16x128xf32>
    %215 = arith.addf %205, %214 : vector<8x16x128xf32>
    %c2_i32_114 = arith.constant 2 : i32
    %216 = arith.addi %154, %c2_i32_114 : i32
    %217 = arith.index_cast %216 : i32 to index
    %c7_115 = arith.constant 7 : index
    %c0_116 = arith.constant 0 : index
    %218 = vector.load %arg9[%217, %c7_115, %c0_116] : memref<18x32x128xbf16, #tpu.memory_space<vmem>>, vector<8x16x128xbf16>
    %219 = arith.extf %218 : vector<8x16x128xbf16> to vector<8x16x128xf32>
    %c6_117 = arith.constant 6 : index
    %c0_118 = arith.constant 0 : index
    %220 = vector.load %arg4[%c6_117, %c0_118] : memref<9x128xf32, #tpu.memory_space<vmem>>, vector<1x128xf32>
    %221 = vector.shape_cast %220 : vector<1x128xf32> to vector<128xf32>
    %222 = vector.shape_cast %221 : vector<128xf32> to vector<1x1x128xf32>
    %223 = vector.broadcast %222 : vector<1x1x128xf32> to vector<8x16x128xf32>
    %224 = arith.mulf %219, %223 : vector<8x16x128xf32>
    %225 = arith.addf %215, %224 : vector<8x16x128xf32>
    %c2_i32_119 = arith.constant 2 : i32
    %226 = arith.addi %154, %c2_i32_119 : i32
    %227 = arith.index_cast %226 : i32 to index
    %c8_120 = arith.constant 8 : index
    %c0_121 = arith.constant 0 : index
    %228 = vector.load %arg9[%227, %c8_120, %c0_121] : memref<18x32x128xbf16, #tpu.memory_space<vmem>>, vector<8x16x128xbf16>
    %229 = arith.extf %228 : vector<8x16x128xbf16> to vector<8x16x128xf32>
    %c7_122 = arith.constant 7 : index
    %c0_123 = arith.constant 0 : index
    %230 = vector.load %arg4[%c7_122, %c0_123] : memref<9x128xf32, #tpu.memory_space<vmem>>, vector<1x128xf32>
    %231 = vector.shape_cast %230 : vector<1x128xf32> to vector<128xf32>
    %232 = vector.shape_cast %231 : vector<128xf32> to vector<1x1x128xf32>
    %233 = vector.broadcast %232 : vector<1x1x128xf32> to vector<8x16x128xf32>
    %234 = arith.mulf %229, %233 : vector<8x16x128xf32>
    %235 = arith.addf %225, %234 : vector<8x16x128xf32>
    %c2_i32_124 = arith.constant 2 : i32
    %236 = arith.addi %154, %c2_i32_124 : i32
    %237 = arith.index_cast %236 : i32 to index
    %c9_125 = arith.constant 9 : index
    %c0_126 = arith.constant 0 : index
    %238 = vector.load %arg9[%237, %c9_125, %c0_126] : memref<18x32x128xbf16, #tpu.memory_space<vmem>>, vector<8x16x128xbf16>
    %239 = arith.extf %238 : vector<8x16x128xbf16> to vector<8x16x128xf32>
    %c8_127 = arith.constant 8 : index
    %c0_128 = arith.constant 0 : index
    %240 = vector.load %arg4[%c8_127, %c0_128] : memref<9x128xf32, #tpu.memory_space<vmem>>, vector<1x128xf32>
    %241 = vector.shape_cast %240 : vector<1x128xf32> to vector<128xf32>
    %242 = vector.shape_cast %241 : vector<128xf32> to vector<1x1x128xf32>
    %243 = vector.broadcast %242 : vector<1x1x128xf32> to vector<8x16x128xf32>
    %244 = arith.mulf %239, %243 : vector<8x16x128xf32>
    %245 = arith.addf %235, %244 : vector<8x16x128xf32>
    %c0_129 = arith.constant 0 : index
    %c0_130 = arith.constant 0 : index
    %246 = vector.load %arg5[%c0_129, %c0_130] : memref<1x128xf32, #tpu.memory_space<vmem>>, vector<1x128xf32>
    %247 = vector.shape_cast %246 : vector<1x128xf32> to vector<1x1x128xf32>
    %248 = vector.broadcast %247 : vector<1x1x128xf32> to vector<8x16x128xf32>
    %249 = arith.addf %245, %248 : vector<8x16x128xf32>
    %cst_131 = arith.constant 0.000000e+00 : f32
    %250 = vector.broadcast %cst_131 : f32 to vector<8x16x128xf32>
    %251 = arith.maximumf %249, %250 : vector<8x16x128xf32>
    %252 = arith.truncf %251 : vector<8x16x128xf32> to vector<8x16x128xbf16>
    %253 = vector.shape_cast %252 : vector<8x16x128xbf16> to vector<128x128xbf16>
    %c1_i32_132 = arith.constant 1 : i32
    %254 = arith.addi %154, %c1_i32_132 : i32
    %255 = arith.index_cast %254 : i32 to index
    %c8_133 = arith.constant 8 : index
    %c0_134 = arith.constant 0 : index
    %256 = vector.load %arg9[%255, %c8_133, %c0_134] : memref<18x32x128xbf16, #tpu.memory_space<vmem>>, vector<8x16x128xbf16>
    %257 = vector.shape_cast %256 : vector<8x16x128xbf16> to vector<128x128xbf16>
    %258 = tpu.concatenate %257, %253 in 1 : vector<128x128xbf16>, vector<128x128xbf16> -> vector<128x256xbf16>
    %c0_135 = arith.constant 0 : index
    %c0_136 = arith.constant 0 : index
    %259 = vector.load %arg6[%c0_135, %c0_136] : memref<256x128xbf16, #tpu.memory_space<vmem>>, vector<256x128xbf16>
    %cst_137 = arith.constant dense<0.000000e+00> : vector<128x128xf32>
    %260 = tpu.matmul %258, %259, %cst_137 {dimension_numbers = #tpu.dot_dimension_numbers<[1], [0], [0], [1], [0, 0, 1, 1], [], []>} : vector<128x256xbf16>, vector<256x128xbf16>, vector<128x128xf32> -> vector<128x128xf32>
    %c0_138 = arith.constant 0 : index
    %c0_139 = arith.constant 0 : index
    %261 = vector.load %arg7[%c0_138, %c0_139] : memref<1x128xf32, #tpu.memory_space<vmem>>, vector<1x128xf32>
    %262 = vector.broadcast %261 : vector<1x128xf32> to vector<128x128xf32>
    %263 = arith.addf %260, %262 : vector<128x128xf32>
    %cst_140 = arith.constant 0.000000e+00 : f32
    %264 = vector.broadcast %cst_140 : f32 to vector<128x128xf32>
    %265 = arith.maximumf %263, %264 : vector<128x128xf32>
    %266 = vector.shape_cast %265 : vector<128x128xf32> to vector<8x16x128xf32>
    %267 = arith.truncf %266 : vector<8x16x128xf32> to vector<8x16x128xbf16>
    %c0_141 = arith.constant 0 : index
    %268 = arith.index_cast %154 : i32 to index
    %c0_142 = arith.constant 0 : index
    %c0_143 = arith.constant 0 : index
    %269 = vector.load %arg8[%c0_141, %268, %c0_142, %c0_143] : memref<1x16x16x128xbf16, #tpu.memory_space<vmem>>, vector<1x8x16x128xbf16>
    %270 = vector.shape_cast %269 : vector<1x8x16x128xbf16> to vector<8x16x128xbf16>
    %271 = vector.shape_cast %267 : vector<8x16x128xbf16> to vector<1x8x16x128xbf16>
    tpu.vector_store %arg8[%c0_141, %268, %c0_142, %c0_143], %271 {strides = array<i32>} : memref<1x16x16x128xbf16, #tpu.memory_space<vmem>>, vector<1x8x16x128xbf16>,
    %c2_i32_144 = arith.constant 2 : i32
    return
  }
  func.func @transform_0(%arg0: i32) -> (i32, i32, i32, i32) {
    %c0_i32 = arith.constant 0 : i32
    %c0_i32_0 = arith.constant 0 : i32
    %c0_i32_1 = arith.constant 0 : i32
    %c0_i32_2 = arith.constant 0 : i32
    return %arg0, %c0_i32, %c0_i32_0, %c0_i32_1 : i32, i32, i32, i32
  }
  func.func @transform_1(%arg0: i32) -> (i32, i32) {
    %c0_i32 = arith.constant 0 : i32
    %c0_i32_0 = arith.constant 0 : i32
    %c0_i32_1 = arith.constant 0 : i32
    return %c0_i32, %c0_i32_0 : i32, i32
  }
  func.func @transform_2(%arg0: i32) -> (i32, i32) {
    %c0_i32 = arith.constant 0 : i32
    %c0_i32_0 = arith.constant 0 : i32
    %c0_i32_1 = arith.constant 0 : i32
    return %c0_i32, %c0_i32_0 : i32, i32
  }
  func.func @transform_3(%arg0: i32) -> (i32, i32) {
    %c0_i32 = arith.constant 0 : i32
    %c0_i32_0 = arith.constant 0 : i32
    %c0_i32_1 = arith.constant 0 : i32
    return %c0_i32, %c0_i32_0 : i32, i32
  }
  func.func @transform_4(%arg0: i32) -> (i32, i32) {
    %c0_i32 = arith.constant 0 : i32
    %c0_i32_0 = arith.constant 0 : i32
    %c0_i32_1 = arith.constant 0 : i32
    return %c0_i32, %c0_i32_0 : i32, i32
  }
  func.func @transform_5(%arg0: i32) -> (i32, i32) {
    %c0_i32 = arith.constant 0 : i32
    %c0_i32_0 = arith.constant 0 : i32
    %c0_i32_1 = arith.constant 0 : i32
    return %c0_i32, %c0_i32_0 : i32, i32
  }
  func.func @transform_6(%arg0: i32) -> (i32, i32) {
    %c0_i32 = arith.constant 0 : i32
    %c0_i32_0 = arith.constant 0 : i32
    %c0_i32_1 = arith.constant 0 : i32
    return %c0_i32, %c0_i32_0 : i32, i32
  }
  func.func @transform_7(%arg0: i32) -> (i32, i32, i32, i32) {
    %c0_i32 = arith.constant 0 : i32
    %c0_i32_0 = arith.constant 0 : i32
    %c0_i32_1 = arith.constant 0 : i32
    %c0_i32_2 = arith.constant 0 : i32
    return %arg0, %c0_i32, %c0_i32_0, %c0_i32_1 : i32, i32, i32, i32
  }
}

</mosaic_0001>

<bundles_post_ra>
// kernel: sse_block_forward.1
= control target key start
LH: loop header
LB: loop body
LE: loop exit
PB: predicated region body
PF: predicated region fallthrough
CT: control target
= control target key end

     0   :  { %s4942_s24 = smov 0   ;;  %s6353_s0 = inlined_call_operand.vmem [shape: bf16[2,16,16,128], index: 0, kind: input, shape index: {}]   ;;  %s6354_s1 = inlined_call_operand.vmem [shape: bf16[128,128], index: 1, kind: input, shape index: {}]   ;;  %s6355_s2 = inlined_call_operand.vmem [shape: f32[1,128], index: 2, kind: input, shape index: {}]   ;;  %s6356_s3 = inlined_call_operand.vmem [shape: f32[9,128], index: 3, kind: input, shape index: {}]   ;;  %s6357_s4 = inlined_call_operand.vmem [shape: f32[1,128], index: 4, kind: input, shape index: {}]   ;;  %s6358_s5 = inlined_call_operand.vmem [shape: bf16[256,128], index: 5, kind: input, shape index: {}]   ;;  %s6359_s6 = inlined_call_operand.vmem [shape: f32[1,128], index: 6, kind: input, shape index: {}]   ;;  %s6360_s7 = inlined_call_operand.vmem [shape: bf16[2,16,16,128], index: 7, kind: output, shape index: {}]  }
   0x1 LB: > { %s4245_s25 = sadd.s32 4294967295, %s4899_s24   ;;  %p4249_p0 = scmp.ge.s32.totalorder %s4899_s24, 1  ;;  %s4899_s24 = sphi %s4942_s24, %s17_s24  }
   0x2   : > { %p237_p1 = scmp.lt.s32.totalorder %s4899_s24, 3 }
   0x4   : > { %p238_p2 = pnand %p4249_p0, %p237_p1 }
   0x5   : > { %p269_p3 = scmp.lt.s32.totalorder (!%p238_p2), %s4245_s25, 1 }
   0x6   : > { %241 = sbr.rel (%p238_p2) target bundleno = 795 (0x31b), region = 48 }
   0xb   : > { %v4641_v0 = vld [vmem:[%s6354_s1 + $0x38] sm:$0xff]  ;;  %v4640_v2 = vld [vmem:[%s6354_s1 + $0x30] sm:$0xff]  ;;  %v4639_v4 = vld [vmem:[%s6354_s1 + $0x28] sm:$0xff]  ;;  %s6364_s25 = smov (!%p269_p3, %s4245_s25), 1  ;;  %v4901_v29 = vmov 0   ;;  %vm945_vm0 = vcmask 1046528  }
   0xc   : > { %v4657_v1 = vld [vmem:[%s6354_s1 + $0x38] sm:$0xff]  ;;  %484 = vmatpush.bf16.msra.mxu0 %v4641_v0  ;;  %4801 = vmatpush.bf16.msra.mxu2 %v4641_v0  ;;  %v4656_v3 = vld [vmem:[%s6354_s1 + $0x30] sm:$0xff]  ;;  %v4655_v5 = vld [vmem:[%s6354_s1 + $0x28] sm:$0xff]  ;;  %s4624_s8 = sshll.u32 %s6364_s25, 7  ;;  %285 = vst [vmem:[#allocation2 + $0x14] sm:$0xf] %v4901_v29 }
   0xd   : > { %715 = vmatpush.bf16.msra.mxu1 %v4657_v1  ;;  %4809 = vmatpush.bf16.msra.mxu3 %v4657_v1  ;;  %v4638_v6 = vld [vmem:[%s6354_s1 + $0x20] sm:$0xff]  ;;  %v4637_v8 = vld [vmem:[%s6354_s1 + $0x18] sm:$0xff]  ;;  %v4636_v10 = vld [vmem:[%s6354_s1 + $0x10] sm:$0xff]  ;;  %s5007_s15 = scalar_lea.vmem %s6353_s0, %s4624_s8  ;;  %280 = vst [vmem:[#allocation2] sm:$0xf] %v4901_v29  ;;  %vm1084_vm1 = vcmask 1045504   ;;  %s6191_s14 = scalar_lea.vmem %s6360_s7, %s4624_s8 }
   0xe   : > { %v4654_v7 = vld [vmem:[%s6354_s1 + $0x20] sm:$0xff]  ;;  %v4653_v9 = vld [vmem:[%s6354_s1 + $0x18] sm:$0xff]  ;;  %v4652_v11 = vld [vmem:[%s6354_s1 + $0x10] sm:$0xff]  ;;  %281 = vst [vmem:[#allocation2 + $0x4] sm:$0xf] %v4901_v29 }
   0xf   : > { %v4635_v12 = vld [vmem:[%s6354_s1 + $0x8] sm:$0xff]  ;;  %v4634_v14 = vld [vmem:[%s6354_s1] sm:$0xff]  ;;  %v4673_v23 = vld [vmem:[%s6358_s5 + $0x38] sm:$0xff]  ;;  %282 = vst [vmem:[#allocation2 + $0x8] sm:$0xf] %v4901_v29 }
  0x10   : > { %485 = vmatpush.bf16.msra.mxu0 %v4640_v2  ;;  %4802 = vmatpush.bf16.msra.mxu2 %v4640_v2  ;;  %v4651_v13 = vld [vmem:[%s6354_s1 + $0x8] sm:$0xff]  ;;  %v4650_v15 = vld [vmem:[%s6354_s1] sm:$0xff]  ;;  %v4628_v24 = vld [vmem:[%s5007_s15 + $0x10] sm:$0xff]  ;;  %283 = vst [vmem:[#allocation2 + $0xc] sm:$0xf] %v4901_v29 }
  0x11   : > { %716 = vmatpush.bf16.msra.mxu1 %v4656_v3  ;;  %4810 = vmatpush.bf16.msra.mxu3 %v4656_v3  ;;  %v4626_v16 = vld [vmem:[%s5007_s15] sm:$0xff]  ;;  %v4627_v19 = vld [vmem:[%s5007_s15 + $0x8] sm:$0xff]  ;;  %v4632_v25 = vld [vmem:[%s5007_s15 + $0x30] sm:$0xff]  ;;  %284 = vst [vmem:[#allocation2 + $0x10] sm:$0xf] %v4901_v29 }
  0x12   : > { %v4630_v17 = vld [vmem:[%s5007_s15 + $0x20] sm:$0xff]  ;;  %v4631_v20 = vld [vmem:[%s5007_s15 + $0x28] sm:$0xff]  ;;  %v4644_v26 = vld [vmem:[%s5007_s15 + $0x50] sm:$0xff]  ;;  %286 = vst [vmem:[#allocation2 + $0x18] sm:$0xf] %v4901_v29 }
  0x13   : > { %v4642_v18 = vld [vmem:[%s5007_s15 + $0x40] sm:$0xff]  ;;  %v4643_v21 = vld [vmem:[%s5007_s15 + $0x48] sm:$0xff]  ;;  %v4672_v28 = vld [vmem:[%s6358_s5 + $0x30] sm:$0xff]  ;;  %287 = vst [vmem:[#allocation2 + $0x1c] sm:$0xf] %v4901_v29 }
  0x14   : > { %486 = vmatpush.bf16.msra.mxu0 %v4639_v4  ;;  %4803 = vmatpush.bf16.msra.mxu2 %v4639_v4  ;;  %v4646_v22 = vld [vmem:[%s5007_s15 + $0x60] sm:$0xff]  ;;  %v4647_v27 = vld [vmem:[%s5007_s15 + $0x68] sm:$0xff]  ;;  %v4629_v30 = vld [vmem:[%s5007_s15 + $0x18] sm:$0xff]  ;;  %288 = vst [vmem:[#allocation2 + $0x20] sm:$0xf] %v4901_v29 }
  0x15   : > { %717 = vmatpush.bf16.msra.mxu1 %v4655_v5  ;;  %4811 = vmatpush.bf16.msra.mxu3 %v4655_v5  ;;  %v4633_v31 = vld [vmem:[%s5007_s15 + $0x38] sm:$0xff]  ;;  %289 = vst [vmem:[#allocation2 + $0x24] sm:$0xf] %v4901_v29  ;;  %v4648_v33 = vld [vmem:[%s5007_s15 + $0x70] sm:$0xff]  ;;  %v4671_v35 = vld [vmem:[%s6358_s5 + $0x28] sm:$0xff] }
  0x16   : > { %v4645_v32 = vld [vmem:[%s5007_s15 + $0x58] sm:$0xff]  ;;  %290 = vst [vmem:[#allocation2 + $0x28] sm:$0xf] %v4901_v29  ;;  %v4670_v36 = vld [vmem:[%s6358_s5 + $0x20] sm:$0xff]  ;;  %v4668_v38 = vld [vmem:[%s6358_s5 + $0x10] sm:$0xff] }
  0x17   : > { %291 = vst [vmem:[#allocation2 + $0x2c] sm:$0xf] %v4901_v29  ;;  %v4649_v34 = vld [vmem:[%s5007_s15 + $0x78] sm:$0xff]  ;;  %v4667_v39 = vld [vmem:[%s6358_s5 + $0x8] sm:$0xff]  ;;  %v4666_v40 = vld [vmem:[%s6358_s5] sm:$0xff] }
  0x18   : > { %487 = vmatpush.bf16.msra.mxu0 %v4638_v6  ;;  %4804 = vmatpush.bf16.msra.mxu2 %v4638_v6  ;;  %292 = vst [vmem:[#allocation2 + $0x30] sm:$0xf] %v4901_v29  ;;  %v4669_v37 = vld [vmem:[%s6358_s5 + $0x18] sm:$0xff]  ;;  %v814_v42 = vld [vmem:[#allocation2 + $0x4] sm:$0xff]   ;;  %v4696_v43 = vld [vmem:[%s6358_s5 + $0x30] sm:$0xff] }
  0x19   : > { %718 = vmatpush.bf16.msra.mxu1 %v4654_v7  ;;  %4812 = vmatpush.bf16.msra.mxu3 %v4654_v7  ;;  %293 = vst [vmem:[#allocation2 + $0x34] sm:$0xf] %v4901_v29  ;;  %v4697_v41 = vld [vmem:[%s6358_s5 + $0x38] sm:$0xff]  ;;  %v5133_v44 = vld [vmem:[%s6355_s2] ss:$0 sm:$0xff]  ;;  %v838_v46 = vunpack.c.l.bf16 %v814_v42  ;;  %v839_v48 = vunpack.c.h.bf16 %v814_v42  ;;  %v4695_v51 = vld [vmem:[%s6358_s5 + $0x28] sm:$0xff] }
  0x1a   : > { %294 = vst [vmem:[#allocation2 + $0x38] sm:$0xf] %v4901_v29  ;;  %v5138_v45 = vld [vmem:[%s6355_s2] ss:$0 sm:$0xff]  ;;  %v5147_v52 = vld [vmem:[%s6356_s3 + $0x1] ss:$0 sm:$0xff] }
  0x1b   : > { %295 = vst [vmem:[#allocation2 + $0x3c] sm:$0xf] %v4901_v29  ;;  %v4681_v54 = vld [vmem:[%s6358_s5 + $0x78] sm:$0xff]  ;;  %v813_v55 = vld [vmem:[#allocation2] sm:$0x8]  ;;  %v913_v58 = vmul.f32 %v5147_v52, %v838_v46  ;;  %v5155_v60 = vmul.f32 %v5147_v52, %v839_v48  ;;  %v4680_v3 = vld [vmem:[%s6358_s5 + $0x70] sm:$0xff] }
  0x1c   : > { %488 = vmatpush.bf16.msra.mxu0 %v4637_v8  ;;  %4805 = vmatpush.bf16.msra.mxu2 %v4637_v8  ;;  %296 = vst [vmem:[#allocation2 + $0x40] sm:$0xf] %v4901_v29  ;;  %v1018_v56 = vld [vmem:[#allocation2 + $0xc] sm:$0x1]  ;;  %v4694_v62 = vld [vmem:[%s6358_s5 + $0x20] sm:$0xff]  ;;  %v837_v63 = vunpack.c.l.bf16 %v813_v55 }
  0x1d   : > { %719 = vmatpush.bf16.msra.mxu1 %v4653_v9  ;;  %4813 = vmatpush.bf16.msra.mxu3 %v4653_v9  ;;  %297 = vst [vmem:[#allocation2 + $0x44] sm:$0xf] %v4901_v29  ;;  %v1026_v0 = vunpack.c.l.bf16 %v1018_v56  ;;  %v5166_v4 = vld [vmem:[%s6356_s3 + $0x2] ss:$0 sm:$0xff]  ;;  %v5172_v6 = vld [vmem:[%s6356_s3] ss:$0 sm:$0xff] }
  0x1e   : > { %298 = vst [vmem:[#allocation2 + $0x48] sm:$0xf] %v4901_v29  ;;  %v946_v7 = vrot.slane %v913_v58, 1  ;;  %v947_v9 = vrot.slane %v5155_v60, 1  ;;  %v1532_v42 = vld [vmem:[#allocation2 + $0x20] sm:$0x8] }
  0x1f   : > { %299 = vst [vmem:[#allocation2 + $0x4c] sm:$0xf] %v4901_v29  ;;  %v5216_v60 = vld [vmem:[%s6356_s3 + $0x8] ss:$0 sm:$0xff]  ;;  %vm1966_vm2 = vsmask.f32 256 }
  0x20   : > { %489 = vmatpush.bf16.msra.mxu0 %v4636_v10  ;;  %4806 = vmatpush.bf16.msra.mxu2 %v4636_v10  ;;  %300 = vst [vmem:[#allocation2 + $0x50] sm:$0xf] %v4901_v29  ;;  %v1036_v10 = vmul.f32 %v5166_v4, %v838_v46  ;;  %vm1967_vm3 = vsmask.f32 4368 }
  0x21   : > { %720 = vmatpush.bf16.msra.mxu1 %v4652_v11  ;;  %4814 = vmatpush.bf16.msra.mxu3 %v4652_v11  ;;  %301 = vst [vmem:[#allocation2 + $0x54] sm:$0xf] %v4901_v29  ;;  %v1037_v11 = vmul.f32 %v5166_v4, %v839_v48  ;;  %vm5389_vm4 = vmor %vm1966_vm2, %vm1967_vm3 }
  0x22   : > { %302 = vst [vmem:[#allocation2 + $0x58] sm:$0xf] %v4901_v29 }
  0x23   : > { %303 = vst [vmem:[#allocation2 + $0x5c] sm:$0xf] %v4901_v29 }
  0x24   : > { %490 = vmatpush.bf16.msra.mxu0 %v4635_v12  ;;  %4807 = vmatpush.bf16.msra.mxu2 %v4635_v12  ;;  %304 = vst [vmem:[#allocation2 + $0x60] sm:$0xf] %v4901_v29 }
  0x25   : > { %721 = vmatpush.bf16.msra.mxu1 %v4651_v13  ;;  %4815 = vmatpush.bf16.msra.mxu3 %v4651_v13  ;;  %305 = vst [vmem:[#allocation2 + $0x64] sm:$0xf] %v4901_v29 }
  0x26   : > { %306 = vst [vmem:[#allocation2 + $0x68] sm:$0xf] %v4901_v29 }
  0x27   : > { %307 = vst [vmem:[#allocation2 + $0x6c] sm:$0xf] %v4901_v29 }
  0x28   : > { %491 = vmatpush.bf16.msra.mxu0 %v4634_v14  ;;  %4808 = vmatpush.bf16.msra.mxu2 %v4634_v14  ;;  %308 = vst [vmem:[#allocation2 + $0x70] sm:$0xf] %v4901_v29 }
  0x29   : > { %722 = vmatpush.bf16.msra.mxu1 %v4650_v15  ;;  %4816 = vmatpush.bf16.msra.mxu3 %v4650_v15  ;;  %309 = vst [vmem:[#allocation2 + $0x74] sm:$0xf] %v4901_v29  ;;  %v4693_v15 = vld [vmem:[%s6358_s5 + $0x18] sm:$0xff] }
  0x2a   : > { %310 = vst [vmem:[#allocation2 + $0x78] sm:$0xf] %v4901_v29 }
  0x2b   : > { %492 = vmatmul.bf16.vlgmr.msra.gmra.mxu0 %v4626_v16  ;;  %512 = vmatmul.bf16.vlgmr.msra.gmra.mxu2 %v4630_v17  ;;  %311 = vst [vmem:[#allocation2 + $0x7c] sm:$0xf] %v4901_v29  ;;  %v863_v16 = vmul.f32 %v5172_v6, %v837_v63  ;;  %v1038_v17 = vmul.f32 %v5166_v4, %v1026_v0  ;;  %v4677_v63 = vld [vmem:[%s6358_s5 + $0x58] sm:$0xff] }
  0x2c   : > { %723 = vmatmul.bf16.vlgmr.msra.gmra.mxu1 %v4642_v18  ;;  %743 = vmatmul.bf16.vlgmr.msra.gmra.mxu3 %v4646_v22  ;;  %312 = vst [vmem:[#allocation2 + $0x80] sm:$0xf] %v4901_v29  ;;  %v864_v22 = vmul.f32 %v5172_v6, %v838_v46 }
  0x2d   : > { %2357 = vmatpush.bf16.msrb.mxu2 %v4673_v23  ;;  %313 = vst [vmem:[#allocation2 + $0x84] sm:$0xf] %v4901_v29  ;;  %4043 = vmatpush.bf16.msrb.mxu0 %v4697_v41  ;;  %v865_v23 = vmul.f32 %v5172_v6, %v839_v48 }
  0x2e   : > { %314 = vst [vmem:[#allocation2 + $0x88] sm:$0xf] %v4901_v29  ;;  %2406 = vmatpush.bf16.msrb.mxu3 %v4681_v54 }
  0x2f   : > { %315 = vst [vmem:[#allocation2 + $0x8c] sm:$0xf] %v4901_v29 }
  0x30   : > { %316 = vst [vmem:[#allocation2 + $0x90] sm:$0xf] %v4901_v29 }
  0x31   : > { %2358 = vmatpush.bf16.msrb.mxu2 %v4672_v28  ;;  %317 = vst [vmem:[#allocation2 + $0x94] sm:$0xf] %v4901_v29  ;;  %4044 = vmatpush.bf16.msrb.mxu0 %v4696_v43  ;;  %v1085_v28 = vrot.slane %v1036_v10, 2  ;;  %v5235_v10 = vld [vmem:[%s6356_s3 + $0x6] ss:$0 sm:$0xff] }
  0x32   : > { %318 = vst [vmem:[#allocation2 + $0x98] sm:$0xf] %v4901_v29  ;;  %2407 = vmatpush.bf16.msrb.mxu3 %v4680_v3 }
  0x33   : > { %319 = vst [vmem:[#allocation2 + $0x9c] sm:$0xf] %v4901_v29 }
  0x34   : > { %320 = vst [vmem:[#allocation2 + $0xa0] sm:$0xf] %v4901_v29 }
  0x35   : > { %321 = vst [vmem:[#allocation2 + $0xa4] sm:$0xf] %v4901_v29  ;;  %2359 = vmatpush.bf16.msrb.mxu2 %v4671_v35  ;;  %4045 = vmatpush.bf16.msrb.mxu0 %v4695_v51  ;;  %v5201_v51 = vld [vmem:[%s6356_s3 + $0x3] ss:$0 sm:$0xff] }
  0x36   : > { %322 = vst [vmem:[#allocation2 + $0xa8] sm:$0xf] %v4901_v29 }
  0x37   : > { %323 = vst [vmem:[#allocation2 + $0xac] sm:$0xf] %v4901_v29 }
  0x38   : > { %324 = vst [vmem:[#allocation2 + $0xb0] sm:$0xf] %v4901_v29 }
  0x39   : > { %325 = vst [vmem:[#allocation2 + $0xb4] sm:$0xf] %v4901_v29  ;;  %2360 = vmatpush.bf16.msrb.mxu2 %v4670_v36  ;;  %4046 = vmatpush.bf16.msrb.mxu0 %v4694_v62 }
  0x3a   : > { %326 = vst [vmem:[#allocation2 + $0xb8] sm:$0xf] %v4901_v29 }
  0x3b   : > { %497 = vmatmul.bf16.gmra.mxu0 %v4627_v19  ;;  %517 = vmatmul.bf16.gmra.mxu2 %v4631_v20  ;;  %327 = vst [vmem:[#allocation2 + $0xbc] sm:$0xf] %v4901_v29  ;;  %v4679_v19 = vld [vmem:[%s6358_s5 + $0x68] sm:$0xff] }
  0x3c   : > { %728 = vmatmul.bf16.gmra.mxu1 %v4643_v21  ;;  %748 = vmatmul.bf16.gmra.mxu3 %v4647_v27  ;;  %328 = vst [vmem:[#allocation2 + $0xc0] sm:$0xf] %v4901_v29  ;;  %v948_v27 = vsel %vm945_vm0, %v946_v7, %v947_v9 }
  0x3d   : > { %329 = vst [vmem:[#allocation2 + $0xc4] sm:$0xf] %v4901_v29  ;;  %2361 = vmatpush.bf16.msrb.mxu2 %v4669_v37  ;;  %4047 = vmatpush.bf16.msrb.mxu0 %v4693_v15  ;;  %v4678_v37 = vld [vmem:[%s6358_s5 + $0x60] sm:$0xff]  ;;  %v995_v48 = vadd.f32 %v948_v27, %v864_v22  ;;  %v4676_v22 = vld [vmem:[%s6358_s5 + $0x50] sm:$0xff] }
  0x3e   : > { %330 = vst [vmem:[#allocation2 + $0xc8] sm:$0xf] %v4901_v29  ;;  %2408 = vmatpush.bf16.msrb.mxu3 %v4679_v19 }
  0x3f   : > { %331 = vst [vmem:[#allocation2 + $0xcc] sm:$0xf] %v4901_v29 }
  0x40   : > { %332 = vst [vmem:[#allocation2 + $0xd0] sm:$0xf] %v4901_v29 }
  0x41   : > { %333 = vst [vmem:[#allocation2 + $0xd4] sm:$0xf] %v4901_v29  ;;  %2362 = vmatpush.bf16.msrb.mxu2 %v4668_v38 }
  0x42   : > { %334 = vst [vmem:[#allocation2 + $0xd8] sm:$0xf] %v4901_v29  ;;  %2409 = vmatpush.bf16.msrb.mxu3 %v4678_v37 }
  0x43   : > { %335 = vst [vmem:[#allocation2 + $0xdc] sm:$0xf] %v4901_v29 }
  0x44   : > { %336 = vst [vmem:[#allocation2 + $0xe0] sm:$0xf] %v4901_v29 }
  0x45   : > { %337 = vst [vmem:[#allocation2 + $0xe4] sm:$0xf] %v4901_v29  ;;  %2363 = vmatpush.bf16.msrb.mxu2 %v4667_v39 }
  0x46   : > { %338 = vst [vmem:[#allocation2 + $0xe8] sm:$0xf] %v4901_v29  ;;  %2410 = vmatpush.bf16.msrb.mxu3 %v4677_v63 }
  0x47   : > { %339 = vst [vmem:[#allocation2 + $0xec] sm:$0xf] %v4901_v29 }
  0x48   : > { %340 = vst [vmem:[#allocation2 + $0xf0] sm:$0xf] %v4901_v29 }
  0x49   : > { %341 = vst [vmem:[#allocation2 + $0xf4] sm:$0xf] %v4901_v29  ;;  %2364 = vmatpush.bf16.msrb.mxu2 %v4666_v40  ;;  %v1019_v40 = vld [vmem:[#allocation2 + $0x1c] sm:$0x1] }
  0x4a   : > { %342 = vst [vmem:[#allocation2 + $0xf8] sm:$0xf] %v4901_v29  ;;  %v1027_v46 = vunpack.c.l.bf16 %v1019_v40  ;;  %2411 = vmatpush.bf16.msrb.mxu3 %v4676_v22 }
  0x4b   : > { %502 = vmatmul.bf16.gmra.mxu0 %v4628_v24  ;;  %522 = vmatmul.bf16.gmra.mxu2 %v4632_v25  ;;  %343 = vst [vmem:[#allocation2 + $0xfc] sm:$0xf] %v4901_v29  ;;  %v1173_v24 = vld [vmem:[#allocation2 + $0x10] sm:$0x8]  ;;  %v1377_v25 = vld [vmem:[#allocation2 + $0x1c] sm:$0x1] }
  0x4c   : > { %733 = vmatmul.bf16.gmra.mxu1 %v4644_v26  ;;  %753 = vmatmul.bf16.gmra.mxu3 %v4648_v33  ;;  %344 = vst [vmem:[#allocation2 + $0x100] sm:$0xf] %v4901_v29  ;;  %v994_v33 = vadd.f32 %v946_v7, %v863_v16  ;;  %v1197_v38 = vunpack.c.l.bf16 %v1173_v24  ;;  %v1385_v39 = vunpack.c.l.bf16 %v1377_v25  ;;  %v5243_v16 = vld [vmem:[%s6356_s3 + $0x4] ss:$0 sm:$0xff] }
  0x4d   : > { %345 = vst [vmem:[#allocation2 + $0x104] sm:$0xf] %v4901_v29 }
  0x4e   : > { %346 = vst [vmem:[#allocation2 + $0x108] sm:$0xf] %v4901_v29  ;;  %v1223_v0 = vmul.f32 %v5201_v51, %v1197_v38 }
  0x4f   : > { %347 = vst [vmem:[#allocation2 + $0x10c] sm:$0xf] %v4901_v29 }
  0x50   : > { %348 = vst [vmem:[#allocation2 + $0x110] sm:$0xf] %v4901_v29 }
  0x51   : > { %349 = vst [vmem:[#allocation2 + $0x114] sm:$0xf] %v4901_v29 }
  0x52   : > { %350 = vst [vmem:[#allocation2 + $0x118] sm:$0xf] %v4901_v29 }
  0x53   : > { %351 = vst [vmem:[#allocation2 + $0x11c] sm:$0xf] %v4901_v29  ;;  %v1086_v29 = vrot.slane %v1037_v11, 2 }
  0x5b   : > { %507 = vmatmul.bf16.gmra.mxu0 %v4629_v30  ;;  %527 = vmatmul.bf16.gmra.mxu2 %v4633_v31  ;;  %v1736_v30 = vld [vmem:[#allocation2 + $0x2c] sm:$0x1] }
  0x5c   : > { %738 = vmatmul.bf16.gmra.mxu1 %v4645_v32  ;;  %758 = vmatmul.bf16.gmra.mxu3 %v4649_v34  ;;  %v4692_v32 = vld [vmem:[%s6358_s5 + $0x10] sm:$0xff]  ;;  %v1088_v34 = vrot.slane %v1038_v17, 2  ;;  %v1744_v43 = vunpack.c.l.bf16 %v1736_v30  ;;  %v5245_v17 = vld [vmem:[#allocation2 + $0x20] sm:$0x8] }
  0x5d   : > { %4048 = vmatpush.bf16.msrb.mxu0 %v4692_v32 }
  0x5e   : > { %v1089_v58 = vsel %vm1084_vm1, %v1086_v29, %v1088_v34  ;;  %v5227_v7 = vmul.f32 %v5216_v60, %v1744_v43  ;;  %v4675_v43 = vld [vmem:[%s6358_s5 + $0x48] sm:$0xff] }
  0x5f   : > { %2412 = vmatpush.bf16.msrb.mxu3 %v4675_v43 }
  0xa8   : > { %v493_v47 = vpop.f32.mrf.mxu0 }
  0xa9   : > { %v494_v49 = vadd.f32 %v5138_v45, %v493_v47  ;;  %v724_v50 = vpop.f32.mrf.mxu1 }
  0xaa   : > { %v725_v53 = vadd.f32 %v5133_v44, %v724_v50  ;;  %v1087_v50 = vsel %vm1084_vm1, %v1085_v28, %v1086_v29  ;;  %v1805_v29 = vrot.slane %v5227_v7, 2 }
  0xab   : > { %v533_v57 = vmax.f32 %v494_v49, 0.0  ;;  %v996_v49 = vadd.f32 %v947_v9, %v865_v23 }
  0xac   : > { %v764_v59 = vmax.f32 %v725_v53, 0.0  ;;  %v5206_v53 = vld [vmem:[%s6356_s3 + $0x5] ss:$0 sm:$0xff] }
  0xad   : > { %v549_v61 = vpack.c.bf16 %v533_v57, %v533_v57  ;;  %v4691_v57 = vld [vmem:[%s6358_s5 + $0x8] sm:$0xff]  ;;  %v1151_v15 = vadd.f32 %v1089_v58, %v996_v49 }
  0xae   : > { %v513_v1 = vpop.f32.mrf.mxu2  ;;  %v780_v2 = vpack.c.bf16 %v764_v59, %v764_v59  ;;  %v1149_v59 = vadd.f32 %v1085_v28, %v994_v33  ;;  %4049 = vmatpush.bf16.msrb.mxu0 %v4691_v57  ;;  %v4705_v57 = vld [vmem:[%s6358_s5 + $0x78] sm:$0xff] }
  0xaf   : > { %566 = vst [vmem:[#allocation2 + $0x14] sm:$0xf] %v549_v61  ;;  %v514_v5 = vadd.f32 %v5138_v45, %v513_v1  ;;  %v816_v61 = vld [vmem:[#allocation2 + $0x10] sm:$0x8]  ;;  %v5224_v1 = vmul.f32 %v5206_v53, %v1385_v39  ;;  %4092 = vmatpush.bf16.msrb.mxu1 %v4705_v57 }
  0xb0   : > { %v495_v8 = vpop.f32.mrf.mxu0  ;;  %797 = vst [vmem:[#allocation2 + $0x94] sm:$0xf] %v780_v2  ;;  %v1556_v2 = vunpack.c.l.bf16 %v1532_v42  ;;  %v840_v11 = vunpack.c.l.bf16 %v816_v61  ;;  %v1247_v23 = vadd.f32 %v1223_v0, %v1149_v59 }
  0xb1   : > { %v541_v12 = vmax.f32 %v514_v5, 0.0  ;;  %v496_v13 = vadd.f32 %v5138_v45, %v495_v8  ;;  %v726_v14 = vpop.f32.mrf.mxu1  ;;  %v5230_v8 = vmul.f32 %v5166_v4, %v1027_v46  ;;  %v1446_v24 = vrot.slane %v5224_v1, 2 }
  0xb2   : > { %v727_v18 = vadd.f32 %v5133_v44, %v726_v14  ;;  %v1150_v14 = vadd.f32 %v1087_v50, %v995_v48  ;;  %v5252_v25 = vmul.f32 %v5235_v10, %v1556_v2  ;;  %v1378_v2 = vld [vmem:[#allocation2 + $0x2c] sm:$0x1] }
  0xb3   : > { %v557_v20 = vpack.c.bf16 %v541_v12, %v541_v12  ;;  %v534_v21 = vmax.f32 %v496_v13, 0.0  ;;  %v4690_v13 = vld [vmem:[%s6358_s5] sm:$0xff]  ;;  %v1093_v30 = vrot.slane %v5230_v8, 2 }
  0xb4   : > { %v765_v26 = vmax.f32 %v727_v18, 0.0  ;;  %4050 = vmatpush.bf16.msrb.mxu0 %v4690_v13  ;;  %v4702_v8 = vld [vmem:[%s6358_s5 + $0x60] sm:$0xff] }
  0xb5   : > { %574 = vst [vmem:[#allocation2 + $0x54] sm:$0xf] %v557_v20  ;;  %v550_v31 = vpack.c.bf16 %v534_v21, %v534_v21 }
  0xb6   : > { %v515_v35 = vpop.f32.mrf.mxu2  ;;  %v781_v36 = vpack.c.bf16 %v765_v26, %v765_v26 }
  0xb7   : > { %567 = vst [vmem:[#allocation2 + $0x18] sm:$0xf] %v550_v31  ;;  %v516_v41 = vadd.f32 %v5138_v45, %v515_v35  ;;  %v5260_v35 = vmul.f32 %v5172_v6, %v840_v11 }
  0xb8   : > { %v498_v47 = vpop.f32.mrf.mxu0  ;;  %798 = vst [vmem:[#allocation2 + $0x98] sm:$0xf] %v781_v36  ;;  %v1200_v36 = vunpack.c.l.bf16 %v5245_v17 }
  0xb9   : > { %v542_v54 = vmax.f32 %v516_v41, 0.0  ;;  %v499_v55 = vadd.f32 %v5138_v45, %v498_v47  ;;  %v729_v56 = vpop.f32.mrf.mxu1 }
  0xba   : > { %v730_v62 = vadd.f32 %v5133_v44, %v729_v56 }
  0xbb   : > { %v558_v3 = vpack.c.bf16 %v542_v54, %v542_v54  ;;  %v535_v5 = vmax.f32 %v499_v55, 0.0 }
  0xbc   : > { %v766_v9 = vmax.f32 %v730_v62, 0.0 }
  0xbd   : > { %575 = vst [vmem:[#allocation2 + $0x58] sm:$0xf] %v558_v3  ;;  %v551_v12 = vpack.c.bf16 %v535_v5, %v535_v5 }
  0xbe   : > { %v818_v18 = vld [vmem:[#allocation2 + $0x14] sm:$0xff]   ;;  %v518_v19 = vpop.f32.mrf.mxu2  ;;  %v782_v21 = vpack.c.bf16 %v766_v9, %v766_v9  ;;  %v4674_v9 = vld [vmem:[%s6358_s5 + $0x40] sm:$0xff] }
  0xbf   : > { %v4658_v20 = vld [vmem:[#allocation2 + $0x14] sm:$0xff]  ;;  %568 = vst [vmem:[#allocation2 + $0x24] sm:$0xf] %v551_v12  ;;  %v519_v26 = vadd.f32 %v5138_v45, %v518_v19  ;;  %v1198_v28 = vunpack.c.l.bf16 %v818_v18  ;;  %v5257_v34 = vunpack.c.h.bf16 %v818_v18  ;;  %v5283_v18 = vmul.f32 %v5201_v51, %v1200_v36  ;;  %2413 = vmatpush.bf16.msrb.mxu3 %v4674_v9 }
  0xc0   : > { %v1175_v27 = vld [vmem:[#allocation2 + $0x14] sm:$0xff]   ;;  %v500_v31 = vpop.f32.mrf.mxu0  ;;  %2365 = vmatmul.bf16.vlgmr.msrb.gmra.mxu2 %v4658_v20  ;;  %799 = vst [vmem:[#allocation2 + $0xa4] sm:$0xf] %v782_v21 }
  0xc1   : > { %v4682_v32 = vld [vmem:[#allocation2 + $0x94] sm:$0xff]  ;;  %v1199_v33 = vunpack.c.h.bf16 %v1175_v27  ;;  %v543_v37 = vmax.f32 %v519_v26, 0.0  ;;  %v501_v38 = vadd.f32 %v5138_v45, %v500_v31  ;;  %v731_v39 = vpop.f32.mrf.mxu1  ;;  %v1224_v40 = vmul.f32 %v5201_v51, %v1198_v28 }
  0xc2   : > { %v1273_v41 = vmul.f32 %v5243_v16, %v1198_v28  ;;  %v732_v42 = vadd.f32 %v5133_v44, %v731_v39  ;;  %4051 = vmatmul.bf16.vlgmr.msrb.gmra.mxu0 %v4682_v32  ;;  %v1395_v48 = vmul.f32 %v5206_v53, %v1198_v28  ;;  %v841_v1 = vunpack.c.l.bf16 %v1175_v27 }
  0xc3   : > { %v1225_v46 = vmul.f32 %v5201_v51, %v1199_v33  ;;  %v1274_v47 = vmul.f32 %v5243_v16, %v1199_v33  ;;  %v559_v49 = vpack.c.bf16 %v543_v37, %v543_v37  ;;  %v536_v50 = vmax.f32 %v501_v38, 0.0 }
  0xc4   : > { %v1248_v54 = vadd.f32 %v1224_v40, %v1150_v14  ;;  %v1305_v55 = vrot.slane %v1273_v41, 1  ;;  %v767_v56 = vmax.f32 %v732_v42, 0.0  ;;  %v1396_v61 = vmul.f32 %v5206_v53, %v1199_v33  ;;  %v5299_v42 = vld [vmem:[#allocation2 + $0x30] sm:$0x8] }
  0xc5   : > { %v1249_v58 = vadd.f32 %v1225_v46, %v1151_v15  ;;  %v1306_v59 = vrot.slane %v1274_v47, 1  ;;  %576 = vst [vmem:[#allocation2 + $0x64] sm:$0xf] %v559_v49  ;;  %v552_v62 = vpack.c.bf16 %v536_v50, %v536_v50  ;;  %v1443_v0 = vrot.slane %v1395_v48, 2 }
  0xc6   : > { %v1353_v63 = vadd.f32 %v1305_v55, %v1247_v23  ;;  %v520_v3 = vpop.f32.mrf.mxu2  ;;  %v783_v5 = vpack.c.bf16 %v767_v56, %v767_v56  ;;  %v1444_v13 = vrot.slane %v1396_v61, 2  ;;  %v867_v22 = vmul.f32 %v5172_v6, %v841_v1 }
  0xc7   : > { %v1307_v11 = vsel %vm945_vm0, %v1305_v55, %v1306_v59  ;;  %v1355_v12 = vadd.f32 %v1306_v59, %v1249_v58  ;;  %569 = vst [vmem:[#allocation2 + $0x28] sm:$0xf] %v552_v62  ;;  %v521_v14 = vadd.f32 %v5138_v45, %v520_v3  ;;  %v1386_v23 = vunpack.c.l.bf16 %v1378_v2  ;;  %v4704_v59 = vld [vmem:[%s6358_s5 + $0x70] sm:$0xff]  ;;  %v5322_v2 = vld [vmem:[%s6356_s3 + $0x7] ss:$0 sm:$0xff] }
  0xc8   : > { %v1354_v15 = vadd.f32 %v1307_v11, %v1248_v54  ;;  %v1507_v17 = vadd.f32 %v1443_v0, %v1353_v63  ;;  %v503_v19 = vpop.f32.mrf.mxu0  ;;  %800 = vst [vmem:[#allocation2 + $0xa8] sm:$0xf] %v783_v5  ;;  %v1445_v20 = vsel %vm1084_vm1, %v1443_v0, %v1444_v13  ;;  %v1447_v21 = vsel %vm1084_vm1, %v1444_v13, %v1446_v24 }
  0xc9   : > { %v544_v26 = vmax.f32 %v521_v14, 0.0  ;;  %v504_v27 = vadd.f32 %v5138_v45, %v503_v19  ;;  %v734_v28 = vpop.f32.mrf.mxu1  ;;  %v1509_v32 = vadd.f32 %v1447_v21, %v1355_v12  ;;  %v868_v37 = vmul.f32 %v5172_v6, %v5257_v34  ;;  %4093 = vmatpush.bf16.msrb.mxu1 %v4704_v59 }
  0xca   : > { %v1508_v31 = vadd.f32 %v1445_v20, %v1354_v15  ;;  %v735_v33 = vadd.f32 %v5133_v44, %v734_v28  ;;  %v1606_v36 = vadd.f32 %v5252_v25, %v1507_v17  ;;  %v915_v38 = vmul.f32 %v5147_v52, %v841_v1 }
  0xcb   : > { %v560_v39 = vpack.c.bf16 %v544_v26, %v544_v26  ;;  %v537_v24 = vmax.f32 %v504_v27, 0.0  ;;  %v916_v40 = vmul.f32 %v5147_v52, %v5257_v34  ;;  %v5297_v41 = vmul.f32 %v5166_v4, %v841_v1 }
  0xcc   : > { %v768_v43 = vmax.f32 %v735_v33, 0.0  ;;  %v949_v46 = vrot.slane %v915_v38, 1  ;;  %v1040_v25 = vmul.f32 %v5166_v4, %v5257_v34  ;;  %v5304_v47 = vmul.f32 %v5206_v53, %v1386_v23 }
  0xcd   : > { %577 = vst [vmem:[#allocation2 + $0x68] sm:$0xf] %v560_v39  ;;  %v553_v48 = vpack.c.bf16 %v537_v24, %v537_v24  ;;  %v950_v49 = vrot.slane %v916_v40, 1  ;;  %v1090_v50 = vrot.slane %v5297_v41, 2  ;;  %v1559_v54 = vunpack.c.l.bf16 %v5299_v42 }
  0xce   : > { %v5308_v55 = vld [vmem:[#allocation2 + $0x24] sm:$0xff]   ;;  %v523_v56 = vpop.f32.mrf.mxu2  ;;  %v784_v58 = vpack.c.bf16 %v768_v43, %v768_v43  ;;  %v5314_v34 = vadd.f32 %v949_v46, %v5260_v35  ;;  %v1091_v61 = vrot.slane %v1040_v25, 2  ;;  %v1451_v62 = vrot.slane %v5304_v47, 2 }
  0xcf   : > { %v4659_v57 = vld [vmem:[#allocation2 + $0x24] sm:$0xff]  ;;  %570 = vst [vmem:[#allocation2 + $0x34] sm:$0xf] %v553_v48  ;;  %v524_v63 = vadd.f32 %v5138_v45, %v523_v56  ;;  %v1557_v1 = vunpack.c.l.bf16 %v5308_v55  ;;  %v951_v3 = vsel %vm945_vm0, %v949_v46, %v950_v49  ;;  %v5325_v5 = vadd.f32 %v950_v49, %v868_v37 }
  0xd0   : > { %v1534_v0 = vld [vmem:[#allocation2 + $0x24] sm:$0xff]   ;;  %v505_v35 = vpop.f32.mrf.mxu0  ;;  %2370 = vmatmul.bf16.gmra.mxu2 %v4659_v57  ;;  %801 = vst [vmem:[#allocation2 + $0xb4] sm:$0xf] %v784_v58  ;;  %v998_v11 = vadd.f32 %v951_v3, %v867_v22  ;;  %v1092_v12 = vsel %vm1084_vm1, %v1090_v50, %v1091_v61  ;;  %v5353_v3 = vld [vmem:[%s6357_s4] ss:$0 sm:$0xff] }
  0xd1   : > { %v1558_v9 = vunpack.c.h.bf16 %v1534_v0  ;;  %v5330_v13 = vunpack.c.l.bf16 %v1534_v0  ;;  %v545_v14 = vmax.f32 %v524_v63, 0.0  ;;  %v506_v15 = vadd.f32 %v5138_v45, %v505_v35  ;;  %v736_v17 = vpop.f32.mrf.mxu1  ;;  %v4683_v27 = vld [vmem:[#allocation2 + $0xa4] sm:$0xff] }
  0xd2   : > { %v1583_v19 = vmul.f32 %v5235_v10, %v1557_v1  ;;  %v1632_v20 = vmul.f32 %v5322_v2, %v1557_v1  ;;  %v737_v21 = vadd.f32 %v5133_v44, %v736_v17  ;;  %v1754_v26 = vmul.f32 %v5216_v60, %v1557_v1  ;;  %4056 = vmatmul.bf16.gmra.mxu0 %v4683_v27  ;;  %v5340_v46 = vld [vmem:[#allocation2 + $0x24] sm:$0xff]  }
  0xd3   : > { %v1584_v23 = vmul.f32 %v5235_v10, %v1558_v9  ;;  %v1633_v22 = vmul.f32 %v5322_v2, %v1558_v9  ;;  %v561_v28 = vpack.c.bf16 %v545_v14, %v545_v14  ;;  %v538_v33 = vmax.f32 %v506_v15, 0.0  ;;  %v4703_v56 = vld [vmem:[%s6358_s5 + $0x68] sm:$0xff] }
  0xd4   : > { %v1607_v37 = vadd.f32 %v1583_v19, %v1508_v31  ;;  %v1664_v38 = vrot.slane %v1632_v20, 1  ;;  %v769_v39 = vmax.f32 %v737_v21, 0.0  ;;  %v1755_v43 = vmul.f32 %v5216_v60, %v1558_v9  ;;  %4094 = vmatpush.bf16.msrb.mxu1 %v4703_v56 }
  0xd5   : > { %v1608_v24 = vadd.f32 %v1584_v23, %v1509_v32  ;;  %v1665_v40 = vrot.slane %v1633_v22, 1  ;;  %578 = vst [vmem:[#allocation2 + $0x74] sm:$0xf] %v561_v28  ;;  %v554_v25 = vpack.c.bf16 %v538_v33, %v538_v33  ;;  %v1802_v49 = vrot.slane %v1754_v26, 2 }
  0xd6   : > { %v1712_v48 = vadd.f32 %v1664_v38, %v1606_v36  ;;  %v1094_v31 = vsel %vm1084_vm1, %v1091_v61, %v1093_v30  ;;  %v525_v57 = vpop.f32.mrf.mxu2  ;;  %v785_v32 = vpack.c.bf16 %v769_v39, %v769_v39  ;;  %v1803_v63 = vrot.slane %v1755_v43, 2  ;;  %v744_v30 = vpop.f32.mrf.mxu3 }
  0xd7   : > { %v1666_v58 = vsel %vm945_vm0, %v1664_v38, %v1665_v40  ;;  %v1714_v59 = vadd.f32 %v1665_v40, %v1608_v24  ;;  %571 = vst [vmem:[#allocation2 + $0x38] sm:$0xf] %v554_v25  ;;  %v526_v0 = vadd.f32 %v5138_v45, %v525_v57  ;;  %v5359_v61 = vunpack.c.h.bf16 %v5340_v46 }
  0xd8   : > { %v1713_v1 = vadd.f32 %v1666_v58, %v1607_v37  ;;  %v1866_v36 = vadd.f32 %v1802_v49, %v1712_v48  ;;  %v508_v35 = vpop.f32.mrf.mxu0  ;;  %802 = vst [vmem:[#allocation2 + $0xb8] sm:$0xf] %v785_v32  ;;  %v1804_v9 = vsel %vm1084_vm1, %v1802_v49, %v1803_v63  ;;  %v1806_v14 = vsel %vm1084_vm1, %v1803_v63, %v1805_v29 }
  0xd9   : > { %v745_v15 = vadd.f32 %v5133_v44, %v744_v30  ;;  %v1152_v17 = vadd.f32 %v1090_v50, %v5314_v34  ;;  %v546_v19 = vmax.f32 %v526_v0, 0.0  ;;  %v509_v20 = vadd.f32 %v5138_v45, %v508_v35  ;;  %v739_v21 = vpop.f32.mrf.mxu1  ;;  %4095 = vmatpush.bf16.msrb.mxu1 %v4702_v8 }
  0xda   : > { %v1867_v23 = vadd.f32 %v1804_v9, %v1713_v1  ;;  %v1868_v22 = vadd.f32 %v1806_v14, %v1714_v59  ;;  %v740_v26 = vadd.f32 %v5133_v44, %v739_v21  ;;  %v1894_v7 = vadd.f32 %v5353_v3, %v1866_v36 }
  0xdb   : > { %v772_v27 = vmax.f32 %v745_v15, 0.0  ;;  %v1153_v29 = vadd.f32 %v1092_v12, %v998_v11  ;;  %v562_v28 = vpack.c.bf16 %v546_v19, %v546_v19  ;;  %v539_v33 = vmax.f32 %v509_v20, 0.0 }
  0xdc   : > { %v1895_v37 = vadd.f32 %v5353_v3, %v1867_v23  ;;  %v1896_v41 = vadd.f32 %v5353_v3, %v1868_v22  ;;  %v770_v50 = vmax.f32 %v740_v26, 0.0  ;;  %v1918_v34 = vmax.f32 %v1894_v7, 0.0 }
  0xdd   : > { %v788_v38 = vpack.c.bf16 %v772_v27, %v772_v27  ;;  %v1154_v39 = vadd.f32 %v1094_v31, %v5325_v5  ;;  %579 = vst [vmem:[#allocation2 + $0x78] sm:$0xf] %v562_v28  ;;  %v555_v24 = vpack.c.bf16 %v539_v33, %v539_v33  ;;  %v1227_v25 = vmul.f32 %v5201_v51, %v5330_v13 }
  0xde   : > { %v1919_v40 = vmax.f32 %v1895_v37, 0.0  ;;  %v1920_v43 = vmax.f32 %v1896_v41, 0.0  ;;  %v528_v11 = vpop.f32.mrf.mxu2  ;;  %v4660_v12 = vld [vmem:[#allocation2 + $0x34] sm:$0xff]  ;;  %v786_v48 = vpack.c.bf16 %v770_v50, %v770_v50  ;;  %v1942_v49 = vpack.c.bf16 %v1918_v34, %v1918_v34 }
  0xdf   : > { %805 = vst [vmem:[#allocation2 + $0xd4] sm:$0xf] %v788_v38  ;;  %v1228_v56 = vmul.f32 %v5201_v51, %v5359_v61  ;;  %v1250_v57 = vadd.f32 %v5283_v18, %v1152_v17  ;;  %v529_v5 = vadd.f32 %v5138_v45, %v528_v11  ;;  %v1251_v58 = vadd.f32 %v1227_v25, %v1153_v29  ;;  %v1536_v34 = vld [vmem:[#allocation2 + $0x34] sm:$0xff]  }
  0xe0   : > { %572 = vst [vmem:[#allocation2 + $0x44] sm:$0xf] %v555_v24  ;;  %v1943_v31 = vpack.c.bf16 %v1919_v40, %v1919_v40  ;;  %v1944_v32 = vpack.c.bf16 %v1920_v43, %v1920_v43  ;;  %v510_v59 = vpop.f32.mrf.mxu0  ;;  %2375 = vmatmul.bf16.gmra.mxu2 %v4660_v12  ;;  %v1970_v63 = vshrl.u32 %v1942_v49, 16  ;;  %v1275_v1 = vmul.f32 %v5243_v16, %v5330_v13  ;;  %v746_v49 = vpop.f32.mrf.mxu3 }
  0xe1   : > { %803 = vst [vmem:[#allocation2 + $0xc4] sm:$0xf] %v786_v48  ;;  %v1252_v0 = vadd.f32 %v1228_v56, %v1154_v39  ;;  %v1276_v36 = vmul.f32 %v5243_v16, %v5359_v61  ;;  %v547_v8 = vmax.f32 %v529_v5, 0.0  ;;  %v511_v18 = vadd.f32 %v5138_v45, %v510_v59  ;;  %v741_v9 = vpop.f32.mrf.mxu1  ;;  %v4701_v48 = vld [vmem:[%s6358_s5 + $0x58] sm:$0xff] }
  0xe2   : > { %v1975_v30 = vshrl.u32 %v1943_v31, 16  ;;  %v1978_v35 = vshll.u32 %v1943_v31, 16  ;;  %v4398_v14 = vrot.slane %v1970_v63, 11  ;;  %v1984_v15 = vshrl.u32 %v1944_v32, 16  ;;  %v4684_v56 = vld [vmem:[#allocation2 + $0xb4] sm:$0xff]  ;;  %4096 = vmatpush.bf16.msrb.mxu1 %v4701_v48 }
  0xe3   : > { %v1987_v17 = vshll.u32 %v1944_v32, 16  ;;  %v742_v19 = vadd.f32 %v5133_v44, %v741_v9  ;;  %v563_v20 = vpack.c.bf16 %v547_v8, %v547_v8  ;;  %v540_v21 = vmax.f32 %v511_v18, 0.0  ;;  %4061 = vmatmul.bf16.gmra.mxu0 %v4684_v56  ;;  %v1737_v18 = vld [vmem:[#allocation2 + $0x3c] sm:$0x1] }
  0xe4   : > { %v1977_v23 = vrot.slane %v1975_v30, 7  ;;  %v1308_v22 = vrot.slane %v1275_v1, 1  ;;  %v1986_v7 = vrot.slane %v1984_v15, 7  ;;  %v1309_v29 = vrot.slane %v1276_v36, 1 }
  0xe5   : > { %v771_v27 = vmax.f32 %v742_v19, 0.0  ;;  %v1398_v28 = vmul.f32 %v5206_v53, %v5330_v13  ;;  %580 = vst [vmem:[#allocation2 + $0x84] sm:$0xf] %v563_v20  ;;  %v556_v33 = vpack.c.bf16 %v540_v21, %v540_v21  ;;  %v1399_v13 = vmul.f32 %v5206_v53, %v5359_v61  ;;  %v4700_v61 = vld [vmem:[%s6358_s5 + $0x50] sm:$0xff] }
  0xe6   : > { %v1980_v37 = vor.u32 %v1978_v35, %v1977_v23  ;;  %v1982_v41 = vrot.slane %v1977_v23, 4  ;;  %v1356_v50 = vadd.f32 %v1308_v22, %v1250_v57  ;;  %v530_v38 = vpop.f32.mrf.mxu2  ;;  %v1989_v39 = vor.u32 %v1987_v17, %v1986_v7  ;;  %4097 = vmatpush.bf16.msrb.mxu1 %v4700_v61 }
  0xe7   : > { %v787_v24 = vpack.c.bf16 %v771_v27, %v771_v27  ;;  %v1310_v40 = vsel %vm945_vm0, %v1308_v22, %v1309_v29  ;;  %v1358_v43 = vadd.f32 %v1309_v29, %v1252_v0  ;;  %573 = vst [vmem:[#allocation2 + $0x48] sm:$0xf] %v556_v33  ;;  %v531_v25 = vadd.f32 %v5138_v45, %v530_v38  ;;  %v819_v22 = vld [vmem:[#allocation2 + $0x20] sm:$0x8] }
  0xe8   : > { %v1981_v11 = vsel %vm5389_vm4, %v4398_v14, %v1980_v37  ;;  %v1357_v12 = vadd.f32 %v1310_v40, %v1251_v58  ;;  %v1990_v57 = vsel %vm5389_vm4, %v1982_v41, %v1989_v39  ;;  %v1448_v31 = vrot.slane %v1398_v28, 2 }
  0xe9   : > { %v2193_v5 = vunpack.c.l.b16 %v1981_v11  ;;  %804 = vst [vmem:[#allocation2 + $0xc8] sm:$0xf] %v787_v24  ;;  %v1560_v45 = vunpack.c.l.bf16 %v1536_v34  ;;  %v548_v32 = vmax.f32 %v531_v25, 0.0  ;;  %v2194_v59 = vunpack.c.l.b16 %v1990_v57 }
  0xea   : > { %v1449_v63 = vrot.slane %v1399_v13, 2  ;;  %v1561_v58 = vunpack.c.h.bf16 %v1536_v34  ;;  %v1510_v0 = vadd.f32 %v1448_v31, %v1356_v50  ;;  %v1585_v1 = vmul.f32 %v5235_v10, %v1559_v54  ;;  %v749_v50 = vpop.f32.mrf.mxu3 }
  0xeb   : > { %v1586_v36 = vmul.f32 %v5235_v10, %v1560_v45  ;;  %v1634_v8 = vmul.f32 %v5322_v2, %v1560_v45  ;;  %v564_v30 = vpack.c.bf16 %v548_v32, %v548_v32  ;;  %v2209_v35 = vpack.c.b16 %v2194_v59, %v2193_v5 }
  0xec   : > { %v1450_v9 = vsel %vm1084_vm1, %v1448_v31, %v1449_v63  ;;  %v1452_v14 = vsel %vm1084_vm1, %v1449_v63, %v1451_v62  ;;  %v1587_v19 = vmul.f32 %v5235_v10, %v1561_v58  ;;  %v1609_v42 = vadd.f32 %v1585_v1, %v1510_v0 }
  0xed   : > { %v1511_v15 = vadd.f32 %v1450_v9, %v1357_v12  ;;  %v1512_v17 = vadd.f32 %v1452_v14, %v1358_v43  ;;  %581 = vst [vmem:[#allocation2 + $0x88] sm:$0xf] %v564_v30  ;;  %2414 = vmatmul.bf16.vlgmr.msrb.gmra.mxu3 %v2209_v35  ;;  %v1635_v54 = vmul.f32 %v5322_v2, %v1561_v58  ;;  %v1667_v20 = vrot.slane %v1634_v8, 1 }
  0xee   : > { %v1745_v21 = vunpack.c.l.bf16 %v1737_v18  ;;  %v1757_v23 = vmul.f32 %v5216_v60, %v1560_v45  ;;  %v4661_v7 = vld [vmem:[#allocation2 + $0x44] sm:$0xff]  ;;  %v1758_v62 = vmul.f32 %v5216_v60, %v1561_v58  ;;  %v747_v29 = vadd.f32 %v5133_v44, %v746_v49  ;;  %v1020_v58 = vld [vmem:[#allocation2 + $0x2c] sm:$0x1] }
  0xef   : > { %v1610_v27 = vadd.f32 %v1586_v36, %v1511_v15  ;;  %v1611_v47 = vadd.f32 %v1587_v19, %v1512_v17  ;;  %v1668_v28 = vrot.slane %v1635_v54, 1  ;;  %v1715_v33 = vadd.f32 %v1667_v20, %v1609_v42 }
  0xf0   : > { %v1759_v37 = vmul.f32 %v5216_v60, %v1745_v21  ;;  %v1807_v41 = vrot.slane %v1757_v23, 2  ;;  %2380 = vmatmul.bf16.gmra.mxu2 %v4661_v7  ;;  %v1808_v34 = vrot.slane %v1758_v62, 2  ;;  %v773_v38 = vmax.f32 %v747_v29, 0.0 }
  0xf1   : > { %v750_v39 = vadd.f32 %v5133_v44, %v749_v50  ;;  %v843_v24 = vunpack.c.l.bf16 %v819_v22  ;;  %v1669_v40 = vsel %vm945_vm0, %v1667_v20, %v1668_v28  ;;  %v1717_v43 = vadd.f32 %v1668_v28, %v1611_v47 }
  0xf2   : > { %v1810_v25 = vrot.slane %v1759_v37, 2  ;;  %v1869_v11 = vadd.f32 %v1807_v41, %v1715_v33  ;;  %v1716_v12 = vadd.f32 %v1669_v40, %v1610_v27  ;;  %v1809_v13 = vsel %vm1084_vm1, %v1807_v41, %v1808_v34  ;;  %v1179_v27 = vld [vmem:[#allocation2 + $0x30] sm:$0x8]  ;;  %v1180_v33 = vld [vmem:[#allocation2 + $0x34] sm:$0xff]   ;;  %v1379_v37 = vld [vmem:[#allocation2 + $0x3c] sm:$0x1] }
  0xf3   : > { %v789_v48 = vpack.c.bf16 %v773_v38, %v773_v38  ;;  %v774_v49 = vmax.f32 %v750_v39, 0.0  ;;  %v844_v5 = vunpack.c.l.bf16 %v5340_v46  ;;  %v845_v31 = vunpack.c.h.bf16 %v5308_v55 }
  0xf4   : > { %v1811_v56 = vsel %vm1084_vm1, %v1808_v34, %v1810_v25  ;;  %v1897_v57 = vadd.f32 %v5353_v3, %v1869_v11  ;;  %v2506_v44 = vld [vmem:[#allocation2 + $0x88] sm:$0xf]  ;;  %v1870_v45 = vadd.f32 %v1809_v13, %v1716_v12  ;;  %v869_v63 = vmul.f32 %v5172_v6, %v843_v24  ;;  %v4662_v12 = vld [vmem:[#allocation2 + $0x54] sm:$0xff] }
  0xf5   : > { %v1871_v32 = vadd.f32 %v1811_v56, %v1717_v43  ;;  %806 = vst [vmem:[#allocation2 + $0xd8] sm:$0xf] %v789_v48  ;;  %v790_v59 = vpack.c.bf16 %v774_v49, %v774_v49  ;;  %v5432_v61 = vunpack.c.l.bf16 %v2506_v44  ;;  %v870_v1 = vmul.f32 %v5172_v6, %v844_v5 }
  0xf6   : > { %v1921_v0 = vmax.f32 %v1897_v57, 0.0  ;;  %v871_v36 = vmul.f32 %v5172_v6, %v845_v31  ;;  %v1898_v8 = vadd.f32 %v5353_v3, %v1870_v45  ;;  %v917_v55 = vmul.f32 %v5147_v52, %v844_v5 }
  0xf7   : > { %v1899_v46 = vadd.f32 %v5353_v3, %v1871_v32  ;;  %807 = vst [vmem:[#allocation2 + $0xe4] sm:$0xf] %v790_v59  ;;  %v918_v18 = vmul.f32 %v5147_v52, %v845_v31  ;;  %v1028_v35 = vunpack.c.l.bf16 %v1020_v58  ;;  %v1042_v9 = vmul.f32 %v5166_v4, %v844_v5 }
  0xf8   : > { %v1945_v30 = vpack.c.bf16 %v1921_v0, %v1921_v0  ;;  %v1043_v14 = vmul.f32 %v5166_v4, %v845_v31  ;;  %v1922_v15 = vmax.f32 %v1898_v8, 0.0  ;;  %v952_v19 = vrot.slane %v917_v55, 1  ;;  %v1539_v55 = vld [vmem:[#allocation2 + $0x44] sm:$0xff]  }
  0xf9   : > { %v1923_v17 = vmax.f32 %v1899_v46, 0.0  ;;  %v953_v42 = vrot.slane %v918_v18, 1  ;;  %v1044_v54 = vmul.f32 %v5166_v4, %v1028_v35  ;;  %v1095_v20 = vrot.slane %v1042_v9, 2  ;;  %v1538_v4 = vld [vmem:[#allocation2 + $0x40] sm:$0x8] }
  0xfa   : > { %v1992_v6 = vshrl.u32 %v1945_v30, 16  ;;  %v1096_v21 = vrot.slane %v1043_v14, 2  ;;  %v1946_v23 = vpack.c.bf16 %v1922_v15, %v1922_v15  ;;  %v1000_v52 = vadd.f32 %v952_v19, %v869_v63  ;;  %v751_v14 = vpop.f32.mrf.mxu3  ;;  %v4685_v15 = vld [vmem:[#allocation2 + $0xc4] sm:$0xff] }
  0xfb   : > { %v1947_v22 = vpack.c.bf16 %v1923_v17, %v1923_v17  ;;  %v954_v7 = vsel %vm945_vm0, %v952_v19, %v953_v42  ;;  %v1002_v29 = vadd.f32 %v953_v42, %v871_v36  ;;  %v1098_v39 = vrot.slane %v1044_v54, 2  ;;  %4066 = vmatmul.bf16.gmra.mxu0 %v4685_v15 }
  0xfc   : > { %v4399_v47 = vrot.slane %v1992_v6, 11  ;;  %v1001_v62 = vadd.f32 %v954_v7, %v870_v1  ;;  %v1097_v28 = vsel %vm1084_vm1, %v1095_v20, %v1096_v21  ;;  %v1997_v41 = vshrl.u32 %v1946_v23, 16 }
  0xfd   : > { %v2000_v50 = vshll.u32 %v1946_v23, 16  ;;  %v2006_v34 = vshrl.u32 %v1947_v22, 16  ;;  %v2009_v38 = vshll.u32 %v1947_v22, 16  ;;  %v1155_v24 = vadd.f32 %v1095_v20, %v1000_v52  ;;  %v4698_v22 = vld [vmem:[%s6358_s5 + $0x40] sm:$0xff] }
  0xfe   : > { %v1156_v40 = vadd.f32 %v1097_v28, %v1001_v62  ;;  %v1203_v43 = vunpack.c.l.bf16 %v1179_v27  ;;  %v1999_v25 = vrot.slane %v1997_v41, 7  ;;  %v1204_v13 = vunpack.c.l.bf16 %v1180_v33  ;;  %v1738_v62 = vld [vmem:[#allocation2 + $0x4c] sm:$0x1] }
  0xff   : > { %v2008_v11 = vrot.slane %v2006_v34, 7  ;;  %v1205_v48 = vunpack.c.h.bf16 %v1180_v33  ;;  %v1099_v49 = vsel %vm1084_vm1, %v1096_v21, %v1098_v39  ;;  %v1387_v57 = vunpack.c.l.bf16 %v1379_v37 }
 0x100   : > { %v1229_v56 = vmul.f32 %v5201_v51, %v1203_v43  ;;  %v1562_v5 = vunpack.c.l.bf16 %v1538_v4  ;;  %v2002_v31 = vor.u32 %v2000_v50, %v1999_v25  ;;  %v2004_v44 = vrot.slane %v1999_v25, 4  ;;  %2385 = vmatmul.bf16.gmra.mxu2 %v4662_v12 }
 0x101   : > { %v2011_v45 = vor.u32 %v2009_v38, %v2008_v11  ;;  %v1157_v32 = vadd.f32 %v1099_v49, %v1002_v29  ;;  %v1230_v59 = vmul.f32 %v5201_v51, %v1204_v13  ;;  %v1231_v63 = vmul.f32 %v5201_v51, %v1205_v48  ;;  %v4699_v51 = vld [vmem:[%s6358_s5 + $0x48] sm:$0xff] }
 0x102   : > { %v1253_v58 = vadd.f32 %v1229_v56, %v1155_v24  ;;  %v1277_v0 = vmul.f32 %v5243_v16, %v1204_v13  ;;  %v2003_v1 = vsel %vm5389_vm4, %v4399_v47, %v2002_v31  ;;  %v1278_v8 = vmul.f32 %v5243_v16, %v1205_v48  ;;  %4098 = vmatpush.bf16.msrb.mxu1 %v4699_v51  ;;  %v1021_v51 = vld [vmem:[#allocation2 + $0x3c] sm:$0x1] }
 0x103   : > { %v2012_v36 = vsel %vm5389_vm4, %v2004_v44, %v2011_v45  ;;  %v1401_v46 = vmul.f32 %v5206_v53, %v1204_v13  ;;  %v2195_v18 = vunpack.c.l.b16 %v2003_v1  ;;  %v1254_v35 = vadd.f32 %v1230_v59, %v1156_v40  ;;  %v754_v44 = vpop.f32.mrf.mxu3  ;;  %v822_v45 = vld [vmem:[#allocation2 + $0x30] sm:$0x8] }
 0x104   : > { %v2196_v30 = vunpack.c.l.b16 %v2012_v36  ;;  %v1255_v9 = vadd.f32 %v1231_v63, %v1157_v32  ;;  %v1311_v17 = vrot.slane %v1277_v0, 1  ;;  %v1312_v19 = vrot.slane %v1278_v8, 1  ;;  %v824_v0 = vld [vmem:[#allocation2 + $0x38] sm:$0xf] }
 0x105   : > { %v1402_v42 = vmul.f32 %v5206_v53, %v1205_v48  ;;  %v1403_v6 = vmul.f32 %v5206_v53, %v1387_v57  ;;  %v1453_v20 = vrot.slane %v1401_v46, 2  ;;  %v1563_v21 = vunpack.c.l.bf16 %v1539_v55  ;;  %v4663_v46 = vld [vmem:[#allocation2 + $0x64] sm:$0xff] }
 0x106   : > { %v2210_v54 = vpack.c.b16 %v2196_v30, %v2195_v18  ;;  %v1564_v23 = vunpack.c.h.bf16 %v1539_v55  ;;  %v1313_v7 = vsel %vm945_vm0, %v1311_v17, %v1312_v19  ;;  %v1359_v52 = vadd.f32 %v1311_v17, %v1253_v58  ;;  %4099 = vmatpush.bf16.msrb.mxu1 %v4698_v22  ;;  %v823_v55 = vld [vmem:[#allocation2 + $0x34] sm:$0xf] }
 0x107   : > { %v1361_v27 = vadd.f32 %v1312_v19, %v1255_v9  ;;  %v1454_v47 = vrot.slane %v1402_v42, 2  ;;  %v1360_v29 = vadd.f32 %v1313_v7, %v1254_v35  ;;  %v1456_v28 = vrot.slane %v1403_v6, 2 }
 0x108   : > { %2419 = vmatmul.bf16.gmra.mxu3 %v2210_v54  ;;  %v1588_v53 = vmul.f32 %v5235_v10, %v1562_v5  ;;  %v1589_v33 = vmul.f32 %v5235_v10, %v1563_v21  ;;  %v1513_v41 = vadd.f32 %v1453_v20, %v1359_v52  ;;  %v1590_v50 = vmul.f32 %v5235_v10, %v1564_v23  ;;  %v5478_v5 = vld [vmem:[%s6355_s2] ss:$0 sm:$0xff] }
 0x109   : > { %v1455_v37 = vsel %vm1084_vm1, %v1453_v20, %v1454_v47  ;;  %v1636_v34 = vmul.f32 %v5322_v2, %v1563_v21  ;;  %v1457_v38 = vsel %vm1084_vm1, %v1454_v47, %v1456_v28  ;;  %v1637_v39 = vmul.f32 %v5322_v2, %v1564_v23  ;;  %v5489_v20 = vld [vmem:[%s6356_s3] ss:$0 sm:$0xff] }
 0x10a   : > { %v1514_v4 = vadd.f32 %v1455_v37, %v1360_v29  ;;  %v1746_v24 = vunpack.c.l.bf16 %v1738_v62  ;;  %v1515_v40 = vadd.f32 %v1457_v38, %v1361_v27  ;;  %v1612_v43 = vadd.f32 %v1588_v53, %v1513_v41  ;;  %v5499_v62 = vld [vmem:[%s6356_s3 + $0x1] ss:$0 sm:$0xff]  ;;  %v5506_v41 = vld [vmem:[%s6356_s3 + $0x2] ss:$0 sm:$0xff] }
 0x10b   : > { %v1670_v25 = vrot.slane %v1636_v34, 1  ;;  %v1760_v11 = vmul.f32 %v5216_v60, %v1563_v21  ;;  %v1671_v13 = vrot.slane %v1637_v39, 1  ;;  %v1761_v48 = vmul.f32 %v5216_v60, %v1564_v23 }
 0x10c   : > { %v1613_v12 = vadd.f32 %v1589_v33, %v1514_v4  ;;  %v1762_v10 = vmul.f32 %v5216_v60, %v1746_v24  ;;  %v1614_v49 = vadd.f32 %v1590_v50, %v1515_v40  ;;  %v752_v31 = vadd.f32 %v5478_v5, %v751_v14 }
 0x10d   : > { %v1718_v56 = vadd.f32 %v1670_v25, %v1612_v43  ;;  %v1812_v57 = vrot.slane %v1760_v11, 2  ;;  %v1672_v32 = vsel %vm945_vm0, %v1670_v25, %v1671_v13  ;;  %v1813_v59 = vrot.slane %v1761_v48, 2 }
 0x10e   : > { %v1815_v63 = vrot.slane %v1762_v10, 2  ;;  %v755_v58 = vadd.f32 %v5478_v5, %v754_v44  ;;  %v1719_v60 = vadd.f32 %v1672_v32, %v1613_v12  ;;  %v1720_v1 = vadd.f32 %v1671_v13, %v1614_v49  ;;  %v1182_v10 = vld [vmem:[#allocation2 + $0x40] sm:$0x8]  ;;  %v1183_v44 = vld [vmem:[#allocation2 + $0x44] sm:$0xff]  }
 0x10f   : > { %v1872_v36 = vadd.f32 %v1812_v57, %v1718_v56  ;;  %v775_v8 = vmax.f32 %v752_v31, 0.0  ;;  %v1814_v18 = vsel %vm1084_vm1, %v1812_v57, %v1813_v59  ;;  %v846_v9 = vunpack.c.l.bf16 %v822_v45 }
 0x110   : > { %v1816_v30 = vsel %vm1084_vm1, %v1813_v59, %v1815_v63  ;;  %v776_v35 = vmax.f32 %v755_v58, 0.0  ;;  %v1873_v14 = vadd.f32 %v1814_v18, %v1719_v60  ;;  %2390 = vmatmul.bf16.gmra.mxu2 %v4663_v46  ;;  %v847_v6 = vunpack.c.l.bf16 %v823_v55  ;;  %v1380_v18 = vld [vmem:[#allocation2 + $0x4c] sm:$0x1] }
 0x111   : > { %v1874_v15 = vadd.f32 %v1816_v30, %v1720_v1  ;;  %v1900_v17 = vadd.f32 %v5353_v3, %v1872_v36  ;;  %v791_v19 = vpack.c.bf16 %v775_v8, %v775_v8  ;;  %v848_v54 = vunpack.c.l.bf16 %v824_v0 }
 0x112   : > { %v792_v42 = vpack.c.bf16 %v776_v35, %v776_v35  ;;  %v872_v21 = vmul.f32 %v5489_v20, %v846_v9  ;;  %v1901_v23 = vadd.f32 %v5353_v3, %v1873_v14  ;;  %v1029_v52 = vunpack.c.l.bf16 %v1021_v51  ;;  %v5517_v14 = vld [vmem:[%s6356_s3 + $0x3] ss:$0 sm:$0xff] }
 0x113   : > { %v1902_v22 = vadd.f32 %v5353_v3, %v1874_v15  ;;  %v1924_v7 = vmax.f32 %v1900_v17, 0.0  ;;  %808 = vst [vmem:[#allocation2 + $0xe8] sm:$0xf] %v791_v19  ;;  %v873_v27 = vmul.f32 %v5489_v20, %v847_v6  ;;  %v874_v47 = vmul.f32 %v5489_v20, %v848_v54 }
 0x114   : > { %809 = vst [vmem:[#allocation2 + $0xf4] sm:$0xf] %v792_v42  ;;  %v919_v29 = vmul.f32 %v5499_v62, %v847_v6  ;;  %v920_v28 = vmul.f32 %v5499_v62, %v848_v54  ;;  %v1925_v53 = vmax.f32 %v1901_v23, 0.0  ;;  %v1045_v50 = vmul.f32 %v5506_v41, %v847_v6 }
 0x115   : > { %v1926_v33 = vmax.f32 %v1902_v22, 0.0  ;;  %v1948_v37 = vpack.c.bf16 %v1924_v7, %v1924_v7  ;;  %v1046_v4 = vmul.f32 %v5506_v41, %v848_v54  ;;  %v1047_v39 = vmul.f32 %v5506_v41, %v1029_v52  ;;  %v1541_v22 = vld [vmem:[#allocation2 + $0x50] sm:$0x8] }
 0x116   : > { %v955_v34 = vrot.slane %v919_v29, 1  ;;  %v956_v38 = vrot.slane %v920_v28, 1  ;;  %v1949_v24 = vpack.c.bf16 %v1925_v53, %v1925_v53  ;;  %v1100_v25 = vrot.slane %v1045_v50, 2  ;;  %v1542_v50 = vld [vmem:[#allocation2 + $0x54] sm:$0xff]  }
 0x117   : > { %v1950_v40 = vpack.c.bf16 %v1926_v33, %v1926_v33  ;;  %v2014_v43 = vshrl.u32 %v1948_v37, 16  ;;  %v1101_v48 = vrot.slane %v1046_v4, 2  ;;  %v1103_v63 = vrot.slane %v1047_v39, 2  ;;  %v5531_v33 = vld [vmem:[%s6356_s3 + $0x5] ss:$0 sm:$0xff] }
 0x118   : > { %v957_v11 = vsel %vm945_vm0, %v955_v34, %v956_v38  ;;  %v1003_v12 = vadd.f32 %v955_v34, %v872_v21  ;;  %v1005_v13 = vadd.f32 %v956_v38, %v874_v47  ;;  %v2019_v56 = vshrl.u32 %v1949_v24, 16  ;;  %v1739_v39 = vld [vmem:[#allocation2 + $0x5c] sm:$0x1] }
 0x119   : > { %v4400_v49 = vrot.slane %v2014_v43, 11  ;;  %v2022_v57 = vshll.u32 %v1949_v24, 16  ;;  %v2028_v31 = vshrl.u32 %v1950_v40, 16  ;;  %v2031_v45 = vshll.u32 %v1950_v40, 16 }
 0x11a   : > { %v1004_v32 = vadd.f32 %v957_v11, %v873_v27  ;;  %v1102_v59 = vsel %vm1084_vm1, %v1100_v25, %v1101_v48  ;;  %v2021_v58 = vrot.slane %v2019_v56, 7  ;;  %v1158_v60 = vadd.f32 %v1100_v25, %v1003_v12  ;;  %v5540_v56 = vld [vmem:[%s6356_s3 + $0x6] ss:$0 sm:$0xff] }
 0x11b   : > { %v2030_v0 = vrot.slane %v2028_v31, 7  ;;  %v1206_v1 = vunpack.c.l.bf16 %v1182_v10  ;;  %v1104_v36 = vsel %vm1084_vm1, %v1101_v48, %v1103_v63  ;;  %v1207_v46 = vunpack.c.l.bf16 %v1183_v44  ;;  %v2504_v63 = vld [vmem:[#allocation2 + $0x80] sm:$0x8] }
 0x11c   : > { %v1159_v8 = vadd.f32 %v1102_v59, %v1004_v32  ;;  %v1208_v55 = vunpack.c.h.bf16 %v1183_v44  ;;  %v2024_v30 = vor.u32 %v2022_v57, %v2021_v58  ;;  %v2026_v35 = vrot.slane %v2021_v58, 4 }
 0x11d   : > { %v2033_v9 = vor.u32 %v2031_v45, %v2030_v0  ;;  %v1160_v51 = vadd.f32 %v1104_v36, %v1005_v13  ;;  %v1232_v15 = vmul.f32 %v5517_v14, %v1206_v1  ;;  %v1233_v17 = vmul.f32 %v5517_v14, %v1207_v46 }
 0x11e   : > { %v1234_v19 = vmul.f32 %v5517_v14, %v1208_v55  ;;  %v1279_v42 = vmul.f32 %v5243_v16, %v1207_v46  ;;  %v2025_v6 = vsel %vm5389_vm4, %v4400_v49, %v2024_v30  ;;  %v1280_v21 = vmul.f32 %v5243_v16, %v1208_v55  ;;  %v2505_v30 = vld [vmem:[#allocation2 + $0x84] sm:$0xf] }
 0x11f   : > { %v2034_v54 = vsel %vm5389_vm4, %v2026_v35, %v2033_v9  ;;  %v1388_v23 = vunpack.c.l.bf16 %v1380_v18  ;;  %v2197_v7 = vunpack.c.l.b16 %v2025_v6  ;;  %v1256_v27 = vadd.f32 %v1232_v15, %v1158_v60  ;;  %v4664_v35 = vld [vmem:[#allocation2 + $0x74] sm:$0xff] }
 0x120   : > { %v2198_v52 = vunpack.c.l.b16 %v2034_v54  ;;  %v1257_v47 = vadd.f32 %v1233_v17, %v1159_v8  ;;  %v1258_v29 = vadd.f32 %v1234_v19, %v1160_v51  ;;  %v1314_v28 = vrot.slane %v1279_v42, 1  ;;  %2395 = vmatmul.bf16.gmra.mxu2 %v4664_v35 }
 0x121   : > { %v1315_v53 = vrot.slane %v1280_v21, 1  ;;  %v1404_v37 = vmul.f32 %v5531_v33, %v1207_v46  ;;  %v1405_v16 = vmul.f32 %v5531_v33, %v1208_v55  ;;  %v1406_v38 = vmul.f32 %v5531_v33, %v1388_v23  ;;  %v5552_v46 = vld [vmem:[%s6356_s3 + $0x8] ss:$0 sm:$0xff] }
 0x122   : > { %v2211_v34 = vpack.c.b16 %v2198_v52, %v2197_v7  ;;  %v1565_v4 = vunpack.c.l.bf16 %v1541_v22  ;;  %v1362_v40 = vadd.f32 %v1314_v28, %v1256_v27  ;;  %v1566_v48 = vunpack.c.l.bf16 %v1542_v50  ;;  %v5568_v52 = vld [vmem:[%s6356_s3 + $0x1] ss:$0 sm:$0xff]  ;;  %v2708_v27 = vld [vmem:[#allocation2 + $0x8c] sm:$0x1] }
 0x123   : > { %v1316_v24 = vsel %vm945_vm0, %v1314_v28, %v1315_v53  ;;  %v1364_v43 = vadd.f32 %v1315_v53, %v1258_v29  ;;  %v1458_v25 = vrot.slane %v1404_v37, 2  ;;  %v1459_v12 = vrot.slane %v1405_v16, 2 }
 0x124   : > { %2424 = vmatmul.bf16.gmra.mxu3 %v2211_v34  ;;  %v1363_v11 = vadd.f32 %v1316_v24, %v1257_v47  ;;  %v1461_v13 = vrot.slane %v1406_v38, 2  ;;  %v1567_v49 = vunpack.c.h.bf16 %v1542_v50  ;;  %v1591_v57 = vmul.f32 %v5540_v56, %v1565_v4  ;;  %v5578_v38 = vld [vmem:[%s6356_s3 + $0x2] ss:$0 sm:$0xff] }
 0x125   : > { %v1516_v10 = vadd.f32 %v1458_v25, %v1362_v40  ;;  %v1747_v31 = vunpack.c.l.bf16 %v1739_v39  ;;  %v1460_v44 = vsel %vm1084_vm1, %v1458_v25, %v1459_v12  ;;  %v1592_v32 = vmul.f32 %v5540_v56, %v1566_v48 }
 0x126   : > { %v1462_v45 = vsel %vm1084_vm1, %v1459_v12, %v1461_v13  ;;  %v1638_v59 = vmul.f32 %v5322_v2, %v1566_v48  ;;  %v1517_v58 = vadd.f32 %v1460_v44, %v1363_v11  ;;  %v1593_v60 = vmul.f32 %v5540_v56, %v1567_v49 }
 0x127   : > { %v1518_v0 = vadd.f32 %v1462_v45, %v1364_v43  ;;  %v1615_v1 = vadd.f32 %v1591_v57, %v1516_v10  ;;  %v1639_v36 = vmul.f32 %v5322_v2, %v1567_v49  ;;  %v1763_v55 = vmul.f32 %v5552_v46, %v1566_v48  ;;  %v5560_v2 = vld [vmem:[%s6356_s3] ss:$0 sm:$0xff] }
 0x128   : > { %v1673_v8 = vrot.slane %v1638_v59, 1  ;;  %v1764_v18 = vmul.f32 %v5552_v46, %v1567_v49  ;;  %v1616_v9 = vadd.f32 %v1592_v32, %v1517_v58  ;;  %v1765_v15 = vmul.f32 %v5552_v46, %v1747_v31  ;;  %v2862_v32 = vld [vmem:[#allocation2 + $0x90] sm:$0x8] }
 0x129   : > { %v1617_v51 = vadd.f32 %v1593_v60, %v1518_v0  ;;  %v2528_v17 = vunpack.c.l.bf16 %v2504_v63  ;;  %v1674_v19 = vrot.slane %v1639_v36, 1  ;;  %v1817_v6 = vrot.slane %v1763_v55, 2  ;;  %v2863_v60 = vld [vmem:[#allocation2 + $0x94] sm:$0xff]  }
 0x12a   : > { %v1721_v42 = vadd.f32 %v1673_v8, %v1615_v1  ;;  %v1818_v54 = vrot.slane %v1764_v18, 2  ;;  %v1820_v21 = vrot.slane %v1765_v15, 2  ;;  %v2529_v23 = vunpack.c.l.bf16 %v2505_v30 }
 0x12b   : > { %v2554_v22 = vmul.f32 %v5560_v2, %v2528_v17  ;;  %v2556_v7 = vmul.f32 %v5560_v2, %v5432_v61  ;;  %v1675_v47 = vsel %vm945_vm0, %v1673_v8, %v1674_v19  ;;  %v1723_v29 = vadd.f32 %v1674_v19, %v1617_v51 }
 0x12c   : > { %v1819_v28 = vsel %vm1084_vm1, %v1817_v6, %v1818_v54  ;;  %v1875_v53 = vadd.f32 %v1817_v6, %v1721_v42  ;;  %v1722_v37 = vadd.f32 %v1675_v47, %v1616_v9  ;;  %v1821_v50 = vsel %vm1084_vm1, %v1818_v54, %v1820_v21  ;;  %v5599_v9 = vld [vmem:[%s6356_s3 + $0x4] ss:$0 sm:$0xff]  ;;  %v3066_v42 = vld [vmem:[#allocation2 + $0x9c] sm:$0x1] }
 0x12d   : > { %v2555_v34 = vmul.f32 %v5560_v2, %v2529_v23  ;;  %v2604_v16 = vmul.f32 %v5568_v52, %v2529_v23  ;;  %v1877_v4 = vadd.f32 %v1821_v50, %v1723_v29  ;;  %v2605_v24 = vmul.f32 %v5568_v52, %v5432_v61 }
 0x12e   : > { %v1903_v39 = vadd.f32 %v5353_v3, %v1875_v53  ;;  %v2716_v40 = vunpack.c.l.bf16 %v2708_v27  ;;  %v1876_v43 = vadd.f32 %v1819_v28, %v1722_v37  ;;  %v2726_v11 = vmul.f32 %v5578_v38, %v2529_v23 }
 0x12f   : > { %v2636_v25 = vrot.slane %v2604_v16, 1  ;;  %v2727_v12 = vmul.f32 %v5578_v38, %v5432_v61  ;;  %v1905_v13 = vadd.f32 %v5353_v3, %v1877_v4  ;;  %v2637_v10 = vrot.slane %v2605_v24, 1 }
 0x130   : > { %v1927_v48 = vmax.f32 %v1903_v39, 0.0  ;;  %v2728_v49 = vmul.f32 %v5578_v38, %v2716_v40  ;;  %v1904_v57 = vadd.f32 %v5353_v3, %v1876_v43  ;;  %v2774_v44 = vrot.slane %v2726_v11, 2  ;;  %v5594_v3 = vld [vmem:[%s6356_s3 + $0x3] ss:$0 sm:$0xff] }
 0x131   : > { %v2684_v31 = vadd.f32 %v2636_v25, %v2554_v22  ;;  %v2775_v45 = vrot.slane %v2727_v12, 2  ;;  %v1929_v59 = vmax.f32 %v1905_v13, 0.0  ;;  %v2638_v58 = vsel %vm945_vm0, %v2636_v25, %v2637_v10  ;;  %v5605_v22 = vld [vmem:[%s6356_s3 + $0x5] ss:$0 sm:$0xff] }
 0x132   : > { %v1951_v63 = vpack.c.bf16 %v1927_v48, %v1927_v48  ;;  %v2686_v0 = vadd.f32 %v2637_v10, %v2556_v7  ;;  %v1928_v1 = vmax.f32 %v1904_v57, 0.0  ;;  %v2685_v61 = vadd.f32 %v2638_v58, %v2555_v34 }
 0x133   : > { %v2776_v36 = vsel %vm1084_vm1, %v2774_v44, %v2775_v45  ;;  %v2777_v8 = vrot.slane %v2728_v49, 2  ;;  %v1953_v55 = vpack.c.bf16 %v1929_v59, %v1929_v59  ;;  %v2838_v30 = vadd.f32 %v2774_v44, %v2684_v31  ;;  %v3221_v44 = vld [vmem:[#allocation2 + $0xa0] sm:$0x8]  ;;  %v4686_v59 = vld [vmem:[#allocation2 + $0xd4] sm:$0xff] }
 0x134   : > { %v2036_v18 = vshrl.u32 %v1951_v63, 16  ;;  %v2886_v35 = vunpack.c.l.bf16 %v2862_v32  ;;  %v1952_v51 = vpack.c.bf16 %v1928_v1, %v1928_v1  ;;  %v2839_v17 = vadd.f32 %v2776_v36, %v2685_v61  ;;  %v756_v32 = vpop.f32.mrf.mxu3  ;;  %v3425_v1 = vld [vmem:[#allocation2 + $0xac] sm:$0x1]  ;;  %4071 = vmatmul.bf16.gmra.mxu0 %v4686_v59  ;;  %v827_v59 = vld [vmem:[#allocation2 + $0x48] sm:$0xf] }
 0x135   : > { %v2778_v15 = vsel %vm1084_vm1, %v2775_v45, %v2777_v8  ;;  %v2887_v19 = vunpack.c.l.bf16 %v2863_v60  ;;  %v2050_v54 = vshrl.u32 %v1953_v55, 16  ;;  %v2053_v21 = vshll.u32 %v1953_v55, 16  ;;  %v3222_v45 = vld [vmem:[#allocation2 + $0xa4] sm:$0xff]  }
 0x136   : > { %v4401_v6 = vrot.slane %v2036_v18, 11  ;;  %v2840_v23 = vadd.f32 %v2778_v15, %v2686_v0  ;;  %v2041_v7 = vshrl.u32 %v1952_v51, 16  ;;  %v2044_v27 = vshll.u32 %v1952_v51, 16  ;;  %v5623_v15 = vld [vmem:[%s6356_s3 + $0x6] ss:$0 sm:$0xff] }
 0x137   : > { %v2888_v47 = vunpack.c.h.bf16 %v2863_v60  ;;  %v2912_v29 = vmul.f32 %v5594_v3, %v2886_v35  ;;  %v2052_v28 = vrot.slane %v2050_v54, 7  ;;  %v2913_v53 = vmul.f32 %v5594_v3, %v2887_v19 }
 0x138   : > { %v2962_v37 = vmul.f32 %v5599_v9, %v2887_v19  ;;  %v3074_v50 = vunpack.c.l.bf16 %v3066_v42  ;;  %v2043_v34 = vrot.slane %v2041_v7, 7  ;;  %v3084_v25 = vmul.f32 %v5605_v22, %v2887_v19 }
 0x139   : > { %v2914_v16 = vmul.f32 %v5594_v3, %v2888_v47  ;;  %v2936_v4 = vadd.f32 %v2912_v29, %v2838_v30  ;;  %v2963_v39 = vmul.f32 %v5599_v9, %v2888_v47  ;;  %v2055_v24 = vor.u32 %v2053_v21, %v2052_v28 }
 0x13a   : > { %v2937_v40 = vadd.f32 %v2913_v53, %v2839_v17  ;;  %v2994_v43 = vrot.slane %v2962_v37, 1  ;;  %v2046_v11 = vor.u32 %v2044_v27, %v2043_v34  ;;  %v2048_v12 = vrot.slane %v2043_v34, 4 }
 0x13b   : > { %v2938_v13 = vadd.f32 %v2914_v16, %v2840_v23  ;;  %v2995_v48 = vrot.slane %v2963_v39, 1  ;;  %v3085_v49 = vmul.f32 %v5605_v22, %v2888_v47  ;;  %v3086_v57 = vmul.f32 %v5605_v22, %v3074_v50  ;;  %v5637_v47 = vld [vmem:[%s6356_s3 + $0x8] ss:$0 sm:$0xff] }
 0x13c   : > { %v3042_v10 = vadd.f32 %v2994_v43, %v2936_v4  ;;  %v3132_v31 = vrot.slane %v3084_v25, 2  ;;  %v2047_v63 = vsel %vm5389_vm4, %v4401_v6, %v2046_v11  ;;  %v2056_v58 = vsel %vm5389_vm4, %v2048_v12, %v2055_v24  ;;  %v5629_v6 = vld [vmem:[%s6356_s3 + $0x7] ss:$0 sm:$0xff]  ;;  %v759_v25 = vpop.f32.mrf.mxu3 }
 0x13d   : > { %v2996_v0 = vsel %vm945_vm0, %v2994_v43, %v2995_v48  ;;  %v3044_v60 = vadd.f32 %v2995_v48, %v2938_v13  ;;  %v2199_v61 = vunpack.c.l.b16 %v2047_v63  ;;  %v2200_v36 = vunpack.c.l.b16 %v2056_v58 }
 0x13e   : > { %v3043_v8 = vadd.f32 %v2996_v0, %v2937_v40  ;;  %v3133_v55 = vrot.slane %v3085_v49, 2  ;;  %v3135_v18 = vrot.slane %v3086_v57, 2  ;;  %v3196_v30 = vadd.f32 %v3132_v31, %v3042_v10  ;;  %v825_v10 = vld [vmem:[#allocation2 + $0x40] sm:$0x8]  ;;  %v826_v49 = vld [vmem:[#allocation2 + $0x44] sm:$0xf] }
 0x13f   : > { %v3245_v35 = vunpack.c.l.bf16 %v3221_v44  ;;  %v3246_v51 = vunpack.c.l.bf16 %v3222_v45  ;;  %v2212_v17 = vpack.c.b16 %v2200_v36, %v2199_v61  ;;  %v3247_v42 = vunpack.c.h.bf16 %v3222_v45 }
 0x140   : > { %v3134_v19 = vsel %vm1084_vm1, %v3132_v31, %v3133_v55  ;;  %v3433_v54 = vunpack.c.l.bf16 %v3425_v1  ;;  %v3136_v21 = vsel %vm1084_vm1, %v3133_v55, %v3135_v18  ;;  %v757_v13 = vadd.f32 %v5478_v5, %v756_v32 }
 0x141   : > { %v3197_v23 = vadd.f32 %v3134_v19, %v3043_v8  ;;  %v3271_v7 = vmul.f32 %v5623_v15, %v3245_v35  ;;  %v3272_v27 = vmul.f32 %v5623_v15, %v3246_v51  ;;  %2429 = vmatmul.bf16.gmra.mxu3 %v2212_v17  ;;  %v3198_v29 = vadd.f32 %v3136_v21, %v3044_v60  ;;  %v1022_v8 = vld [vmem:[#allocation2 + $0x4c] sm:$0x1] }
 0x142   : > { %v3273_v28 = vmul.f32 %v5623_v15, %v3247_v42  ;;  %v3321_v53 = vmul.f32 %v5629_v6, %v3246_v51  ;;  %v3322_v37 = vmul.f32 %v5629_v6, %v3247_v42  ;;  %v3443_v16 = vmul.f32 %v5637_v47, %v3246_v51 }
 0x143   : > { %v3295_v50 = vadd.f32 %v3271_v7, %v3196_v30  ;;  %v3296_v34 = vadd.f32 %v3272_v27, %v3197_v23  ;;  %v3444_v4 = vmul.f32 %v5637_v47, %v3247_v42  ;;  %v3445_v43 = vmul.f32 %v5637_v47, %v3433_v54 }
 0x144   : > { %v3297_v39 = vadd.f32 %v3273_v28, %v3198_v29  ;;  %v3353_v24 = vrot.slane %v3321_v53, 1  ;;  %v3354_v40 = vrot.slane %v3322_v37, 1  ;;  %v3491_v11 = vrot.slane %v3443_v16, 2 }
 0x145   : > { %v3492_v12 = vrot.slane %v3444_v4, 2  ;;  %v760_v48 = vadd.f32 %v5478_v5, %v759_v25  ;;  %v3494_v45 = vrot.slane %v3445_v43, 2  ;;  %v777_v0 = vmax.f32 %v757_v13, 0.0  ;;  %v5653_v5 = vld [vmem:[%s6357_s4] ss:$0 sm:$0xff] }
 0x146   : > { %v3355_v57 = vsel %vm945_vm0, %v3353_v24, %v3354_v40  ;;  %v3401_v31 = vadd.f32 %v3353_v24, %v3295_v50  ;;  %v3403_v44 = vadd.f32 %v3354_v40, %v3297_v39  ;;  %v849_v32 = vunpack.c.l.bf16 %v825_v10 }
 0x147   : > { %v3402_v63 = vadd.f32 %v3355_v57, %v3296_v34  ;;  %v3493_v58 = vsel %vm1084_vm1, %v3491_v11, %v3492_v12  ;;  %v778_v60 = vmax.f32 %v760_v48, 0.0  ;;  %v3495_v1 = vsel %vm1084_vm1, %v3492_v12, %v3494_v45  ;;  %v1186_v57 = vld [vmem:[#allocation2 + $0x54] sm:$0xff]  }
 0x148   : > { %v3555_v61 = vadd.f32 %v3491_v11, %v3401_v31  ;;  %v850_v36 = vunpack.c.l.bf16 %v826_v49  ;;  %v3557_v18 = vadd.f32 %v3495_v1, %v3403_v44  ;;  %v793_v30 = vpack.c.bf16 %v777_v0, %v777_v0 }
 0x149   : > { %v3556_v55 = vadd.f32 %v3493_v58, %v3402_v63  ;;  %v794_v35 = vpack.c.bf16 %v778_v60, %v778_v60  ;;  %v851_v17 = vunpack.c.l.bf16 %v827_v59  ;;  %v875_v19 = vmul.f32 %v5489_v20, %v849_v32  ;;  %v1185_v63 = vld [vmem:[#allocation2 + $0x50] sm:$0x8] }
 0x14a   : > { %v3583_v51 = vadd.f32 %v5653_v5, %v3555_v61  ;;  %v876_v42 = vmul.f32 %v5489_v20, %v850_v36  ;;  %v3585_v21 = vadd.f32 %v5653_v5, %v3557_v18  ;;  %810 = vst [vmem:[#allocation2 + $0xf8] sm:$0xf] %v793_v30  ;;  %v921_v23 = vmul.f32 %v5499_v62, %v850_v36  ;;  %v1381_v61 = vld [vmem:[#allocation2 + $0x5c] sm:$0x1] }
 0x14b   : > { %v3584_v54 = vadd.f32 %v5653_v5, %v3556_v55  ;;  %v1030_v7 = vunpack.c.l.bf16 %v1022_v8  ;;  %811 = vst [vmem:[#allocation2 + $0x104] sm:$0xf] %v794_v35  ;;  %v877_v29 = vmul.f32 %v5489_v20, %v851_v17  ;;  %v922_v28 = vmul.f32 %v5499_v62, %v851_v17 }
 0x14c   : > { %v3607_v27 = vmax.f32 %v3583_v51, 0.0  ;;  %v1048_v53 = vmul.f32 %v5506_v41, %v850_v36  ;;  %v3609_v50 = vmax.f32 %v3585_v21, 0.0  ;;  %v958_v34 = vrot.slane %v921_v23, 1 }
 0x14d   : > { %v3608_v37 = vmax.f32 %v3584_v54, 0.0  ;;  %v1049_v16 = vmul.f32 %v5506_v41, %v851_v17  ;;  %v959_v39 = vrot.slane %v922_v28, 1  ;;  %v1050_v24 = vmul.f32 %v5506_v41, %v1030_v7 }
 0x14e   : > { %v3631_v4 = vpack.c.bf16 %v3607_v27, %v3607_v27  ;;  %v1105_v40 = vrot.slane %v1048_v53, 2  ;;  %v3633_v25 = vpack.c.bf16 %v3609_v50, %v3609_v50  ;;  %v1006_v11 = vadd.f32 %v958_v34, %v875_v19  ;;  %v5675_v27 = vld [vmem:[%s6356_s3 + $0x4] ss:$0 sm:$0xff] }
 0x14f   : > { %v3632_v43 = vpack.c.bf16 %v3608_v37, %v3608_v37  ;;  %v1106_v12 = vrot.slane %v1049_v16, 2  ;;  %v960_v48 = vsel %vm945_vm0, %v958_v34, %v959_v39  ;;  %v1008_v10 = vadd.f32 %v959_v39, %v877_v29  ;;  %v1544_v34 = vld [vmem:[#allocation2 + $0x60] sm:$0x8] }
 0x150   : > { %v3656_v13 = vshrl.u32 %v3631_v4, 16  ;;  %v1108_v49 = vrot.slane %v1050_v24, 2  ;;  %v3670_v45 = vshrl.u32 %v3633_v25, 16  ;;  %v3673_v59 = vshll.u32 %v3633_v25, 16 }
 0x151   : > { %v3661_v31 = vshrl.u32 %v3632_v43, 16  ;;  %v3664_v44 = vshll.u32 %v3632_v43, 16  ;;  %v1007_v0 = vadd.f32 %v960_v48, %v876_v42  ;;  %v1107_v60 = vsel %vm1084_vm1, %v1105_v40, %v1106_v12 }
 0x152   : > { %v4502_v58 = vrot.slane %v3656_v13, 11  ;;  %v1109_v1 = vsel %vm1084_vm1, %v1106_v12, %v1108_v49  ;;  %v3672_v36 = vrot.slane %v3670_v45, 7  ;;  %v1161_v8 = vadd.f32 %v1105_v40, %v1006_v11  ;;  %v1545_v12 = vld [vmem:[#allocation2 + $0x64] sm:$0xff]  }
 0x153   : > { %v3663_v32 = vrot.slane %v3661_v31, 7  ;;  %v1163_v55 = vadd.f32 %v1109_v1, %v1008_v10  ;;  %v1162_v18 = vadd.f32 %v1107_v60, %v1007_v0  ;;  %v1209_v30 = vunpack.c.l.bf16 %v1185_v63 }
 0x154   : > { %v1210_v35 = vunpack.c.l.bf16 %v1186_v57  ;;  %v1211_v51 = vunpack.c.h.bf16 %v1186_v57  ;;  %v3675_v54 = vor.u32 %v3673_v59, %v3672_v36  ;;  %v1389_v21 = vunpack.c.l.bf16 %v1381_v61  ;;  %v1740_v57 = vld [vmem:[#allocation2 + $0x6c] sm:$0x1] }
 0x155   : > { %v3666_v17 = vor.u32 %v3664_v44, %v3663_v32  ;;  %v3668_v19 = vrot.slane %v3663_v32, 4  ;;  %v1235_v23 = vmul.f32 %v5517_v14, %v1209_v30  ;;  %v1568_v49 = vunpack.c.l.bf16 %v1544_v34 }
 0x156   : > { %v1236_v42 = vmul.f32 %v5517_v14, %v1210_v35  ;;  %v1237_v7 = vmul.f32 %v5517_v14, %v1211_v51  ;;  %v1281_v29 = vmul.f32 %v5675_v27, %v1210_v35  ;;  %v1282_v37 = vmul.f32 %v5675_v27, %v1211_v51 }
 0x157   : > { %v3667_v28 = vsel %vm5389_vm4, %v4502_v58, %v3666_v17  ;;  %v3676_v53 = vsel %vm5389_vm4, %v3668_v19, %v3675_v54  ;;  %v1407_v50 = vmul.f32 %v5531_v33, %v1210_v35  ;;  %v1259_v39 = vadd.f32 %v1235_v23, %v1161_v8  ;;  %v2507_v35 = vld [vmem:[#allocation2 + $0x90] sm:$0x8]  ;;  %v5695_v19 = vld [vmem:[%s6356_s3 + $0x7] ss:$0 sm:$0xff]  ;;  %v2508_v23 = vld [vmem:[#allocation2 + $0x94] sm:$0xf] }
 0x158   : > { %v3879_v16 = vunpack.c.l.b16 %v3667_v28  ;;  %v3880_v4 = vunpack.c.l.b16 %v3676_v53  ;;  %v1260_v24 = vadd.f32 %v1236_v42, %v1162_v18  ;;  %v1261_v40 = vadd.f32 %v1237_v7, %v1163_v55  ;;  %v2509_v42 = vld [vmem:[#allocation2 + $0x98] sm:$0xf] }
 0x159   : > { %v1317_v43 = vrot.slane %v1281_v29, 1  ;;  %v1318_v25 = vrot.slane %v1282_v37, 1  ;;  %v1408_v11 = vmul.f32 %v5531_v33, %v1211_v51  ;;  %v1409_v48 = vmul.f32 %v5531_v33, %v1389_v21 }
 0x15a   : > { %v3895_v13 = vpack.c.b16 %v3880_v4, %v3879_v16  ;;  %v1463_v10 = vrot.slane %v1407_v50, 2  ;;  %v1569_v0 = vunpack.c.l.bf16 %v1545_v12  ;;  %v1570_v60 = vunpack.c.h.bf16 %v1545_v12  ;;  %v2709_v12 = vld [vmem:[#allocation2 + $0x9c] sm:$0x1] }
 0x15b   : > { %v1319_v31 = vsel %vm945_vm0, %v1317_v43, %v1318_v25  ;;  %v1365_v44 = vadd.f32 %v1317_v43, %v1259_v39  ;;  %v1367_v45 = vadd.f32 %v1318_v25, %v1261_v40  ;;  %v1464_v59 = vrot.slane %v1408_v11, 2 }
 0x15c   : > { %4100 = vmatmul.bf16.vlgmr.msrb.gmra.mxu1 %v3895_v13  ;;  %v1366_v63 = vadd.f32 %v1319_v31, %v1260_v24  ;;  %v1466_v58 = vrot.slane %v1409_v48, 2  ;;  %v1594_v32 = vmul.f32 %v5540_v56, %v1568_v49  ;;  %v1748_v36 = vunpack.c.l.bf16 %v1740_v57 }
 0x15d   : > { %v1465_v1 = vsel %vm1084_vm1, %v1463_v10, %v1464_v59  ;;  %v1519_v61 = vadd.f32 %v1463_v10, %v1365_v44  ;;  %v1595_v18 = vmul.f32 %v5540_v56, %v1569_v0  ;;  %v1596_v30 = vmul.f32 %v5540_v56, %v1570_v60 }
 0x15e   : > { %v1467_v8 = vsel %vm1084_vm1, %v1464_v59, %v1466_v58  ;;  %v1520_v55 = vadd.f32 %v1465_v1, %v1366_v63  ;;  %v1640_v54 = vmul.f32 %v5695_v19, %v1569_v0  ;;  %v1641_v21 = vmul.f32 %v5695_v19, %v1570_v60 }
 0x15f   : > { %v1521_v51 = vadd.f32 %v1467_v8, %v1367_v45  ;;  %v1618_v17 = vadd.f32 %v1594_v32, %v1519_v61  ;;  %v1766_v29 = vmul.f32 %v5552_v46, %v1569_v0  ;;  %v1767_v28 = vmul.f32 %v5552_v46, %v1570_v60  ;;  %v5713_v0 = vld [vmem:[%s6357_s4] ss:$0 sm:$0xff] }
 0x160   : > { %v1619_v7 = vadd.f32 %v1595_v18, %v1520_v55  ;;  %v1768_v56 = vmul.f32 %v5552_v46, %v1748_v36  ;;  %v1676_v37 = vrot.slane %v1640_v54, 1  ;;  %v1677_v50 = vrot.slane %v1641_v21, 1 }
 0x161   : > { %v1620_v53 = vadd.f32 %v1596_v30, %v1521_v51  ;;  %v2531_v34 = vunpack.c.l.bf16 %v2507_v35  ;;  %v1822_v16 = vrot.slane %v1766_v29, 2  ;;  %v1823_v4 = vrot.slane %v1767_v28, 2 }
 0x162   : > { %v1825_v39 = vrot.slane %v1768_v56, 2  ;;  %v2532_v24 = vunpack.c.l.bf16 %v2508_v23  ;;  %v1678_v40 = vsel %vm945_vm0, %v1676_v37, %v1677_v50  ;;  %v1724_v43 = vadd.f32 %v1676_v37, %v1618_v17  ;;  %v2865_v17 = vld [vmem:[#allocation2 + $0xa0] sm:$0x8] }
 0x163   : > { %v1726_v25 = vadd.f32 %v1677_v50, %v1620_v53  ;;  %v2533_v11 = vunpack.c.l.bf16 %v2509_v42  ;;  %v1725_v13 = vadd.f32 %v1678_v40, %v1619_v7  ;;  %v1824_v48 = vsel %vm1084_vm1, %v1822_v16, %v1823_v4  ;;  %v2866_v53 = vld [vmem:[#allocation2 + $0xa4] sm:$0xff]  }
 0x164   : > { %v1826_v10 = vsel %vm1084_vm1, %v1823_v4, %v1825_v39  ;;  %v2557_v46 = vmul.f32 %v5560_v2, %v2531_v34  ;;  %v1878_v49 = vadd.f32 %v1822_v16, %v1724_v43  ;;  %v2558_v31 = vmul.f32 %v5560_v2, %v2532_v24 }
 0x165   : > { %v1880_v57 = vadd.f32 %v1826_v10, %v1726_v25  ;;  %v2559_v44 = vmul.f32 %v5560_v2, %v2533_v11  ;;  %v1879_v45 = vadd.f32 %v1824_v48, %v1725_v13  ;;  %v2606_v59 = vmul.f32 %v5568_v52, %v2532_v24  ;;  %v4665_v2 = vld [vmem:[#allocation2 + $0x84] sm:$0xff] }
 0x166   : > { %v2607_v63 = vmul.f32 %v5568_v52, %v2533_v11  ;;  %v2717_v58 = vunpack.c.l.bf16 %v2709_v12  ;;  %v1906_v60 = vadd.f32 %v5713_v0, %v1878_v49  ;;  %v2729_v61 = vmul.f32 %v5578_v38, %v2532_v24  ;;  %2400 = vmatmul.bf16.gmra.mxu2 %v4665_v2  ;;  %v3067_v12 = vld [vmem:[#allocation2 + $0xac] sm:$0x1] }
 0x167   : > { %v1908_v1 = vadd.f32 %v5713_v0, %v1880_v57  ;;  %v2730_v32 = vmul.f32 %v5578_v38, %v2533_v11  ;;  %v1907_v36 = vadd.f32 %v5713_v0, %v1879_v45  ;;  %v2639_v8 = vrot.slane %v2606_v59, 1 }
 0x168   : > { %v2640_v55 = vrot.slane %v2607_v63, 1  ;;  %v2731_v52 = vmul.f32 %v5578_v38, %v2717_v58  ;;  %v1930_v18 = vmax.f32 %v1906_v60, 0.0  ;;  %v2779_v35 = vrot.slane %v2729_v61, 2 }
 0x169   : > { %v1932_v30 = vmax.f32 %v1908_v1, 0.0  ;;  %v2780_v51 = vrot.slane %v2730_v32, 2  ;;  %v1931_v54 = vmax.f32 %v1907_v36, 0.0  ;;  %v2687_v23 = vadd.f32 %v2639_v8, %v2557_v46 }
 0x16a   : > { %v2641_v21 = vsel %vm945_vm0, %v2639_v8, %v2640_v55  ;;  %v2689_v42 = vadd.f32 %v2640_v55, %v2559_v44  ;;  %v1954_v7 = vpack.c.bf16 %v1930_v18, %v1930_v18  ;;  %v2782_v50 = vrot.slane %v2731_v52, 2 }
 0x16b   : > { %v1956_v29 = vpack.c.bf16 %v1932_v30, %v1932_v30  ;;  %v2688_v28 = vadd.f32 %v2641_v21, %v2558_v31  ;;  %v2781_v56 = vsel %vm1084_vm1, %v2779_v35, %v2780_v51  ;;  %v1955_v37 = vpack.c.bf16 %v1931_v54, %v1931_v54  ;;  %v3224_v30 = vld [vmem:[#allocation2 + $0xb0] sm:$0x8] }
 0x16c   : > { %v2841_v38 = vadd.f32 %v2779_v35, %v2687_v23  ;;  %v2889_v34 = vunpack.c.l.bf16 %v2865_v17  ;;  %v2058_v16 = vshrl.u32 %v1954_v7, 16  ;;  %v2783_v25 = vsel %vm1084_vm1, %v2780_v51, %v2782_v50  ;;  %v3225_v35 = vld [vmem:[#allocation2 + $0xb4] sm:$0xff]   ;;  %v4687_v51 = vld [vmem:[#allocation2 + $0xe4] sm:$0xff] }
 0x16d   : > { %v2072_v4 = vshrl.u32 %v1956_v29, 16  ;;  %v2075_v39 = vshll.u32 %v1956_v29, 16  ;;  %v2842_v24 = vadd.f32 %v2781_v56, %v2688_v28  ;;  %v2063_v40 = vshrl.u32 %v1955_v37, 16  ;;  %4076 = vmatmul.bf16.gmra.mxu0 %v4687_v51 }
 0x16e   : > { %v2066_v43 = vshll.u32 %v1955_v37, 16  ;;  %v2890_v11 = vunpack.c.l.bf16 %v2866_v53  ;;  %v4402_v13 = vrot.slane %v2058_v16, 11  ;;  %v2843_v10 = vadd.f32 %v2783_v25, %v2689_v42  ;;  %v3426_v42 = vld [vmem:[#allocation2 + $0xbc] sm:$0x1] }
 0x16f   : > { %v2074_v48 = vrot.slane %v2072_v4, 7  ;;  %v2891_v46 = vunpack.c.h.bf16 %v2866_v53  ;;  %v2065_v49 = vrot.slane %v2063_v40, 7  ;;  %v2915_v57 = vmul.f32 %v5594_v3, %v2889_v34 }
 0x170   : > { %v2916_v31 = vmul.f32 %v5594_v3, %v2890_v11  ;;  %v2964_v44 = vmul.f32 %v5599_v9, %v2890_v11  ;;  %v3075_v58 = vunpack.c.l.bf16 %v3067_v12  ;;  %v3087_v55 = vmul.f32 %v5605_v22, %v2890_v11 }
 0x171   : > { %v2077_v45 = vor.u32 %v2075_v39, %v2074_v48  ;;  %v2917_v59 = vmul.f32 %v5594_v3, %v2891_v46  ;;  %v2965_v63 = vmul.f32 %v5599_v9, %v2891_v46  ;;  %v2068_v60 = vor.u32 %v2066_v43, %v2065_v49  ;;  %v761_v48 = vpop.f32.mrf.mxu3 }
 0x172   : > { %v2070_v1 = vrot.slane %v2065_v49, 4  ;;  %v2939_v61 = vadd.f32 %v2915_v57, %v2841_v38  ;;  %v2940_v32 = vadd.f32 %v2916_v31, %v2842_v24  ;;  %v2997_v36 = vrot.slane %v2964_v44, 1 }
 0x173   : > { %v2941_v2 = vadd.f32 %v2917_v59, %v2843_v10  ;;  %v2998_v8 = vrot.slane %v2965_v63, 1  ;;  %v2069_v52 = vsel %vm5389_vm4, %v4402_v13, %v2068_v60  ;;  %v3088_v3 = vmul.f32 %v5605_v22, %v2891_v46  ;;  %v828_v10 = vld [vmem:[#allocation2 + $0x50] sm:$0x8]  ;;  %v830_v60 = vld [vmem:[#allocation2 + $0x58] sm:$0xf] }
 0x174   : > { %v2078_v18 = vsel %vm5389_vm4, %v2070_v1, %v2077_v45  ;;  %v3089_v9 = vmul.f32 %v5605_v22, %v3075_v58  ;;  %v2201_v17 = vunpack.c.l.b16 %v2069_v52  ;;  %v3045_v23 = vadd.f32 %v2997_v36, %v2939_v61  ;;  %v829_v58 = vld [vmem:[#allocation2 + $0x54] sm:$0xf] }
 0x175   : > { %v2202_v54 = vunpack.c.l.b16 %v2078_v18  ;;  %v2999_v21 = vsel %vm945_vm0, %v2997_v36, %v2998_v8  ;;  %v3047_v29 = vadd.f32 %v2998_v8, %v2941_v2  ;;  %v3137_v28 = vrot.slane %v3087_v55, 2 }
 0x176   : > { %v3046_v7 = vadd.f32 %v2999_v21, %v2940_v32  ;;  %v3138_v56 = vrot.slane %v3088_v3, 2  ;;  %v3140_v37 = vrot.slane %v3089_v9, 2  ;;  %v3248_v50 = vunpack.c.l.bf16 %v3224_v30  ;;  %v4861_v32 = vld [vmem:[%s6355_s2] ss:$0 sm:$0xff] }
 0x177   : > { %v2213_v53 = vpack.c.b16 %v2202_v54, %v2201_v17  ;;  %v3249_v38 = vunpack.c.l.bf16 %v3225_v35  ;;  %v3199_v34 = vadd.f32 %v3137_v28, %v3045_v23  ;;  %v3250_v16 = vunpack.c.h.bf16 %v3225_v35  ;;  %v1023_v23 = vld [vmem:[#allocation2 + $0x5c] sm:$0x1] }
 0x178   : > { %v3139_v22 = vsel %vm1084_vm1, %v3137_v28, %v3138_v56  ;;  %v3434_v4 = vunpack.c.l.bf16 %v3426_v42  ;;  %v3141_v39 = vsel %vm1084_vm1, %v3138_v56, %v3140_v37  ;;  %v3274_v40 = vmul.f32 %v5623_v15, %v3248_v50  ;;  %v5757_v28 = vld [vmem:[%s6356_s3] ss:$0 sm:$0xff] }
 0x179   : > { %2434 = vmatmul.bf16.gmra.mxu3 %v2213_v53  ;;  %v3200_v24 = vadd.f32 %v3139_v22, %v3046_v7  ;;  %v3275_v43 = vmul.f32 %v5623_v15, %v3249_v38  ;;  %v3201_v25 = vadd.f32 %v3141_v39, %v3047_v29  ;;  %v3276_v11 = vmul.f32 %v5623_v15, %v3250_v16 }
 0x17a   : > { %v3323_v12 = vmul.f32 %v5629_v6, %v3249_v38  ;;  %v3324_v13 = vmul.f32 %v5629_v6, %v3250_v16  ;;  %v3298_v46 = vadd.f32 %v3274_v40, %v3199_v34  ;;  %v3446_v57 = vmul.f32 %v5637_v47, %v3249_v38 }
 0x17b   : > { %v3299_v49 = vadd.f32 %v3275_v43, %v3200_v24  ;;  %v3447_v31 = vmul.f32 %v5637_v47, %v3250_v16  ;;  %v3300_v44 = vadd.f32 %v3276_v11, %v3201_v25  ;;  %v3448_v63 = vmul.f32 %v5637_v47, %v3434_v4  ;;  %v5771_v11 = vld [vmem:[%s6356_s3 + $0x2] ss:$0 sm:$0xff] }
 0x17c   : > { %v3356_v45 = vrot.slane %v3323_v12, 1  ;;  %v3357_v59 = vrot.slane %v3324_v13, 1  ;;  %v3496_v1 = vrot.slane %v3446_v57, 2  ;;  %v762_v2 = vadd.f32 %v4861_v32, %v761_v48  ;;  %v1188_v13 = vld [vmem:[#allocation2 + $0x60] sm:$0x8] }
 0x17d   : > { %v3497_v61 = vrot.slane %v3447_v31, 2  ;;  %v852_v36 = vunpack.c.l.bf16 %v828_v10  ;;  %v3499_v18 = vrot.slane %v3448_v63, 2  ;;  %v853_v35 = vunpack.c.l.bf16 %v829_v58 }
 0x17e   : > { %v3358_v8 = vsel %vm945_vm0, %v3356_v45, %v3357_v59  ;;  %v3404_v55 = vadd.f32 %v3356_v45, %v3298_v46  ;;  %v3406_v52 = vadd.f32 %v3357_v59, %v3300_v44  ;;  %v779_v30 = vmax.f32 %v762_v2, 0.0  ;;  %v1189_v45 = vld [vmem:[#allocation2 + $0x64] sm:$0xff]  }
 0x17f   : > { %v3405_v3 = vadd.f32 %v3358_v8, %v3299_v49  ;;  %v3498_v9 = vsel %vm1084_vm1, %v3496_v1, %v3497_v61  ;;  %v3500_v51 = vsel %vm1084_vm1, %v3497_v61, %v3499_v18  ;;  %v854_v54 = vunpack.c.l.bf16 %v830_v60  ;;  %v1382_v18 = vld [vmem:[#allocation2 + $0x6c] sm:$0x1] }
 0x180   : > { %v3558_v17 = vadd.f32 %v3496_v1, %v3404_v55  ;;  %v878_v21 = vmul.f32 %v5489_v20, %v852_v36  ;;  %v3560_v7 = vadd.f32 %v3500_v51, %v3406_v52  ;;  %v795_v29 = vpack.c.bf16 %v779_v30, %v779_v30 }
 0x181   : > { %v3559_v42 = vadd.f32 %v3498_v9, %v3405_v3  ;;  %v879_v56 = vmul.f32 %v5757_v28, %v853_v35  ;;  %v880_v37 = vmul.f32 %v5757_v28, %v854_v54  ;;  %v923_v50 = vmul.f32 %v5499_v62, %v853_v35 }
 0x182   : > { %v3586_v53 = vadd.f32 %v5653_v5, %v3558_v17  ;;  %v924_v38 = vmul.f32 %v5499_v62, %v854_v54  ;;  %v3588_v22 = vadd.f32 %v5653_v5, %v3560_v7  ;;  %812 = vst [vmem:[#allocation2 + $0x108] sm:$0xf] %v795_v29  ;;  %v1031_v34 = vunpack.c.l.bf16 %v1023_v23 }
 0x183   : > { %v3587_v20 = vadd.f32 %v5653_v5, %v3559_v42  ;;  %v1051_v16 = vmul.f32 %v5506_v41, %v853_v35  ;;  %v961_v39 = vrot.slane %v923_v50, 1  ;;  %v1052_v40 = vmul.f32 %v5506_v41, %v854_v54 }
 0x184   : > { %v3610_v4 = vmax.f32 %v3586_v53, 0.0  ;;  %v962_v24 = vrot.slane %v924_v38, 1  ;;  %v3612_v25 = vmax.f32 %v3588_v22, 0.0  ;;  %v1053_v62 = vmul.f32 %v5771_v11, %v1031_v34 }
 0x185   : > { %v3611_v43 = vmax.f32 %v3587_v20, 0.0  ;;  %v1110_v12 = vrot.slane %v1051_v16, 2  ;;  %v1009_v46 = vadd.f32 %v961_v39, %v878_v21  ;;  %v1111_v41 = vrot.slane %v1052_v40, 2  ;;  %v1547_v16 = vld [vmem:[#allocation2 + $0x70] sm:$0x8] }
 0x186   : > { %v3634_v48 = vpack.c.bf16 %v3610_v4, %v3610_v4  ;;  %v963_v10 = vsel %vm945_vm0, %v961_v39, %v962_v24  ;;  %v1011_v49 = vadd.f32 %v962_v24, %v880_v37  ;;  %v3636_v31 = vpack.c.bf16 %v3612_v25, %v3612_v25  ;;  %v5795_v25 = vld [vmem:[%s6356_s3 + $0x5] ss:$0 sm:$0xff] }
 0x187   : > { %v3635_v57 = vpack.c.bf16 %v3611_v43, %v3611_v43  ;;  %v1010_v44 = vadd.f32 %v963_v10, %v879_v56  ;;  %v1113_v63 = vrot.slane %v1053_v62, 2  ;;  %v1164_v58 = vadd.f32 %v1110_v12, %v1009_v46  ;;  %v5783_v56 = vld [vmem:[%s6356_s3 + $0x3] ss:$0 sm:$0xff]  ;;  %v1741_v10 = vld [vmem:[#allocation2 + $0x7c] sm:$0x1] }
 0x188   : > { %v3678_v59 = vshrl.u32 %v3634_v48, 16  ;;  %v1212_v60 = vunpack.c.l.bf16 %v1188_v13  ;;  %v3692_v32 = vshrl.u32 %v3636_v31, 16  ;;  %v3695_v2 = vshll.u32 %v3636_v31, 16  ;;  %v1548_v48 = vld [vmem:[#allocation2 + $0x74] sm:$0xff]   ;;  %v2510_v31 = vld [vmem:[#allocation2 + $0xa0] sm:$0x8] }
 0x189   : > { %v3683_v1 = vshrl.u32 %v3635_v57, 16  ;;  %v3686_v61 = vshll.u32 %v3635_v57, 16  ;;  %v1112_v8 = vsel %vm1084_vm1, %v1110_v12, %v1111_v41  ;;  %v1114_v55 = vsel %vm1084_vm1, %v1111_v41, %v1113_v63 }
 0x18a   : > { %v4503_v36 = vrot.slane %v3678_v59, 11  ;;  %v1213_v52 = vunpack.c.l.bf16 %v1189_v45  ;;  %v3694_v9 = vrot.slane %v3692_v32, 7  ;;  %v1165_v30 = vadd.f32 %v1112_v8, %v1010_v44  ;;  %v2511_v44 = vld [vmem:[#allocation2 + $0xa4] sm:$0xf] }
 0x18b   : > { %v3685_v3 = vrot.slane %v3683_v1, 7  ;;  %v1166_v35 = vadd.f32 %v1114_v55, %v1011_v49  ;;  %v1214_v51 = vunpack.c.h.bf16 %v1189_v45  ;;  %v1238_v17 = vmul.f32 %v5517_v14, %v1212_v60  ;;  %v5803_v1 = vld [vmem:[%s6356_s3 + $0x6] ss:$0 sm:$0xff] }
 0x18c   : > { %v1239_v54 = vmul.f32 %v5517_v14, %v1213_v52  ;;  %v1283_v21 = vmul.f32 %v5675_v27, %v1213_v52  ;;  %v3697_v7 = vor.u32 %v3695_v2, %v3694_v9  ;;  %v1390_v29 = vunpack.c.l.bf16 %v1382_v18 }
 0x18d   : > { %v3688_v23 = vor.u32 %v3686_v61, %v3685_v3  ;;  %v3690_v42 = vrot.slane %v3685_v3, 4  ;;  %v1240_v53 = vmul.f32 %v5783_v56, %v1214_v51  ;;  %v1262_v37 = vadd.f32 %v1238_v17, %v1164_v58 }
 0x18e   : > { %v1263_v50 = vadd.f32 %v1239_v54, %v1165_v30  ;;  %v1284_v38 = vmul.f32 %v5675_v27, %v1214_v51  ;;  %v1320_v22 = vrot.slane %v1283_v21, 1  ;;  %v1410_v34 = vmul.f32 %v5531_v33, %v1213_v52  ;;  %v2512_v52 = vld [vmem:[#allocation2 + $0xa8] sm:$0xf] }
 0x18f   : > { %v3689_v14 = vsel %vm5389_vm4, %v4503_v36, %v3688_v23  ;;  %v3698_v20 = vsel %vm5389_vm4, %v3690_v42, %v3697_v7  ;;  %v1264_v24 = vadd.f32 %v1240_v53, %v1166_v35  ;;  %v1411_v62 = vmul.f32 %v5795_v25, %v1214_v51  ;;  %v5815_v54 = vld [vmem:[%s6356_s3 + $0x8] ss:$0 sm:$0xff] }
 0x190   : > { %v3881_v4 = vunpack.c.l.b16 %v3689_v14  ;;  %v3882_v39 = vunpack.c.l.b16 %v3698_v20  ;;  %v1321_v40 = vrot.slane %v1284_v38, 1  ;;  %v1368_v43 = vadd.f32 %v1320_v22, %v1262_v37 }
 0x191   : > { %v1412_v12 = vmul.f32 %v5795_v25, %v1390_v29  ;;  %v1468_v13 = vrot.slane %v1410_v34, 2  ;;  %v1571_v57 = vunpack.c.l.bf16 %v1547_v16  ;;  %v1469_v45 = vrot.slane %v1411_v62, 2 }
 0x192   : > { %v3896_v46 = vpack.c.b16 %v3882_v39, %v3881_v4  ;;  %v1322_v33 = vsel %vm945_vm0, %v1320_v22, %v1321_v40  ;;  %v1370_v49 = vadd.f32 %v1321_v40, %v1264_v24  ;;  %v1572_v58 = vunpack.c.l.bf16 %v1548_v48  ;;  %v5823_v22 = vld [vmem:[%s6356_s3] ss:$0 sm:$0xff]  ;;  %v2710_v4 = vld [vmem:[#allocation2 + $0xac] sm:$0x1] }
 0x193   : > { %v1369_v41 = vadd.f32 %v1322_v33, %v1263_v50  ;;  %v1471_v59 = vrot.slane %v1412_v12, 2  ;;  %v1522_v63 = vadd.f32 %v1468_v13, %v1368_v43  ;;  %v1573_v60 = vunpack.c.h.bf16 %v1548_v48  ;;  %v5834_v48 = vld [vmem:[%s6356_s3 + $0x1] ss:$0 sm:$0xff] }
 0x194   : > { %4105 = vmatmul.bf16.gmra.mxu1 %v3896_v46  ;;  %v1597_v61 = vmul.f32 %v5803_v1, %v1571_v57  ;;  %v1749_v32 = vunpack.c.l.bf16 %v1741_v10  ;;  %v1470_v2 = vsel %vm1084_vm1, %v1468_v13, %v1469_v45  ;;  %v2534_v8 = vunpack.c.l.bf16 %v2510_v31 }
 0x195   : > { %v1472_v36 = vsel %vm1084_vm1, %v1469_v45, %v1471_v59  ;;  %v2535_v55 = vunpack.c.l.bf16 %v2511_v44  ;;  %v1523_v18 = vadd.f32 %v1470_v2, %v1369_v41  ;;  %v1598_v9 = vmul.f32 %v5803_v1, %v1572_v58  ;;  %v5841_v41 = vld [vmem:[%s6356_s3 + $0x2] ss:$0 sm:$0xff] }
 0x196   : > { %v1524_v3 = vadd.f32 %v1472_v36, %v1370_v49  ;;  %v1599_v30 = vmul.f32 %v5803_v1, %v1573_v60  ;;  %v1621_v35 = vadd.f32 %v1597_v61, %v1522_v63  ;;  %v1642_v51 = vmul.f32 %v5695_v19, %v1572_v58 }
 0x197   : > { %v1643_v17 = vmul.f32 %v5695_v19, %v1573_v60  ;;  %v1769_v21 = vmul.f32 %v5815_v54, %v1572_v58  ;;  %v1622_v23 = vadd.f32 %v1598_v9, %v1523_v18  ;;  %v1770_v7 = vmul.f32 %v5815_v54, %v1573_v60 }
 0x198   : > { %v1623_v42 = vadd.f32 %v1599_v30, %v1524_v3  ;;  %v1771_v29 = vmul.f32 %v5815_v54, %v1749_v32  ;;  %v1679_v53 = vrot.slane %v1642_v51, 1  ;;  %v2536_v38 = vunpack.c.l.bf16 %v2512_v52  ;;  %v2868_v52 = vld [vmem:[#allocation2 + $0xb0] sm:$0x8]  ;;  %v2869_v30 = vld [vmem:[#allocation2 + $0xb4] sm:$0xff]  }
 0x199   : > { %v1680_v37 = vrot.slane %v1643_v17, 1  ;;  %v1827_v50 = vrot.slane %v1769_v21, 2  ;;  %v1828_v14 = vrot.slane %v1770_v7, 2  ;;  %v2560_v34 = vmul.f32 %v5823_v22, %v2534_v8 }
 0x19a   : > { %v1830_v20 = vrot.slane %v1771_v29, 2  ;;  %v2561_v16 = vmul.f32 %v5823_v22, %v2535_v55  ;;  %v1727_v24 = vadd.f32 %v1679_v53, %v1621_v35  ;;  %v2562_v43 = vmul.f32 %v5823_v22, %v2536_v38 }
 0x19b   : > { %v1681_v39 = vsel %vm945_vm0, %v1679_v53, %v1680_v37  ;;  %v1729_v40 = vadd.f32 %v1680_v37, %v1623_v42  ;;  %v1829_v12 = vsel %vm1084_vm1, %v1827_v50, %v1828_v14  ;;  %v2608_v10 = vmul.f32 %v5834_v48, %v2535_v55 }
 0x19c   : > { %v1728_v62 = vadd.f32 %v1681_v39, %v1622_v23  ;;  %v1831_v13 = vsel %vm1084_vm1, %v1828_v14, %v1830_v20  ;;  %v1881_v46 = vadd.f32 %v1827_v50, %v1727_v24  ;;  %v2609_v49 = vmul.f32 %v5834_v48, %v2536_v38 }
 0x19d   : > { %v1883_v33 = vadd.f32 %v1831_v13, %v1729_v40  ;;  %v2718_v57 = vunpack.c.l.bf16 %v2710_v4  ;;  %v2642_v44 = vrot.slane %v2608_v10, 1  ;;  %v2732_v45 = vmul.f32 %v5841_v41, %v2535_v55 }
 0x19e   : > { %v1882_v31 = vadd.f32 %v1829_v12, %v1728_v62  ;;  %v2733_v59 = vmul.f32 %v5841_v41, %v2536_v38  ;;  %v1909_v63 = vadd.f32 %v5713_v0, %v1881_v46  ;;  %v2643_v60 = vrot.slane %v2609_v49, 1  ;;  %v3068_v62 = vld [vmem:[#allocation2 + $0xbc] sm:$0x1]  ;;  %v5862_v46 = vld [vmem:[%s6356_s3 + $0x4] ss:$0 sm:$0xff] }
 0x19f   : > { %v1911_v58 = vadd.f32 %v5713_v0, %v1883_v33  ;;  %v2734_v61 = vmul.f32 %v5841_v41, %v2718_v57  ;;  %v2690_v2 = vadd.f32 %v2642_v44, %v2560_v34  ;;  %v2784_v36 = vrot.slane %v2732_v45, 2 }
 0x1a0   : > { %v1910_v32 = vadd.f32 %v5713_v0, %v1882_v31  ;;  %v2785_v8 = vrot.slane %v2733_v59, 2  ;;  %v1933_v18 = vmax.f32 %v1909_v63, 0.0  ;;  %v2644_v9 = vsel %vm945_vm0, %v2642_v44, %v2643_v60 }
 0x1a1   : > { %v1935_v3 = vmax.f32 %v1911_v58, 0.0  ;;  %v2692_v55 = vadd.f32 %v2643_v60, %v2562_v43  ;;  %v2691_v51 = vadd.f32 %v2644_v9, %v2561_v16  ;;  %v2787_v21 = vrot.slane %v2734_v61, 2  ;;  %v5855_v16 = vld [vmem:[%s6356_s3 + $0x3] ss:$0 sm:$0xff] }
 0x1a2   : > { %v1934_v35 = vmax.f32 %v1910_v32, 0.0  ;;  %v2786_v17 = vsel %vm1084_vm1, %v2784_v36, %v2785_v8  ;;  %v1957_v23 = vpack.c.bf16 %v1933_v18, %v1933_v18  ;;  %v2844_v7 = vadd.f32 %v2784_v36, %v2690_v2  ;;  %v3227_v9 = vld [vmem:[#allocation2 + $0xc0] sm:$0x8] }
 0x1a3   : > { %v1959_v42 = vpack.c.bf16 %v1935_v3, %v1935_v3  ;;  %v2892_v29 = vunpack.c.l.bf16 %v2868_v52  ;;  %v2788_v37 = vsel %vm1084_vm1, %v2785_v8, %v2787_v21  ;;  %v2845_v50 = vadd.f32 %v2786_v17, %v2691_v51  ;;  %v5870_v8 = vld [vmem:[%s6356_s3 + $0x5] ss:$0 sm:$0xff]  ;;  %v3427_v21 = vld [vmem:[#allocation2 + $0xcc] sm:$0x1] }
 0x1a4   : > { %v1958_v53 = vpack.c.bf16 %v1934_v35, %v1934_v35  ;;  %v2893_v38 = vunpack.c.l.bf16 %v2869_v30  ;;  %v2080_v14 = vshrl.u32 %v1957_v23, 16  ;;  %v2846_v4 = vadd.f32 %v2788_v37, %v2692_v55  ;;  %v3228_v55 = vld [vmem:[#allocation2 + $0xc4] sm:$0xff]   ;;  %v4688_v23 = vld [vmem:[#allocation2 + $0xf4] sm:$0xff] }
 0x1a5   : > { %v2094_v20 = vshrl.u32 %v1959_v42, 16  ;;  %v2097_v34 = vshll.u32 %v1959_v42, 16  ;;  %v2894_v40 = vunpack.c.h.bf16 %v2869_v30  ;;  %v2918_v43 = vmul.f32 %v5855_v16, %v2892_v29  ;;  %4081 = vmatmul.bf16.gmra.mxu0 %v4688_v23 }
 0x1a6   : > { %v2085_v39 = vshrl.u32 %v1958_v53, 16  ;;  %v2088_v24 = vshll.u32 %v1958_v53, 16  ;;  %v4403_v12 = vrot.slane %v2080_v14, 11  ;;  %v2919_v10 = vmul.f32 %v5855_v16, %v2893_v38 }
 0x1a7   : > { %v2096_v13 = vrot.slane %v2094_v20, 7  ;;  %v2966_v33 = vmul.f32 %v5862_v46, %v2893_v38  ;;  %v2920_v57 = vmul.f32 %v5855_v16, %v2894_v40  ;;  %v2942_v31 = vadd.f32 %v2918_v43, %v2844_v7 }
 0x1a8   : > { %v2087_v49 = vrot.slane %v2085_v39, 7  ;;  %v2967_v44 = vmul.f32 %v5862_v46, %v2894_v40  ;;  %v2943_v59 = vadd.f32 %v2919_v10, %v2845_v50  ;;  %v3076_v58 = vunpack.c.l.bf16 %v3068_v62  ;;  %v5887_v10 = vld [vmem:[%s6356_s3 + $0x6] ss:$0 sm:$0xff] }
 0x1a9   : > { %v2099_v45 = vor.u32 %v2097_v34, %v2096_v13  ;;  %v3000_v63 = vrot.slane %v2966_v33, 1  ;;  %v2944_v32 = vadd.f32 %v2920_v57, %v2846_v4  ;;  %v3090_v52 = vmul.f32 %v5870_v8, %v2893_v38 }
 0x1aa   : > { %v2090_v60 = vor.u32 %v2088_v24, %v2087_v49  ;;  %v2092_v61 = vrot.slane %v2087_v49, 4  ;;  %v3001_v2 = vrot.slane %v2967_v44, 1  ;;  %v3091_v18 = vmul.f32 %v5870_v8, %v2894_v40 }
 0x1ab   : > { %v3048_v36 = vadd.f32 %v3000_v63, %v2942_v31  ;;  %v3092_v3 = vmul.f32 %v5870_v8, %v3076_v58  ;;  %v3142_v53 = vrot.slane %v3090_v52, 2  ;;  %v3251_v38 = vunpack.c.l.bf16 %v3227_v9  ;;  %v5894_v31 = vld [vmem:[%s6356_s3 + $0x7] ss:$0 sm:$0xff]  ;;  %v833_v58 = vld [vmem:[#allocation2 + $0x68] sm:$0xf] }
 0x1ac   : > { %v2091_v30 = vsel %vm5389_vm4, %v4403_v12, %v2090_v60  ;;  %v2100_v35 = vsel %vm5389_vm4, %v2092_v61, %v2099_v45  ;;  %v3002_v51 = vsel %vm945_vm0, %v3000_v63, %v3001_v2  ;;  %v3050_v17 = vadd.f32 %v3001_v2, %v2944_v32  ;;  %v832_v63 = vld [vmem:[#allocation2 + $0x64] sm:$0xf] }
 0x1ad   : > { %v2203_v42 = vunpack.c.l.b16 %v2091_v30  ;;  %v2204_v7 = vunpack.c.l.b16 %v2100_v35  ;;  %v3049_v29 = vadd.f32 %v3002_v51, %v2943_v59  ;;  %v3143_v37 = vrot.slane %v3091_v18, 2  ;;  %v831_v59 = vld [vmem:[#allocation2 + $0x60] sm:$0x8] }
 0x1ae   : > { %v3145_v50 = vrot.slane %v3092_v3, 2  ;;  %v3252_v14 = vunpack.c.l.bf16 %v3228_v55  ;;  %v3202_v34 = vadd.f32 %v3142_v53, %v3048_v36  ;;  %v3253_v4 = vunpack.c.h.bf16 %v3228_v55 }
 0x1af   : > { %v2214_v20 = vpack.c.b16 %v2204_v7, %v2203_v42  ;;  %v3435_v39 = vunpack.c.l.bf16 %v3427_v21  ;;  %v3144_v24 = vsel %vm1084_vm1, %v3142_v53, %v3143_v37  ;;  %v3277_v43 = vmul.f32 %v5623_v15, %v3251_v38  ;;  %v1024_v21 = vld [vmem:[#allocation2 + $0x6c] sm:$0x1]  ;;  %v5914_v38 = vld [vmem:[%s6356_s3 + $0x1] ss:$0 sm:$0xff] }
 0x1b0   : > { %v3146_v40 = vsel %vm1084_vm1, %v3143_v37, %v3145_v50  ;;  %v3278_v62 = vmul.f32 %v5623_v15, %v3252_v14  ;;  %v3203_v12 = vadd.f32 %v3144_v24, %v3049_v29  ;;  %v3279_v33 = vmul.f32 %v5887_v10, %v3253_v4 }
 0x1b1   : > { %2439 = vmatmul.bf16.gmra.mxu3 %v2214_v20  ;;  %v3204_v13 = vadd.f32 %v3146_v40, %v3050_v17  ;;  %v3325_v49 = vmul.f32 %v5629_v6, %v3252_v14  ;;  %v3301_v57 = vadd.f32 %v3277_v43, %v3202_v34  ;;  %v3326_v15 = vmul.f32 %v5894_v31, %v3253_v4  ;;  %v5902_v6 = vld [vmem:[%s6356_s3 + $0x8] ss:$0 sm:$0xff] }
 0x1b2   : > { %v3449_v44 = vmul.f32 %v5637_v47, %v3252_v14  ;;  %v3450_v45 = vmul.f32 %v5637_v47, %v3253_v4  ;;  %v3302_v60 = vadd.f32 %v3278_v62, %v3203_v12  ;;  %v3451_v2 = vmul.f32 %v5902_v6, %v3435_v39  ;;  %v5925_v12 = vld [vmem:[%s6357_s4] ss:$0 sm:$0xff] }
 0x1b3   : > { %v3303_v61 = vadd.f32 %v3279_v33, %v3204_v13  ;;  %v3359_v32 = vrot.slane %v3325_v49, 1  ;;  %v3360_v36 = vrot.slane %v3326_v15, 1  ;;  %v855_v55 = vunpack.c.l.bf16 %v831_v59  ;;  %v1191_v59 = vld [vmem:[#allocation2 + $0x70] sm:$0x8] }
 0x1b4   : > { %v3501_v52 = vrot.slane %v3449_v44, 2  ;;  %v3502_v18 = vrot.slane %v3450_v45, 2  ;;  %v3504_v9 = vrot.slane %v3451_v2, 2  ;;  %v856_v47 = vunpack.c.l.bf16 %v832_v63 }
 0x1b5   : > { %v3407_v3 = vadd.f32 %v3359_v32, %v3301_v57  ;;  %v3361_v30 = vsel %vm945_vm0, %v3359_v32, %v3360_v36  ;;  %v3409_v35 = vadd.f32 %v3360_v36, %v3303_v61  ;;  %v857_v17 = vunpack.c.l.bf16 %v833_v58 }
 0x1b6   : > { %v3503_v51 = vsel %vm1084_vm1, %v3501_v52, %v3502_v18  ;;  %v3408_v23 = vadd.f32 %v3361_v30, %v3302_v60  ;;  %v3505_v42 = vsel %vm1084_vm1, %v3502_v18, %v3504_v9  ;;  %v881_v29 = vmul.f32 %v5757_v28, %v855_v55  ;;  %v1192_v55 = vld [vmem:[#allocation2 + $0x74] sm:$0xff]   ;;  %v1383_v30 = vld [vmem:[#allocation2 + $0x7c] sm:$0x1] }
 0x1b7   : > { %v3561_v7 = vadd.f32 %v3501_v52, %v3407_v3  ;;  %v3563_v53 = vadd.f32 %v3505_v42, %v3409_v35  ;;  %v882_v37 = vmul.f32 %v5757_v28, %v856_v47  ;;  %v883_v50 = vmul.f32 %v5757_v28, %v857_v17  ;;  %v1551_v42 = vld [vmem:[#allocation2 + $0x84] sm:$0xff]  }
 0x1b8   : > { %v925_v14 = vmul.f32 %v5914_v38, %v856_v47  ;;  %v3562_v20 = vadd.f32 %v3503_v51, %v3408_v23  ;;  %v926_v4 = vmul.f32 %v5914_v38, %v857_v17  ;;  %v1032_v39 = vunpack.c.l.bf16 %v1024_v21  ;;  %v1550_v23 = vld [vmem:[#allocation2 + $0x80] sm:$0x8] }
 0x1b9   : > { %v3589_v34 = vadd.f32 %v5653_v5, %v3561_v7  ;;  %v3591_v24 = vadd.f32 %v5653_v5, %v3563_v53  ;;  %v1054_v43 = vmul.f32 %v5771_v11, %v856_v47  ;;  %v1055_v62 = vmul.f32 %v5771_v11, %v857_v17 }
 0x1ba   : > { %v964_v40 = vrot.slane %v925_v14, 1  ;;  %v3590_v13 = vadd.f32 %v5925_v12, %v3562_v20  ;;  %v965_v49 = vrot.slane %v926_v4, 1  ;;  %v1056_v57 = vmul.f32 %v5771_v11, %v1032_v39 }
 0x1bb   : > { %v3613_v33 = vmax.f32 %v3589_v34, 0.0  ;;  %v3615_v15 = vmax.f32 %v3591_v24, 0.0  ;;  %v1115_v45 = vrot.slane %v1054_v43, 2  ;;  %v1116_v5 = vrot.slane %v1055_v62, 2 }
 0x1bc   : > { %v1012_v44 = vadd.f32 %v964_v40, %v881_v29  ;;  %v3614_v63 = vmax.f32 %v3590_v13, 0.0  ;;  %v966_v60 = vsel %vm945_vm0, %v964_v40, %v965_v49  ;;  %v1014_v61 = vadd.f32 %v965_v49, %v883_v50 }
 0x1bd   : > { %v3637_v58 = vpack.c.bf16 %v3613_v33, %v3613_v33  ;;  %v3639_v32 = vpack.c.bf16 %v3615_v15, %v3615_v15  ;;  %v1013_v2 = vadd.f32 %v966_v60, %v882_v37  ;;  %v1117_v36 = vsel %vm1084_vm1, %v1115_v45, %v1116_v5 }
 0x1be   : > { %v1118_v52 = vrot.slane %v1056_v57, 2  ;;  %v3638_v18 = vpack.c.bf16 %v3614_v63, %v3614_v63  ;;  %v1167_v9 = vadd.f32 %v1115_v45, %v1012_v44  ;;  %v1215_v47 = vunpack.c.l.bf16 %v1191_v59 }
 0x1bf   : > { %v3700_v3 = vshrl.u32 %v3637_v58, 16  ;;  %v3714_v35 = vshrl.u32 %v3639_v32, 16  ;;  %v3717_v51 = vshll.u32 %v3639_v32, 16  ;;  %v1168_v21 = vadd.f32 %v1117_v36, %v1013_v2 }
 0x1c0   : > { %v1119_v17 = vsel %vm1084_vm1, %v1116_v5, %v1118_v52  ;;  %v3705_v29 = vshrl.u32 %v3638_v18, 16  ;;  %v3708_v53 = vshll.u32 %v3638_v18, 16  ;;  %v1216_v14 = vunpack.c.l.bf16 %v1192_v55 }
 0x1c1   : > { %v4504_v7 = vrot.slane %v3700_v3, 11  ;;  %v1169_v37 = vadd.f32 %v1119_v17, %v1014_v61  ;;  %v3716_v50 = vrot.slane %v3714_v35, 7  ;;  %v1217_v20 = vunpack.c.h.bf16 %v1192_v55  ;;  %v1742_v17 = vld [vmem:[#allocation2 + $0x8c] sm:$0x1] }
 0x1c2   : > { %v1241_v34 = vmul.f32 %v5783_v56, %v1215_v47  ;;  %v3707_v4 = vrot.slane %v3705_v29, 7  ;;  %v1391_v39 = vunpack.c.l.bf16 %v1383_v30  ;;  %v1574_v24 = vunpack.c.l.bf16 %v1550_v23 }
 0x1c3   : > { %v1575_v40 = vunpack.c.l.bf16 %v1551_v42  ;;  %v3719_v43 = vor.u32 %v3717_v51, %v3716_v50  ;;  %v1242_v62 = vmul.f32 %v5783_v56, %v1216_v14  ;;  %v1243_v13 = vmul.f32 %v5783_v56, %v1217_v20 }
 0x1c4   : > { %v1265_v33 = vadd.f32 %v1241_v34, %v1167_v9  ;;  %v3710_v49 = vor.u32 %v3708_v53, %v3707_v4  ;;  %v3712_v57 = vrot.slane %v3707_v4, 4  ;;  %v1285_v15 = vmul.f32 %v5675_v27, %v1216_v14 }
 0x1c5   : > { %v1286_v44 = vmul.f32 %v5675_v27, %v1217_v20  ;;  %v1266_v45 = vadd.f32 %v1242_v62, %v1168_v21  ;;  %v1267_v5 = vadd.f32 %v1243_v13, %v1169_v37  ;;  %v1413_v59 = vmul.f32 %v5795_v25, %v1216_v14 }
 0x1c6   : > { %v1414_v63 = vmul.f32 %v5795_v25, %v1217_v20  ;;  %v3711_v58 = vsel %vm5389_vm4, %v4504_v7, %v3710_v49  ;;  %v3720_v60 = vsel %vm5389_vm4, %v3712_v57, %v3719_v43  ;;  %v1323_v61 = vrot.slane %v1285_v15, 1  ;;  %v2515_v49 = vld [vmem:[#allocation2 + $0xb8] sm:$0xf] }
 0x1c7   : > { %v1324_v32 = vrot.slane %v1286_v44, 1  ;;  %v3883_v2 = vunpack.c.l.b16 %v3711_v58  ;;  %v3884_v36 = vunpack.c.l.b16 %v3720_v60  ;;  %v1415_v52 = vmul.f32 %v5795_v25, %v1391_v39  ;;  %v2513_v39 = vld [vmem:[#allocation2 + $0xb0] sm:$0x8] }
 0x1c8   : > { %v1473_v18 = vrot.slane %v1413_v59, 2  ;;  %v1371_v3 = vadd.f32 %v1323_v61, %v1265_v33  ;;  %v1474_v55 = vrot.slane %v1414_v63, 2  ;;  %v1576_v51 = vunpack.c.h.bf16 %v1551_v42  ;;  %v2514_v33 = vld [vmem:[#allocation2 + $0xb4] sm:$0xf] }
 0x1c9   : > { %v1325_v27 = vsel %vm945_vm0, %v1323_v61, %v1324_v32  ;;  %v1373_v9 = vadd.f32 %v1324_v32, %v1267_v5  ;;  %v3897_v47 = vpack.c.b16 %v3884_v36, %v3883_v2  ;;  %v1476_v35 = vrot.slane %v1415_v52, 2  ;;  %v2711_v52 = vld [vmem:[#allocation2 + $0xbc] sm:$0x1] }
 0x1ca   : > { %v1372_v30 = vadd.f32 %v1325_v27, %v1266_v45  ;;  %v1475_v21 = vsel %vm1084_vm1, %v1473_v18, %v1474_v55  ;;  %v1525_v23 = vadd.f32 %v1473_v18, %v1371_v3  ;;  %v1600_v7 = vmul.f32 %v5803_v1, %v1574_v24 }
 0x1cb   : > { %v1601_v29 = vmul.f32 %v5803_v1, %v1575_v40  ;;  %4110 = vmatmul.bf16.gmra.mxu1 %v3897_v47  ;;  %v1477_v53 = vsel %vm1084_vm1, %v1474_v55, %v1476_v35  ;;  %v1602_v50 = vmul.f32 %v5803_v1, %v1576_v51  ;;  %v1644_v14 = vmul.f32 %v5695_v19, %v1575_v40 }
 0x1cc   : > { %v1526_v37 = vadd.f32 %v1475_v21, %v1372_v30  ;;  %v1527_v20 = vadd.f32 %v1477_v53, %v1373_v9  ;;  %v1624_v34 = vadd.f32 %v1600_v7, %v1525_v23  ;;  %v1645_v42 = vmul.f32 %v5695_v19, %v1576_v51 }
 0x1cd   : > { %v1750_v4 = vunpack.c.l.bf16 %v1742_v17  ;;  %v1682_v62 = vrot.slane %v1644_v14, 1  ;;  %v1772_v24 = vmul.f32 %v5815_v54, %v1575_v40  ;;  %v1773_v13 = vmul.f32 %v5815_v54, %v1576_v51 }
 0x1ce   : > { %v1625_v43 = vadd.f32 %v1601_v29, %v1526_v37  ;;  %v1626_v57 = vadd.f32 %v1602_v50, %v1527_v20  ;;  %v1683_v15 = vrot.slane %v1645_v42, 1  ;;  %v2537_v63 = vunpack.c.l.bf16 %v2513_v39 }
 0x1cf   : > { %v1774_v44 = vmul.f32 %v5815_v54, %v1750_v4  ;;  %v1730_v45 = vadd.f32 %v1682_v62, %v1624_v34  ;;  %v1832_v5 = vrot.slane %v1772_v24, 2  ;;  %v1833_v59 = vrot.slane %v1773_v13, 2  ;;  %v2872_v24 = vld [vmem:[#allocation2 + $0xc4] sm:$0xff]  }
 0x1d0   : > { %v1684_v19 = vsel %vm945_vm0, %v1682_v62, %v1683_v15  ;;  %v1732_v58 = vadd.f32 %v1683_v15, %v1626_v57  ;;  %v2538_v61 = vunpack.c.l.bf16 %v2514_v33  ;;  %v2539_v36 = vunpack.c.l.bf16 %v2515_v49  ;;  %v2871_v62 = vld [vmem:[#allocation2 + $0xc0] sm:$0x8] }
 0x1d1   : > { %v1835_v60 = vrot.slane %v1774_v44, 2  ;;  %v1731_v32 = vadd.f32 %v1684_v19, %v1625_v43  ;;  %v1834_v40 = vsel %vm1084_vm1, %v1832_v5, %v1833_v59  ;;  %v1884_v2 = vadd.f32 %v1832_v5, %v1730_v45 }
 0x1d2   : > { %v2563_v27 = vmul.f32 %v5823_v22, %v2537_v63  ;;  %v2564_v3 = vmul.f32 %v5823_v22, %v2538_v61  ;;  %v2610_v9 = vmul.f32 %v5834_v48, %v2538_v61  ;;  %v2565_v35 = vmul.f32 %v5823_v22, %v2539_v36 }
 0x1d3   : > { %v1836_v18 = vsel %vm1084_vm1, %v1833_v59, %v1835_v60  ;;  %v1885_v55 = vadd.f32 %v1834_v40, %v1731_v32  ;;  %v1912_v30 = vadd.f32 %v5713_v0, %v1884_v2  ;;  %v2611_v51 = vmul.f32 %v5834_v48, %v2539_v36  ;;  %v3069_v40 = vld [vmem:[#allocation2 + $0xcc] sm:$0x1] }
 0x1d4   : > { %v1886_v47 = vadd.f32 %v1836_v18, %v1732_v58  ;;  %v2645_v17 = vrot.slane %v2610_v9, 1  ;;  %v2719_v21 = vunpack.c.l.bf16 %v2711_v52  ;;  %v2735_v23 = vmul.f32 %v5841_v41, %v2538_v61 }
 0x1d5   : > { %v1913_v7 = vadd.f32 %v5713_v0, %v1885_v55  ;;  %v1936_v53 = vmax.f32 %v1912_v30, 0.0  ;;  %v2736_v37 = vmul.f32 %v5841_v41, %v2539_v36  ;;  %v2646_v50 = vrot.slane %v2611_v51, 1 }
 0x1d6   : > { %v1914_v29 = vadd.f32 %v5713_v0, %v1886_v47  ;;  %v2693_v14 = vadd.f32 %v2645_v17, %v2563_v27  ;;  %v2737_v20 = vmul.f32 %v5841_v41, %v2719_v21  ;;  %v2789_v34 = vrot.slane %v2735_v23, 2 }
 0x1d7   : > { %v1937_v42 = vmax.f32 %v1913_v7, 0.0  ;;  %v1960_v39 = vpack.c.bf16 %v1936_v53, %v1936_v53  ;;  %v2790_v43 = vrot.slane %v2736_v37, 2  ;;  %v2647_v13 = vsel %vm945_vm0, %v2645_v17, %v2646_v50 }
 0x1d8   : > { %v1938_v4 = vmax.f32 %v1914_v29, 0.0  ;;  %v2695_v33 = vadd.f32 %v2646_v50, %v2565_v35  ;;  %v2792_v49 = vrot.slane %v2737_v20, 2  ;;  %v2847_v57 = vadd.f32 %v2789_v34, %v2693_v14 }
 0x1d9   : > { %v1961_v0 = vpack.c.bf16 %v1937_v42, %v1937_v42  ;;  %v2102_v44 = vshrl.u32 %v1960_v39, 16  ;;  %v2694_v45 = vadd.f32 %v2647_v13, %v2564_v3  ;;  %v2791_v5 = vsel %vm1084_vm1, %v2789_v34, %v2790_v43  ;;  %v3231_v39 = vld [vmem:[#allocation2 + $0xd4] sm:$0xff]  }
 0x1da   : > { %v1962_v15 = vpack.c.bf16 %v1938_v4, %v1938_v4  ;;  %v2793_v59 = vsel %vm1084_vm1, %v2790_v43, %v2792_v49  ;;  %v2895_v63 = vunpack.c.l.bf16 %v2871_v62  ;;  %v2896_v19 = vunpack.c.l.bf16 %v2872_v24  ;;  %v3230_v4 = vld [vmem:[#allocation2 + $0xd0] sm:$0x8]  ;;  %v4689_v43 = vld [vmem:[#allocation2 + $0x104] sm:$0xff]  ;;  %v3428_v49 = vld [vmem:[#allocation2 + $0xdc] sm:$0x1] }
 0x1db   : > { %v4404_v58 = vrot.slane %v2102_v44, 11  ;;  %v2107_v60 = vshrl.u32 %v1961_v0, 16  ;;  %v2110_v61 = vshll.u32 %v1961_v0, 16  ;;  %v2848_v36 = vadd.f32 %v2791_v5, %v2694_v45  ;;  %4086 = vmatmul.bf16.gmra.mxu0 %v4689_v43 }
 0x1dc   : > { %v2116_v32 = vshrl.u32 %v1962_v15, 16  ;;  %v2119_v2 = vshll.u32 %v1962_v15, 16  ;;  %v2849_v52 = vadd.f32 %v2793_v59, %v2695_v33  ;;  %v2897_v18 = vunpack.c.h.bf16 %v2872_v24 }
 0x1dd   : > { %v2109_v27 = vrot.slane %v2107_v60, 7  ;;  %v2921_v55 = vmul.f32 %v5855_v16, %v2895_v63  ;;  %v2922_v3 = vmul.f32 %v5855_v16, %v2896_v19  ;;  %v2968_v30 = vmul.f32 %v5862_v46, %v2896_v19 }
 0x1de   : > { %v2118_v9 = vrot.slane %v2116_v32, 7  ;;  %v2923_v47 = vmul.f32 %v5855_v16, %v2897_v18  ;;  %v2969_v35 = vmul.f32 %v5862_v46, %v2897_v18  ;;  %v3077_v51 = vunpack.c.l.bf16 %v3069_v40 }
 0x1df   : > { %v2112_v17 = vor.u32 %v2110_v61, %v2109_v27  ;;  %v2114_v21 = vrot.slane %v2109_v27, 4  ;;  %v2945_v7 = vadd.f32 %v2921_v55, %v2847_v57  ;;  %v2946_v29 = vadd.f32 %v2922_v3, %v2848_v36 }
 0x1e0   : > { %v2121_v23 = vor.u32 %v2119_v2, %v2118_v9  ;;  %v2947_v53 = vadd.f32 %v2923_v47, %v2849_v52  ;;  %v3003_v37 = vrot.slane %v2968_v30, 1  ;;  %v3004_v50 = vrot.slane %v2969_v35, 1  ;;  %v834_v35 = vld [vmem:[#allocation2 + $0x70] sm:$0x8] }
 0x1e1   : > { %v2113_v14 = vsel %vm5389_vm4, %v4404_v58, %v2112_v17  ;;  %v3093_v34 = vmul.f32 %v5870_v8, %v2896_v19  ;;  %v3094_v42 = vmul.f32 %v5870_v8, %v2897_v18  ;;  %v3095_v15 = vmul.f32 %v5870_v8, %v3077_v51 }
 0x1e2   : > { %v2122_v20 = vsel %vm5389_vm4, %v2114_v21, %v2121_v23  ;;  %v2205_v62 = vunpack.c.l.b16 %v2113_v14  ;;  %v3005_v13 = vsel %vm945_vm0, %v3003_v37, %v3004_v50  ;;  %v3051_v33 = vadd.f32 %v3003_v37, %v2945_v7  ;;  %v835_v7 = vld [vmem:[#allocation2 + $0x74] sm:$0xf] }
 0x1e3   : > { %v2206_v24 = vunpack.c.l.b16 %v2122_v20  ;;  %v3052_v57 = vadd.f32 %v3005_v13, %v2946_v29  ;;  %v3053_v0 = vadd.f32 %v3004_v50, %v2947_v53  ;;  %v3147_v44 = vrot.slane %v3093_v34, 2  ;;  %v836_v29 = vld [vmem:[#allocation2 + $0x78] sm:$0xf] }
 0x1e4   : > { %v3148_v5 = vrot.slane %v3094_v42, 2  ;;  %v3254_v59 = vunpack.c.l.bf16 %v3230_v4  ;;  %v3255_v63 = vunpack.c.l.bf16 %v3231_v39  ;;  %v3150_v19 = vrot.slane %v3095_v15, 2 }
 0x1e5   : > { %v2215_v45 = vpack.c.b16 %v2206_v24, %v2205_v62  ;;  %v3205_v58 = vadd.f32 %v3147_v44, %v3051_v33  ;;  %v3256_v60 = vunpack.c.h.bf16 %v3231_v39  ;;  %v3436_v61 = vunpack.c.l.bf16 %v3428_v49  ;;  %v1025_v24 = vld [vmem:[#allocation2 + $0x7c] sm:$0x1] }
 0x1e6   : > { %v3149_v32 = vsel %vm1084_vm1, %v3147_v44, %v3148_v5  ;;  %v3280_v40 = vmul.f32 %v5887_v10, %v3254_v59  ;;  %v3281_v2 = vmul.f32 %v5887_v10, %v3255_v63  ;;  %v3327_v36 = vmul.f32 %v5894_v31, %v3255_v63 }
 0x1e7   : > { %2444 = vmatmul.bf16.gmra.mxu3 %v2215_v45  ;;  %v3151_v52 = vsel %vm1084_vm1, %v3148_v5, %v3150_v19  ;;  %v3206_v18 = vadd.f32 %v3149_v32, %v3052_v57  ;;  %v3282_v27 = vmul.f32 %v5887_v10, %v3256_v60  ;;  %v3328_v9 = vmul.f32 %v5894_v31, %v3256_v60 }
 0x1e8   : > { %v3207_v55 = vadd.f32 %v3151_v52, %v3053_v0  ;;  %v3304_v3 = vadd.f32 %v3280_v40, %v3205_v58  ;;  %v3362_v47 = vrot.slane %v3327_v36, 1  ;;  %v3452_v30 = vmul.f32 %v5902_v6, %v3255_v63 }
 0x1e9   : > { %v3305_v51 = vadd.f32 %v3281_v2, %v3206_v18  ;;  %v3363_v17 = vrot.slane %v3328_v9, 1  ;;  %v3453_v21 = vmul.f32 %v5902_v6, %v3256_v60  ;;  %v3454_v23 = vmul.f32 %v5902_v6, %v3436_v61 }
 0x1ea   : > { %v3306_v53 = vadd.f32 %v3282_v27, %v3207_v55  ;;  %v3410_v37 = vadd.f32 %v3362_v47, %v3304_v3  ;;  %v3506_v50 = vrot.slane %v3452_v30, 2  ;;  %v858_v42 = vunpack.c.l.bf16 %v834_v35  ;;  %v1194_v55 = vld [vmem:[#allocation2 + $0x80] sm:$0x8] }
 0x1eb   : > { %v3364_v14 = vsel %vm945_vm0, %v3362_v47, %v3363_v17  ;;  %v3507_v20 = vrot.slane %v3453_v21, 2  ;;  %v3509_v34 = vrot.slane %v3454_v23, 2  ;;  %v859_v62 = vunpack.c.l.bf16 %v835_v7  ;;  %v1195_v23 = vld [vmem:[#allocation2 + $0x84] sm:$0xff]  }
 0x1ec   : > { %v3411_v4 = vadd.f32 %v3364_v14, %v3305_v51  ;;  %v3412_v39 = vadd.f32 %v3363_v17, %v3306_v53  ;;  %v3564_v43 = vadd.f32 %v3506_v50, %v3410_v37  ;;  %v860_v49 = vunpack.c.l.bf16 %v836_v29 }
 0x1ed   : > { %v3508_v13 = vsel %vm1084_vm1, %v3506_v50, %v3507_v20  ;;  %v3510_v33 = vsel %vm1084_vm1, %v3507_v20, %v3509_v34  ;;  %v884_v57 = vmul.f32 %v5757_v28, %v858_v42  ;;  %v885_v45 = vmul.f32 %v5757_v28, %v859_v62  ;;  %v1384_v34 = vld [vmem:[#allocation2 + $0x8c] sm:$0x1] }
 0x1ee   : > { %v3565_v0 = vadd.f32 %v3508_v13, %v3411_v4  ;;  %v3566_v15 = vadd.f32 %v3510_v33, %v3412_v39  ;;  %v3592_v44 = vadd.f32 %v5925_v12, %v3564_v43  ;;  %v886_v5 = vmul.f32 %v5757_v28, %v860_v49 }
 0x1ef   : > { %v927_v59 = vmul.f32 %v5914_v38, %v859_v62  ;;  %v928_v63 = vmul.f32 %v5914_v38, %v860_v49  ;;  %v1033_v19 = vunpack.c.l.bf16 %v1025_v24  ;;  %v1057_v32 = vmul.f32 %v5771_v11, %v859_v62 }
 0x1f0   : > { %v3593_v58 = vadd.f32 %v5925_v12, %v3565_v0  ;;  %v3594_v60 = vadd.f32 %v5925_v12, %v3566_v15  ;;  %v3616_v61 = vmax.f32 %v3592_v44, 0.0  ;;  %v1058_v36 = vmul.f32 %v5771_v11, %v860_v49  ;;  %v4879_v0 = vld [vmem:[%s6356_s3 + $0x4] ss:$0 sm:$0xff] }
 0x1f1   : > { %v967_v40 = vrot.slane %v927_v59, 1  ;;  %v968_v2 = vrot.slane %v928_v63, 1  ;;  %v1059_v52 = vmul.f32 %v5771_v11, %v1033_v19  ;;  %v1120_v9 = vrot.slane %v1057_v32, 2  ;;  %v1553_v32 = vld [vmem:[#allocation2 + $0x90] sm:$0x8] }
 0x1f2   : > { %v3617_v18 = vmax.f32 %v3593_v58, 0.0  ;;  %v3618_v28 = vmax.f32 %v3594_v60, 0.0  ;;  %v3640_v27 = vpack.c.bf16 %v3616_v61, %v3616_v61  ;;  %v1121_v30 = vrot.slane %v1058_v36, 2 }
 0x1f3   : > { %v969_v38 = vsel %vm945_vm0, %v967_v40, %v968_v2  ;;  %v1015_v3 = vadd.f32 %v967_v40, %v884_v57  ;;  %v1017_v47 = vadd.f32 %v968_v2, %v886_v5  ;;  %v1123_v29 = vrot.slane %v1059_v52, 2 }
 0x1f4   : > { %v3641_v35 = vpack.c.bf16 %v3617_v18, %v3617_v18  ;;  %v3642_v51 = vpack.c.bf16 %v3618_v28, %v3618_v28  ;;  %v3722_v17 = vshrl.u32 %v3640_v27, 16  ;;  %v1016_v21 = vadd.f32 %v969_v38, %v885_v45  ;;  %v1554_v18 = vld [vmem:[#allocation2 + $0x94] sm:$0xff]  }
 0x1f5   : > { %v1122_v7 = vsel %vm1084_vm1, %v1120_v9, %v1121_v30  ;;  %v1170_v53 = vadd.f32 %v1120_v9, %v1015_v3  ;;  %v1218_v11 = vunpack.c.l.bf16 %v1194_v55  ;;  %v1124_v4 = vsel %vm1084_vm1, %v1121_v30, %v1123_v29 }
 0x1f6   : > { %v4505_v37 = vrot.slane %v3722_v17, 11  ;;  %v3727_v50 = vshrl.u32 %v3641_v35, 16  ;;  %v3730_v14 = vshll.u32 %v3641_v35, 16  ;;  %v3736_v20 = vshrl.u32 %v3642_v51, 16 }
 0x1f7   : > { %v3739_v42 = vshll.u32 %v3642_v51, 16  ;;  %v1171_v39 = vadd.f32 %v1122_v7, %v1016_v21  ;;  %v1219_v43 = vunpack.c.l.bf16 %v1195_v23  ;;  %v1172_v13 = vadd.f32 %v1124_v4, %v1017_v47  ;;  %v1743_v21 = vld [vmem:[#allocation2 + $0x9c] sm:$0x1] }
 0x1f8   : > { %v3729_v62 = vrot.slane %v3727_v50, 7  ;;  %v3738_v24 = vrot.slane %v3736_v20, 7  ;;  %v1220_v33 = vunpack.c.h.bf16 %v1195_v23  ;;  %v1244_v49 = vmul.f32 %v5783_v56, %v1218_v11 }
 0x1f9   : > { %v1245_v57 = vmul.f32 %v5783_v56, %v1219_v43  ;;  %v1287_v15 = vmul.f32 %v4879_v0, %v1219_v43  ;;  %v1392_v44 = vunpack.c.l.bf16 %v1384_v34  ;;  %v1416_v52 = vmul.f32 %v5795_v25, %v1219_v43 }
 0x1fa   : > { %v3732_v45 = vor.u32 %v3730_v14, %v3729_v62  ;;  %v3734_v5 = vrot.slane %v3729_v62, 4  ;;  %v3741_v59 = vor.u32 %v3739_v42, %v3738_v24  ;;  %v1246_v63 = vmul.f32 %v5783_v56, %v1220_v33 }
 0x1fb   : > { %v1268_v19 = vadd.f32 %v1244_v49, %v1170_v53  ;;  %v1269_v58 = vadd.f32 %v1245_v57, %v1171_v39  ;;  %v1288_v60 = vmul.f32 %v4879_v0, %v1220_v33  ;;  %v1326_v61 = vrot.slane %v1287_v15, 1  ;;  %v2518_v39 = vld [vmem:[#allocation2 + $0xc8] sm:$0xf] }
 0x1fc   : > { %v3733_v40 = vsel %vm5389_vm4, %v4505_v37, %v3732_v45  ;;  %v3742_v2 = vsel %vm5389_vm4, %v3734_v5, %v3741_v59  ;;  %v1270_v36 = vadd.f32 %v1246_v63, %v1172_v13  ;;  %v1417_v56 = vmul.f32 %v5795_v25, %v1220_v33  ;;  %v2516_v33 = vld [vmem:[#allocation2 + $0xc0] sm:$0x8]  ;;  %v2712_v45 = vld [vmem:[#allocation2 + $0xcc] sm:$0x1] }
 0x1fd   : > { %v3885_v28 = vunpack.c.l.b16 %v3733_v40  ;;  %v3886_v27 = vunpack.c.l.b16 %v3742_v2  ;;  %v1327_v9 = vrot.slane %v1288_v60, 1  ;;  %v1374_v55 = vadd.f32 %v1326_v61, %v1268_v19 }
 0x1fe   : > { %v1418_v38 = vmul.f32 %v5795_v25, %v1392_v44  ;;  %v1478_v3 = vrot.slane %v1416_v52, 2  ;;  %v1577_v47 = vunpack.c.l.bf16 %v1553_v32  ;;  %v1578_v17 = vunpack.c.l.bf16 %v1554_v18  ;;  %v4880_v25 = vld [vmem:[%s6356_s3 + $0x7] ss:$0 sm:$0xff] }
 0x1ff   : > { %v3898_v30 = vpack.c.b16 %v3886_v27, %v3885_v28  ;;  %v1328_v35 = vsel %vm945_vm0, %v1326_v61, %v1327_v9  ;;  %v1376_v51 = vadd.f32 %v1327_v9, %v1270_v36  ;;  %v1479_v7 = vrot.slane %v1417_v56, 2  ;;  %v2517_v44 = vld [vmem:[#allocation2 + $0xc4] sm:$0xf] }
 0x200   : > { %v1375_v23 = vadd.f32 %v1328_v35, %v1269_v58  ;;  %v1481_v29 = vrot.slane %v1418_v38, 2  ;;  %v1528_v53 = vadd.f32 %v1478_v3, %v1374_v55  ;;  %v1579_v11 = vunpack.c.h.bf16 %v1554_v18  ;;  %v4881_v35 = vld [vmem:[%s6357_s4] ss:$0 sm:$0xff] }
 0x201   : > { %4115 = vmatmul.bf16.gmra.mxu1 %v3898_v30  ;;  %v1603_v37 = vmul.f32 %v5803_v1, %v1577_v47  ;;  %v1604_v50 = vmul.f32 %v5803_v1, %v1578_v17  ;;  %v1646_v14 = vmul.f32 %v4880_v25, %v1578_v17  ;;  %v1480_v20 = vsel %vm1084_vm1, %v1478_v3, %v1479_v7 }
 0x202   : > { %v1482_v34 = vsel %vm1084_vm1, %v1479_v7, %v1481_v29  ;;  %v1751_v42 = vunpack.c.l.bf16 %v1743_v21  ;;  %v1775_v4 = vmul.f32 %v5815_v54, %v1578_v17  ;;  %v1529_v43 = vadd.f32 %v1480_v20, %v1375_v23 }
 0x203   : > { %v1530_v62 = vadd.f32 %v1482_v34, %v1376_v51  ;;  %v1605_v24 = vmul.f32 %v5803_v1, %v1579_v11  ;;  %v1627_v13 = vadd.f32 %v1603_v37, %v1528_v53  ;;  %v1647_v49 = vmul.f32 %v4880_v25, %v1579_v11 }
 0x204   : > { %v1685_v57 = vrot.slane %v1646_v14, 1  ;;  %v1776_v0 = vmul.f32 %v5815_v54, %v1579_v11  ;;  %v1777_v15 = vmul.f32 %v5815_v54, %v1751_v42  ;;  %v1628_v5 = vadd.f32 %v1604_v50, %v1529_v43  ;;  %v2875_v42 = vld [vmem:[#allocation2 + $0xd4] sm:$0xff]  }
 0x205   : > { %v1629_v59 = vadd.f32 %v1605_v24, %v1530_v62  ;;  %v1837_v63 = vrot.slane %v1775_v4, 2  ;;  %v1686_v19 = vrot.slane %v1647_v49, 1  ;;  %v2540_v32 = vunpack.c.l.bf16 %v2516_v33 }
 0x206   : > { %v1733_v58 = vadd.f32 %v1685_v57, %v1627_v13  ;;  %v1838_v60 = vrot.slane %v1776_v0, 2  ;;  %v1840_v61 = vrot.slane %v1777_v15, 2  ;;  %v2541_v40 = vunpack.c.l.bf16 %v2517_v44 }
 0x207   : > { %v2542_v1 = vunpack.c.l.bf16 %v2518_v39  ;;  %v2720_v2 = vunpack.c.l.bf16 %v2712_v45  ;;  %v1687_v36 = vsel %vm945_vm0, %v1685_v57, %v1686_v19  ;;  %v1735_v52 = vadd.f32 %v1686_v19, %v1629_v59 }
 0x208   : > { %v1839_v18 = vsel %vm1084_vm1, %v1837_v63, %v1838_v60  ;;  %v1841_v54 = vsel %vm1084_vm1, %v1838_v60, %v1840_v61  ;;  %v1734_v28 = vadd.f32 %v1687_v36, %v1628_v5  ;;  %v1887_v27 = vadd.f32 %v1837_v63, %v1733_v58  ;;  %v3070_v63 = vld [vmem:[#allocation2 + $0xdc] sm:$0x1] }
 0x209   : > { %v2566_v9 = vmul.f32 %v5823_v22, %v2540_v32  ;;  %v2567_v55 = vmul.f32 %v5823_v22, %v2541_v40  ;;  %v1889_v56 = vadd.f32 %v1841_v54, %v1735_v52  ;;  %v2568_v38 = vmul.f32 %v5823_v22, %v2542_v1 }
 0x20a   : > { %v2612_v3 = vmul.f32 %v5834_v48, %v2541_v40  ;;  %v2613_v47 = vmul.f32 %v5834_v48, %v2542_v1  ;;  %v1888_v30 = vadd.f32 %v1839_v18, %v1734_v28  ;;  %v1915_v51 = vadd.f32 %v4881_v35, %v1887_v27  ;;  %v2874_v48 = vld [vmem:[#allocation2 + $0xd0] sm:$0x8]  ;;  %v3233_v28 = vld [vmem:[#allocation2 + $0xe0] sm:$0x8] }
 0x20b   : > { %v2738_v17 = vmul.f32 %v5841_v41, %v2541_v40  ;;  %v2739_v21 = vmul.f32 %v5841_v41, %v2542_v1  ;;  %v1917_v23 = vadd.f32 %v4881_v35, %v1889_v56  ;;  %v2740_v53 = vmul.f32 %v5841_v41, %v2720_v2 }
 0x20c   : > { %v2648_v7 = vrot.slane %v2612_v3, 1  ;;  %v2649_v29 = vrot.slane %v2613_v47, 1  ;;  %v1916_v22 = vadd.f32 %v4881_v35, %v1888_v30  ;;  %v1939_v11 = vmax.f32 %v1915_v51, 0.0 }
 0x20d   : > { %v2794_v37 = vrot.slane %v2738_v17, 2  ;;  %v2795_v50 = vrot.slane %v2739_v21, 2  ;;  %v1941_v25 = vmax.f32 %v1917_v23, 0.0  ;;  %v2797_v13 = vrot.slane %v2740_v53, 2  ;;  %v3234_v17 = vld [vmem:[#allocation2 + $0xe4] sm:$0xff]  }
 0x20e   : > { %v2650_v14 = vsel %vm945_vm0, %v2648_v7, %v2649_v29  ;;  %v2696_v20 = vadd.f32 %v2648_v7, %v2566_v9  ;;  %v2698_v34 = vadd.f32 %v2649_v29, %v2568_v38  ;;  %v1940_v4 = vmax.f32 %v1916_v22, 0.0  ;;  %v3429_v53 = vld [vmem:[#allocation2 + $0xec] sm:$0x1] }
 0x20f   : > { %v1963_v39 = vpack.c.bf16 %v1939_v11, %v1939_v11  ;;  %v2697_v43 = vadd.f32 %v2650_v14, %v2567_v55  ;;  %v2796_v62 = vsel %vm1084_vm1, %v2794_v37, %v2795_v50  ;;  %v1965_v24 = vpack.c.bf16 %v1941_v25, %v1941_v25 }
 0x210   : > { %v2850_v33 = vadd.f32 %v2794_v37, %v2696_v20  ;;  %v2898_v41 = vunpack.c.l.bf16 %v2874_v48  ;;  %v1964_v49 = vpack.c.bf16 %v1940_v4, %v1940_v4  ;;  %v2899_v15 = vunpack.c.l.bf16 %v2875_v42 }
 0x211   : > { %v2124_v57 = vshrl.u32 %v1963_v39, 16  ;;  %v2851_v0 = vadd.f32 %v2796_v62, %v2697_v43  ;;  %v2138_v44 = vshrl.u32 %v1965_v24, 16  ;;  %v2141_v45 = vshll.u32 %v1965_v24, 16 }
 0x212   : > { %v2798_v5 = vsel %vm1084_vm1, %v2795_v50, %v2797_v13  ;;  %v2900_v59 = vunpack.c.h.bf16 %v2875_v42  ;;  %v2129_v58 = vshrl.u32 %v1964_v49, 16  ;;  %v2132_v60 = vshll.u32 %v1964_v49, 16 }
 0x213   : > { %v4405_v19 = vrot.slane %v2124_v57, 11  ;;  %v2852_v61 = vadd.f32 %v2798_v5, %v2698_v34  ;;  %v2140_v32 = vrot.slane %v2138_v44, 7  ;;  %v2924_v40 = vmul.f32 %v5855_v16, %v2898_v41  ;;  %v6076_v57 = vld [vmem:[%s6359_s6] ss:$0 sm:$0xff]  ;;  %v2521_v5 = vld [vmem:[#allocation2 + $0xd8] sm:$0xf] }
 0x214   : > { %v2925_v1 = vmul.f32 %v5855_v16, %v2899_v15  ;;  %v2926_v2 = vmul.f32 %v5855_v16, %v2900_v59  ;;  %v2131_v36 = vrot.slane %v2129_v58, 7  ;;  %v2970_v52 = vmul.f32 %v5862_v46, %v2899_v15 }
 0x215   : > { %v2971_v18 = vmul.f32 %v5862_v46, %v2900_v59  ;;  %v3078_v54 = vunpack.c.l.bf16 %v3070_v63  ;;  %v2143_v27 = vor.u32 %v2141_v45, %v2140_v32  ;;  %v2948_v9 = vadd.f32 %v2924_v40, %v2850_v33  ;;  %v2519_v32 = vld [vmem:[#allocation2 + $0xd0] sm:$0x8]  ;;  %v2366_v40 = vpop.f32.mrf.mxu2 }
 0x216   : > { %v2949_v55 = vadd.f32 %v2925_v1, %v2851_v0  ;;  %v2950_v56 = vadd.f32 %v2926_v2, %v2852_v61  ;;  %v2134_v38 = vor.u32 %v2132_v60, %v2131_v36  ;;  %v2136_v3 = vrot.slane %v2131_v36, 4  ;;  %v2520_v36 = vld [vmem:[#allocation2 + $0xd4] sm:$0xf] }
 0x217   : > { %v3006_v47 = vrot.slane %v2970_v52, 1  ;;  %v3007_v30 = vrot.slane %v2971_v18, 1  ;;  %v3096_v35 = vmul.f32 %v5870_v8, %v2899_v15  ;;  %v3097_v51 = vmul.f32 %v5870_v8, %v2900_v59  ;;  %v2713_v52 = vld [vmem:[#allocation2 + $0xdc] sm:$0x1] }
 0x218   : > { %v3098_v16 = vmul.f32 %v5870_v8, %v3078_v54  ;;  %v3257_v21 = vunpack.c.l.bf16 %v3233_v28  ;;  %v2135_v46 = vsel %vm5389_vm4, %v4405_v19, %v2134_v38  ;;  %v2144_v23 = vsel %vm5389_vm4, %v2136_v3, %v2143_v27  ;;  %v2877_v27 = vld [vmem:[#allocation2 + $0xe0] sm:$0x8] }
 0x219   : > { %v3008_v7 = vsel %vm945_vm0, %v3006_v47, %v3007_v30  ;;  %v3054_v29 = vadd.f32 %v3006_v47, %v2948_v9  ;;  %v2207_v22 = vunpack.c.l.b16 %v2135_v46  ;;  %v2208_v11 = vunpack.c.l.b16 %v2144_v23 }
 0x21a   : > { %v3055_v37 = vadd.f32 %v3008_v7, %v2949_v55  ;;  %v3056_v50 = vadd.f32 %v3007_v30, %v2950_v56  ;;  %v3152_v48 = vrot.slane %v3096_v35, 2  ;;  %v3153_v25 = vrot.slane %v3097_v51, 2 }
 0x21b   : > { %v3155_v14 = vrot.slane %v3098_v16, 2  ;;  %v3258_v8 = vunpack.c.l.bf16 %v3234_v17  ;;  %v2216_v20 = vpack.c.b16 %v2208_v11, %v2207_v22  ;;  %v3259_v34 = vunpack.c.h.bf16 %v3234_v17  ;;  %v6092_v16 = vld [vmem:[%s6356_s3] ss:$0 sm:$0xff] }
 0x21c   : > { %v3283_v42 = vmul.f32 %v5887_v10, %v3257_v21  ;;  %v3437_v4 = vunpack.c.l.bf16 %v3429_v53  ;;  %v3154_v39 = vsel %vm1084_vm1, %v3152_v48, %v3153_v25  ;;  %v3208_v62 = vadd.f32 %v3152_v48, %v3054_v29  ;;  %v6101_v29 = vld [vmem:[%s6356_s3 + $0x1] ss:$0 sm:$0xff] }
 0x21d   : > { %v3156_v43 = vsel %vm1084_vm1, %v3153_v25, %v3155_v14  ;;  %v3284_v24 = vmul.f32 %v5887_v10, %v3258_v8  ;;  %2449 = vmatmul.bf16.gmra.mxu3 %v2216_v20  ;;  %v3209_v13 = vadd.f32 %v3154_v39, %v3055_v37  ;;  %v3285_v41 = vmul.f32 %v5887_v10, %v3259_v34 }
 0x21e   : > { %v3210_v33 = vadd.f32 %v3156_v43, %v3056_v50  ;;  %v3329_v49 = vmul.f32 %v5894_v31, %v3258_v8  ;;  %v3307_v0 = vadd.f32 %v3283_v42, %v3208_v62  ;;  %v3330_v15 = vmul.f32 %v5894_v31, %v3259_v34  ;;  %v6109_v50 = vld [vmem:[%s6356_s3 + $0x2] ss:$0 sm:$0xff] }
 0x21f   : > { %v3455_v44 = vmul.f32 %v5902_v6, %v3258_v8  ;;  %v3456_v45 = vmul.f32 %v5902_v6, %v3259_v34  ;;  %v3308_v59 = vadd.f32 %v3284_v24, %v3209_v13  ;;  %v3457_v10 = vmul.f32 %v5902_v6, %v3437_v4 }
 0x220   : > { %v3309_v63 = vadd.f32 %v3285_v41, %v3210_v33  ;;  %v3365_v19 = vrot.slane %v3329_v49, 1  ;;  %v3366_v58 = vrot.slane %v3330_v15, 1  ;;  %v6083_v31 = vadd.f32 %v6076_v57, %v2366_v40 }
 0x221   : > { %v3511_v60 = vrot.slane %v3455_v44, 2  ;;  %v3512_v61 = vrot.slane %v3456_v45, 2  ;;  %v3514_v2 = vrot.slane %v3457_v10, 2  ;;  %v2543_v56 = vunpack.c.l.bf16 %v2519_v32 }
 0x222   : > { %v3413_v1 = vadd.f32 %v3365_v19, %v3307_v0  ;;  %v3367_v18 = vsel %vm945_vm0, %v3365_v19, %v3366_v58  ;;  %v3415_v54 = vadd.f32 %v3366_v58, %v3309_v63  ;;  %v2544_v3 = vunpack.c.l.bf16 %v2520_v36 }
 0x223   : > { %v3513_v28 = vsel %vm1084_vm1, %v3511_v60, %v3512_v61  ;;  %v3414_v9 = vadd.f32 %v3367_v18, %v3308_v59  ;;  %v3515_v6 = vsel %vm1084_vm1, %v3512_v61, %v3514_v2  ;;  %v2545_v47 = vunpack.c.l.bf16 %v2521_v5  ;;  %v2878_v5 = vld [vmem:[#allocation2 + $0xe4] sm:$0xff]   ;;  %v3071_v59 = vld [vmem:[#allocation2 + $0xec] sm:$0x1]  ;;  %v3237_v61 = vld [vmem:[#allocation2 + $0xf4] sm:$0xff]  }
 0x224   : > { %v3567_v55 = vadd.f32 %v3511_v60, %v3413_v1  ;;  %v3569_v38 = vadd.f32 %v3515_v6, %v3415_v54  ;;  %v2721_v30 = vunpack.c.l.bf16 %v2713_v52  ;;  %v2569_v17 = vmul.f32 %v6092_v16, %v2543_v56  ;;  %v3236_v60 = vld [vmem:[#allocation2 + $0xf0] sm:$0x8]  ;;  %v6120_v54 = vld [vmem:[%s6356_s3 + $0x3] ss:$0 sm:$0xff] }
 0x225   : > { %v3568_v35 = vadd.f32 %v3513_v28, %v3414_v9  ;;  %v2901_v21 = vunpack.c.l.bf16 %v2877_v27  ;;  %v2570_v23 = vmul.f32 %v6092_v16, %v2544_v3  ;;  %v2571_v7 = vmul.f32 %v6092_v16, %v2545_v47 }
 0x226   : > { %v3595_v51 = vadd.f32 %v5925_v12, %v3567_v55  ;;  %v3597_v46 = vadd.f32 %v5925_v12, %v3569_v38  ;;  %v2614_v53 = vmul.f32 %v6101_v29, %v2544_v3  ;;  %v2615_v37 = vmul.f32 %v6101_v29, %v2545_v47 }
 0x227   : > { %v3596_v22 = vadd.f32 %v5925_v12, %v3568_v35  ;;  %v2741_v48 = vmul.f32 %v6109_v50, %v2544_v3  ;;  %v2742_v8 = vmul.f32 %v6109_v50, %v2545_v47  ;;  %v2743_v20 = vmul.f32 %v6109_v50, %v2721_v30  ;;  %v6128_v35 = vld [vmem:[%s6356_s3 + $0x4] ss:$0 sm:$0xff] }
 0x228   : > { %v3619_v11 = vmax.f32 %v3595_v51, 0.0  ;;  %v3621_v25 = vmax.f32 %v3597_v46, 0.0  ;;  %v2651_v14 = vrot.slane %v2614_v53, 1  ;;  %v2652_v4 = vrot.slane %v2615_v37, 1 }
 0x229   : > { %v3620_v34 = vmax.f32 %v3596_v22, 0.0  ;;  %v2799_v12 = vrot.slane %v2741_v48, 2  ;;  %v2800_v62 = vrot.slane %v2742_v8, 2  ;;  %v2802_v24 = vrot.slane %v2743_v20, 2  ;;  %v2368_v8 = vpop.f32.mrf.mxu2 }
 0x22a   : > { %v3643_v42 = vpack.c.bf16 %v3619_v11, %v3619_v11  ;;  %v3645_v39 = vpack.c.bf16 %v3621_v25, %v3621_v25  ;;  %v2699_v43 = vadd.f32 %v2651_v14, %v2569_v17  ;;  %v2653_v41 = vsel %vm945_vm0, %v2651_v14, %v2652_v4  ;;  %v2415_v11 = vpop.f32.mrf.mxu3 }
 0x22b   : > { %v3644_v13 = vpack.c.bf16 %v3620_v34, %v3620_v34  ;;  %v2701_v49 = vadd.f32 %v2652_v4, %v2571_v7  ;;  %v2700_v44 = vadd.f32 %v2653_v41, %v2570_v23  ;;  %v2801_v45 = vsel %vm1084_vm1, %v2799_v12, %v2800_v62 }
 0x22c   : > { %v3744_v33 = vshrl.u32 %v3643_v42, 16  ;;  %v3758_v0 = vshrl.u32 %v3645_v39, 16  ;;  %v3761_v15 = vshll.u32 %v3645_v39, 16  ;;  %v2803_v58 = vsel %vm1084_vm1, %v2800_v62, %v2802_v24  ;;  %v3430_v24 = vld [vmem:[#allocation2 + $0xfc] sm:$0x1] }
 0x22d   : > { %v3749_v19 = vshrl.u32 %v3644_v13, 16  ;;  %v3752_v10 = vshll.u32 %v3644_v13, 16  ;;  %v2853_v40 = vadd.f32 %v2799_v12, %v2699_v43  ;;  %v2854_v1 = vadd.f32 %v2801_v45, %v2700_v44 }
 0x22e   : > { %v4506_v63 = vrot.slane %v3744_v33, 11  ;;  %v3760_v32 = vrot.slane %v3758_v0, 7  ;;  %v2855_v2 = vadd.f32 %v2803_v58, %v2701_v49  ;;  %v2902_v52 = vunpack.c.l.bf16 %v2878_v5  ;;  %v6148_v49 = vld [vmem:[%s6356_s3 + $0x6] ss:$0 sm:$0xff] }
 0x22f   : > { %v3751_v36 = vrot.slane %v3749_v19, 7  ;;  %v2903_v18 = vunpack.c.h.bf16 %v2878_v5  ;;  %v2927_v28 = vmul.f32 %v6120_v54, %v2901_v21  ;;  %v3079_v9 = vunpack.c.l.bf16 %v3071_v59  ;;  %v6135_v21 = vld [vmem:[%s6356_s3 + $0x5] ss:$0 sm:$0xff]  ;;  %v6156_v5 = vld [vmem:[%s6356_s3 + $0x7] ss:$0 sm:$0xff] }
 0x230   : > { %v3763_v27 = vor.u32 %v3761_v15, %v3760_v32  ;;  %v3260_v6 = vunpack.c.l.bf16 %v3236_v60  ;;  %v3261_v55 = vunpack.c.l.bf16 %v3237_v61  ;;  %v2928_v3 = vmul.f32 %v6120_v54, %v2902_v52 }
 0x231   : > { %v3754_v56 = vor.u32 %v3752_v10, %v3751_v36  ;;  %v3756_v38 = vrot.slane %v3751_v36, 4  ;;  %v2929_v47 = vmul.f32 %v6120_v54, %v2903_v18  ;;  %v2951_v30 = vadd.f32 %v2927_v28, %v2853_v40 }
 0x232   : > { %v2972_v51 = vmul.f32 %v6128_v35, %v2902_v52  ;;  %v2973_v17 = vmul.f32 %v6128_v35, %v2903_v18  ;;  %v3099_v46 = vmul.f32 %v6135_v21, %v2902_v52  ;;  %v2952_v53 = vadd.f32 %v2928_v3, %v2854_v1 }
 0x233   : > { %v3755_v23 = vsel %vm5389_vm4, %v4506_v63, %v3754_v56  ;;  %v3764_v7 = vsel %vm5389_vm4, %v3756_v38, %v3763_v27  ;;  %v2953_v22 = vadd.f32 %v2929_v47, %v2855_v2  ;;  %v3100_v20 = vmul.f32 %v6135_v21, %v2903_v18  ;;  %v6165_v2 = vld [vmem:[%s6356_s3 + $0x8] ss:$0 sm:$0xff] }
 0x234   : > { %v3887_v37 = vunpack.c.l.b16 %v3755_v23  ;;  %v3888_v48 = vunpack.c.l.b16 %v3764_v7  ;;  %v3009_v25 = vrot.slane %v2972_v51, 1  ;;  %v3010_v14 = vrot.slane %v2973_v17, 1  ;;  %v2523_v23 = vld [vmem:[#allocation2 + $0xe4] sm:$0xf]  ;;  %v2524_v7 = vld [vmem:[#allocation2 + $0xe8] sm:$0xf] }
 0x235   : > { %v3101_v34 = vmul.f32 %v6135_v21, %v3079_v9  ;;  %v3157_v42 = vrot.slane %v3099_v46, 2  ;;  %v3262_v4 = vunpack.c.h.bf16 %v3237_v61  ;;  %v3158_v33 = vrot.slane %v3100_v20, 2 }
 0x236   : > { %v3899_v12 = vpack.c.b16 %v3888_v48, %v3887_v37  ;;  %v3011_v39 = vsel %vm945_vm0, %v3009_v25, %v3010_v14  ;;  %v3057_v43 = vadd.f32 %v3009_v25, %v2951_v30  ;;  %v3059_v62 = vadd.f32 %v3010_v14, %v2953_v22  ;;  %v2417_v30 = vpop.f32.mrf.mxu3 }
 0x237   : > { %v3058_v13 = vadd.f32 %v3011_v39, %v2952_v53  ;;  %v3160_v41 = vrot.slane %v3101_v34, 2  ;;  %v3286_v0 = vmul.f32 %v6148_v49, %v3260_v6  ;;  %v3287_v44 = vmul.f32 %v6148_v49, %v3261_v55  ;;  %v2371_v53 = vpop.f32.mrf.mxu2 }
 0x238   : > { %4120 = vmatmul.bf16.gmra.mxu1 %v3899_v12  ;;  %v3211_v15 = vadd.f32 %v3157_v42, %v3057_v43  ;;  %v3288_v45 = vmul.f32 %v6148_v49, %v3262_v4  ;;  %v3331_v59 = vmul.f32 %v6156_v5, %v3261_v55  ;;  %v3159_v63 = vsel %vm1084_vm1, %v3157_v42, %v3158_v33 }
 0x239   : > { %v3161_v19 = vsel %vm1084_vm1, %v3158_v33, %v3160_v41  ;;  %v3332_v10 = vmul.f32 %v6156_v5, %v3262_v4  ;;  %v3438_v58 = vunpack.c.l.bf16 %v3430_v24  ;;  %v3212_v60 = vadd.f32 %v3159_v63, %v3058_v13  ;;  %v2714_v24 = vld [vmem:[#allocation2 + $0xec] sm:$0x1] }
 0x23a   : > { %v3213_v61 = vadd.f32 %v3161_v19, %v3059_v62  ;;  %v3310_v32 = vadd.f32 %v3286_v0, %v3211_v15  ;;  %v3368_v40 = vrot.slane %v3331_v59, 1  ;;  %v3458_v36 = vmul.f32 %v6165_v2, %v3261_v55  ;;  %v2522_v55 = vld [vmem:[#allocation2 + $0xe0] sm:$0x8] }
 0x23b   : > { %v3369_v1 = vrot.slane %v3332_v10, 1  ;;  %v3459_v52 = vmul.f32 %v6165_v2, %v3262_v4  ;;  %v3460_v18 = vmul.f32 %v6165_v2, %v3438_v58  ;;  %v3311_v28 = vadd.f32 %v3287_v44, %v3212_v60 }
 0x23c   : > { %v3312_v27 = vadd.f32 %v3288_v45, %v3213_v61  ;;  %v3416_v9 = vadd.f32 %v3368_v40, %v3310_v32  ;;  %v2416_v6 = vadd.f32 %v2415_v11, %v6083_v31  ;;  %v3516_v38 = vrot.slane %v3458_v36, 2 }
 0x23d   : > { %v3370_v56 = vsel %vm945_vm0, %v3368_v40, %v3369_v1  ;;  %v3517_v3 = vrot.slane %v3459_v52, 2  ;;  %v3519_v47 = vrot.slane %v3460_v18, 2  ;;  %v2369_v51 = vadd.f32 %v6076_v57, %v2368_v8  ;;  %v6181_v8 = vld [vmem:[%s6357_s4] ss:$0 sm:$0xff] }
 0x23e   : > { %v3417_v17 = vadd.f32 %v3370_v56, %v3311_v28  ;;  %v3418_v46 = vadd.f32 %v3369_v1, %v3312_v27  ;;  %v3570_v48 = vadd.f32 %v3516_v38, %v3416_v9  ;;  %v6176_v31 = vadd.f32 %v6076_v57, %v2371_v53  ;;  %v2881_v28 = vld [vmem:[#allocation2 + $0xf4] sm:$0xff]  }
 0x23f   : > { %v3518_v22 = vsel %vm1084_vm1, %v3516_v38, %v3517_v3  ;;  %v3520_v37 = vsel %vm1084_vm1, %v3517_v3, %v3519_v47  ;;  %v2418_v14 = vadd.f32 %v2417_v30, %v2369_v51  ;;  %v2455_v34 = vmax.f32 %v2416_v6, 0.0  ;;  %v2880_v38 = vld [vmem:[#allocation2 + $0xf0] sm:$0x8] }
 0x240   : > { %v3571_v11 = vadd.f32 %v3518_v22, %v3417_v17  ;;  %v3572_v25 = vadd.f32 %v3520_v37, %v3418_v46  ;;  %v3598_v20 = vadd.f32 %v6181_v8, %v3570_v48  ;;  %v2546_v42 = vunpack.c.l.bf16 %v2522_v55 }
 0x241   : > { %v2547_v4 = vunpack.c.l.bf16 %v2523_v23  ;;  %v2456_v43 = vmax.f32 %v2418_v14, 0.0  ;;  %v2548_v62 = vunpack.c.l.bf16 %v2524_v7  ;;  %v2722_v58 = vunpack.c.l.bf16 %v2714_v24  ;;  %v6203_v7 = vpop.f32.mrf.mxu2 }
 0x242   : > { %v3599_v12 = vadd.f32 %v6181_v8, %v3571_v11  ;;  %v3600_v39 = vadd.f32 %v6181_v8, %v3572_v25  ;;  %v3622_v13 = vmax.f32 %v3598_v20, 0.0  ;;  %v2572_v33 = vmul.f32 %v6092_v16, %v2546_v42 }
 0x243   : > { %v2573_v41 = vmul.f32 %v6092_v16, %v2547_v4  ;;  %v2616_v0 = vmul.f32 %v6101_v29, %v2547_v4  ;;  %v4709_v45 = vpack.c.bf16 %v2456_v43, %v2455_v34  ;;  %v2574_v59 = vmul.f32 %v6092_v16, %v2548_v62 }
 0x244   : > { %v3623_v15 = vmax.f32 %v3599_v12, 0.0  ;;  %v3624_v44 = vmax.f32 %v3600_v39, 0.0  ;;  %v3646_v63 = vpack.c.bf16 %v3622_v13, %v3622_v13  ;;  %v2617_v19 = vmul.f32 %v6101_v29, %v2548_v62  ;;  %v3072_v39 = vld [vmem:[#allocation2 + $0xfc] sm:$0x1] }
 0x245   : > { %v2654_v10 = vrot.slane %v2616_v0, 1  ;;  %4710 = vst [vmem:[%s6191_s14] sm:$0xff] %v4709_v45   ;;  %v2744_v32 = vmul.f32 %v6109_v50, %v2547_v4  ;;  %v2745_v40 = vmul.f32 %v6109_v50, %v2548_v62  ;;  %v2746_v18 = vmul.f32 %v6109_v50, %v2722_v58 }
 0x246   : > { %v3647_v60 = vpack.c.bf16 %v3623_v15, %v3623_v15  ;;  %v3648_v61 = vpack.c.bf16 %v3624_v44, %v3624_v44  ;;  %v3766_v1 = vshrl.u32 %v3646_v63, 16  ;;  %v2655_v36 = vrot.slane %v2617_v19, 1  ;;  %v3239_v44 = vld [vmem:[#allocation2 + $0x100] sm:$0x8] }
 0x247   : > { %v2702_v52 = vadd.f32 %v2654_v10, %v2572_v33  ;;  %v2804_v51 = vrot.slane %v2744_v32, 2  ;;  %v2805_v23 = vrot.slane %v2745_v40, 2  ;;  %v2807_v53 = vrot.slane %v2746_v18, 2  ;;  %v2420_v40 = vpop.f32.mrf.mxu3 }
 0x248   : > { %v3771_v27 = vshrl.u32 %v3647_v60, 16  ;;  %v3774_v9 = vshll.u32 %v3647_v60, 16  ;;  %v3780_v6 = vshrl.u32 %v3648_v61, 16  ;;  %v3783_v56 = vshll.u32 %v3648_v61, 16 }
 0x249   : > { %v4507_v3 = vrot.slane %v3766_v1, 11  ;;  %v2656_v47 = vsel %vm945_vm0, %v2654_v10, %v2655_v36  ;;  %v2704_v30 = vadd.f32 %v2655_v36, %v2574_v59  ;;  %v2856_v22 = vadd.f32 %v2804_v51, %v2702_v52  ;;  %v3240_v10 = vld [vmem:[#allocation2 + $0x104] sm:$0xff]  }
 0x24a   : > { %v3773_v17 = vrot.slane %v3771_v27, 7  ;;  %v3782_v46 = vrot.slane %v3780_v6, 7  ;;  %v2703_v55 = vadd.f32 %v2656_v47, %v2573_v41  ;;  %v2904_v37 = vunpack.c.l.bf16 %v2880_v38 }
 0x24b   : > { %v2905_v48 = vunpack.c.l.bf16 %v2881_v28  ;;  %v2806_v20 = vsel %vm1084_vm1, %v2804_v51, %v2805_v23  ;;  %v2808_v34 = vsel %vm1084_vm1, %v2805_v23, %v2807_v53  ;;  %v2906_v4 = vunpack.c.h.bf16 %v2881_v28  ;;  %v2376_v51 = vpop.f32.mrf.mxu2 }
 0x24c   : > { %v3776_v11 = vor.u32 %v3774_v9, %v3773_v17  ;;  %v3778_v25 = vrot.slane %v3773_v17, 4  ;;  %v3785_v14 = vor.u32 %v3783_v56, %v3782_v46  ;;  %v2857_v42 = vadd.f32 %v2806_v20, %v2703_v55 }
 0x24d   : > { %v2930_v12 = vmul.f32 %v6120_v54, %v2904_v37  ;;  %v2858_v24 = vadd.f32 %v2808_v34, %v2704_v30  ;;  %v2931_v13 = vmul.f32 %v6120_v54, %v2905_v48  ;;  %v2932_v0 = vmul.f32 %v6120_v54, %v2906_v4  ;;  %v3431_v30 = vld [vmem:[#allocation2 + $0x10c] sm:$0x1] }
 0x24e   : > { %v3777_v43 = vsel %vm5389_vm4, %v4507_v3, %v3776_v11  ;;  %v3786_v62 = vsel %vm5389_vm4, %v3778_v25, %v3785_v14  ;;  %v2974_v59 = vmul.f32 %v6128_v35, %v2905_v48  ;;  %v2975_v63 = vmul.f32 %v6128_v35, %v2906_v4 }
 0x24f   : > { %v3889_v33 = vunpack.c.l.b16 %v3777_v43  ;;  %v3890_v41 = vunpack.c.l.b16 %v3786_v62  ;;  %v2954_v15 = vadd.f32 %v2930_v12, %v2856_v22  ;;  %v2955_v45 = vadd.f32 %v2931_v13, %v2857_v42 }
 0x250   : > { %v3080_v19 = vunpack.c.l.bf16 %v3072_v39  ;;  %v2956_v60 = vadd.f32 %v2932_v0, %v2858_v24  ;;  %v3102_v61 = vmul.f32 %v6135_v21, %v2905_v48  ;;  %v3103_v32 = vmul.f32 %v6135_v21, %v2906_v4 }
 0x251   : > { %v3900_v58 = vpack.c.b16 %v3890_v41, %v3889_v33  ;;  %v3012_v1 = vrot.slane %v2974_v59, 1  ;;  %v3013_v36 = vrot.slane %v2975_v63, 1  ;;  %v3263_v18 = vunpack.c.l.bf16 %v3239_v44 }
 0x252   : > { %v3104_v52 = vmul.f32 %v6135_v21, %v3080_v19  ;;  %v3162_v28 = vrot.slane %v3102_v61, 2  ;;  %v3163_v27 = vrot.slane %v3103_v32, 2  ;;  %v3264_v9 = vunpack.c.l.bf16 %v3240_v10  ;;  %v2527_v19 = vld [vmem:[#allocation2 + $0xf8] sm:$0xf]  ;;  %v2525_v61 = vld [vmem:[#allocation2 + $0xf0] sm:$0x8] }
 0x253   : > { %4125 = vmatmul.bf16.gmra.mxu1 %v3900_v58  ;;  %v3265_v6 = vunpack.c.h.bf16 %v3240_v10  ;;  %v3014_v56 = vsel %vm945_vm0, %v3012_v1, %v3013_v36  ;;  %v3060_v38 = vadd.f32 %v3012_v1, %v2954_v15  ;;  %v3062_v3 = vadd.f32 %v3013_v36, %v2956_v60  ;;  %v2422_v15 = vpop.f32.mrf.mxu3  ;;  %v2526_v32 = vld [vmem:[#allocation2 + $0xf4] sm:$0xf]  ;;  %v2715_v36 = vld [vmem:[#allocation2 + $0xfc] sm:$0x1] }
 0x254   : > { %v3165_v47 = vrot.slane %v3104_v52, 2  ;;  %v3061_v17 = vadd.f32 %v3014_v56, %v2955_v45  ;;  %v3164_v46 = vsel %vm1084_vm1, %v3162_v28, %v3163_v27  ;;  %v3289_v55 = vmul.f32 %v6148_v49, %v3263_v18  ;;  %v6239_v52 = vpop.f32.mrf.mxu0 }
 0x255   : > { %v3290_v23 = vmul.f32 %v6148_v49, %v3264_v9  ;;  %v3214_v22 = vadd.f32 %v3162_v28, %v3060_v38  ;;  %v3291_v37 = vmul.f32 %v6148_v49, %v3265_v6  ;;  %v3333_v48 = vmul.f32 %v6156_v5, %v3264_v9 }
 0x256   : > { %v3166_v53 = vsel %vm1084_vm1, %v3163_v27, %v3165_v47  ;;  %v3215_v11 = vadd.f32 %v3164_v46, %v3061_v17  ;;  %v3334_v14 = vmul.f32 %v6156_v5, %v3265_v6  ;;  %v3439_v20 = vunpack.c.l.bf16 %v3431_v30 }
 0x257   : > { %v3216_v25 = vadd.f32 %v3166_v53, %v3062_v3  ;;  %v3313_v34 = vadd.f32 %v3289_v55, %v3214_v22  ;;  %v3371_v42 = vrot.slane %v3333_v48, 1  ;;  %v3461_v4 = vmul.f32 %v6165_v2, %v3264_v9  ;;  %v6242_v9 = vpop.f32.mrf.mxu2 }
 0x258   : > { %v3462_v12 = vmul.f32 %v6165_v2, %v3265_v6  ;;  %v3314_v39 = vadd.f32 %v3290_v23, %v3215_v11  ;;  %v3372_v62 = vrot.slane %v3334_v14, 1  ;;  %v3463_v24 = vmul.f32 %v6165_v2, %v3439_v20 }
 0x259   : > { %v3315_v43 = vadd.f32 %v3291_v37, %v3216_v25  ;;  %v3419_v13 = vadd.f32 %v3371_v42, %v3313_v34  ;;  %v3521_v33 = vrot.slane %v3461_v4, 2  ;;  %v2421_v0 = vadd.f32 %v2420_v40, %v6176_v31 }
 0x25a   : > { %v3522_v41 = vrot.slane %v3462_v12, 2  ;;  %v2374_v44 = vadd.f32 %v6076_v57, %v6203_v7  ;;  %v3373_v45 = vsel %vm945_vm0, %v3371_v42, %v3372_v62  ;;  %v3524_v63 = vrot.slane %v3463_v24, 2 }
 0x25b   : > { %v3421_v59 = vadd.f32 %v3372_v62, %v3315_v43  ;;  %v3420_v10 = vadd.f32 %v3373_v45, %v3314_v39  ;;  %v3573_v60 = vadd.f32 %v3521_v33, %v3419_v13  ;;  %v6236_v1 = vadd.f32 %v6076_v57, %v2376_v51  ;;  %v2884_v13 = vld [vmem:[#allocation2 + $0x104] sm:$0xff]  }
 0x25c   : > { %v3523_v58 = vsel %vm1084_vm1, %v3521_v33, %v3522_v41  ;;  %v3525_v31 = vsel %vm1084_vm1, %v3522_v41, %v3524_v63  ;;  %v2423_v40 = vadd.f32 %v2422_v15, %v2374_v44  ;;  %v2457_v27 = vmax.f32 %v2421_v0, 0.0 }
 0x25d   : > { %v3574_v7 = vadd.f32 %v3523_v58, %v3420_v10  ;;  %v3575_v18 = vadd.f32 %v3525_v31, %v3421_v59  ;;  %v3601_v28 = vadd.f32 %v6181_v8, %v3573_v60  ;;  %v2549_v56 = vunpack.c.l.bf16 %v2525_v61 }
 0x25e   : > { %v2458_v6 = vmax.f32 %v2423_v40, 0.0  ;;  %v2550_v38 = vunpack.c.l.bf16 %v2526_v32  ;;  %v2551_v3 = vunpack.c.l.bf16 %v2527_v19  ;;  %v2723_v17 = vunpack.c.l.bf16 %v2715_v36 }
 0x25f   : > { %v3602_v47 = vadd.f32 %v6181_v8, %v3574_v7  ;;  %v3603_v30 = vadd.f32 %v6181_v8, %v3575_v18  ;;  %v3625_v51 = vmax.f32 %v3601_v28, 0.0  ;;  %v2575_v55 = vmul.f32 %v6092_v16, %v2549_v56  ;;  %v6259_v61 = vpop.f32.mrf.mxu2  ;;  %v3073_v7 = vld [vmem:[#allocation2 + $0x10c] sm:$0x1] }
 0x260   : > { %v4714_v46 = vpack.c.bf16 %v2458_v6, %v2457_v27  ;;  %v2576_v23 = vmul.f32 %v6092_v16, %v2550_v38  ;;  %v2577_v53 = vmul.f32 %v6092_v16, %v2551_v3  ;;  %v2618_v11 = vmul.f32 %v6101_v29, %v2550_v38 }
 0x261   : > { %v3626_v22 = vmax.f32 %v3602_v47, 0.0  ;;  %v3627_v37 = vmax.f32 %v3603_v30, 0.0  ;;  %v3649_v48 = vpack.c.bf16 %v3625_v51, %v3625_v51  ;;  %v2619_v25 = vmul.f32 %v6101_v29, %v2551_v3  ;;  %v2883_v29 = vld [vmem:[#allocation2 + $0x100] sm:$0x8] }
 0x262   : > { %4786 = vst [vmem:[%s6191_s14 + $0x8] sm:$0xff] %v4714_v46   ;;  %v2747_v14 = vmul.f32 %v6109_v50, %v2550_v38  ;;  %v2748_v20 = vmul.f32 %v6109_v50, %v2551_v3  ;;  %v2749_v34 = vmul.f32 %v6109_v50, %v2723_v17  ;;  %v2657_v39 = vrot.slane %v2618_v11, 1  ;;  %v6256_v50 = vpop.f32.mrf.mxu0 }
 0x263   : > { %v3650_v42 = vpack.c.bf16 %v3626_v22, %v3626_v22  ;;  %v3651_v4 = vpack.c.bf16 %v3627_v37, %v3627_v37  ;;  %v3788_v12 = vshrl.u32 %v3649_v48, 16  ;;  %v2658_v43 = vrot.slane %v2619_v25, 1  ;;  %v3242_v37 = vld [vmem:[#allocation2 + $0x110] sm:$0x8] }
 0x264   : > { %v2809_v16 = vrot.slane %v2747_v14, 2  ;;  %v2810_v62 = vrot.slane %v2748_v20, 2  ;;  %v2812_v24 = vrot.slane %v2749_v34, 2  ;;  %v2705_v59 = vadd.f32 %v2657_v39, %v2575_v55  ;;  %v3243_v20 = vld [vmem:[#allocation2 + $0x114] sm:$0xff]  }
 0x265   : > { %v4508_v33 = vrot.slane %v3788_v12, 11  ;;  %v3793_v41 = vshrl.u32 %v3650_v42, 16  ;;  %v3796_v0 = vshll.u32 %v3650_v42, 16  ;;  %v3802_v15 = vshrl.u32 %v3651_v4, 16 }
 0x266   : > { %v3805_v44 = vshll.u32 %v3651_v4, 16  ;;  %v2659_v45 = vsel %vm945_vm0, %v2657_v39, %v2658_v43  ;;  %v2707_v63 = vadd.f32 %v2658_v43, %v2577_v53  ;;  %v2811_v60 = vsel %vm1084_vm1, %v2809_v16, %v2810_v62  ;;  %v2425_v39 = vpop.f32.mrf.mxu3 }
 0x267   : > { %v3795_v19 = vrot.slane %v3793_v41, 7  ;;  %v3804_v10 = vrot.slane %v3802_v15, 7  ;;  %v2706_v58 = vadd.f32 %v2659_v45, %v2576_v23  ;;  %v2813_v32 = vsel %vm1084_vm1, %v2810_v62, %v2812_v24  ;;  %v4101_v24 = vpop.f32.mrf.mxu1 }
 0x268   : > { %v2859_v31 = vadd.f32 %v2809_v16, %v2705_v59  ;;  %v2907_v40 = vunpack.c.l.bf16 %v2883_v29  ;;  %v2908_v36 = vunpack.c.l.bf16 %v2884_v13  ;;  %v2861_v56 = vadd.f32 %v2813_v32, %v2707_v63  ;;  %v6278_v59 = vpop.f32.mrf.mxu2 }
 0x269   : > { %v3798_v18 = vor.u32 %v3796_v0, %v3795_v19  ;;  %v3800_v28 = vrot.slane %v3795_v19, 4  ;;  %v3807_v27 = vor.u32 %v3805_v44, %v3804_v10  ;;  %v2860_v6 = vadd.f32 %v2811_v60, %v2706_v58 }
 0x26a   : > { %v2909_v38 = vunpack.c.h.bf16 %v2884_v13  ;;  %v2933_v3 = vmul.f32 %v6120_v54, %v2907_v40  ;;  %v2934_v47 = vmul.f32 %v6120_v54, %v2908_v36  ;;  %v2976_v17 = vmul.f32 %v6128_v35, %v2908_v36  ;;  %v6274_v0 = vpop.f32.mrf.mxu0 }
 0x26b   : > { %v3799_v30 = vsel %vm5389_vm4, %v4508_v33, %v3798_v18  ;;  %v3808_v51 = vsel %vm5389_vm4, %v3800_v28, %v3807_v27  ;;  %v3081_v46 = vunpack.c.l.bf16 %v3073_v7  ;;  %v3105_v14 = vmul.f32 %v6135_v21, %v2908_v36  ;;  %v6288_v36 = vld [vmem:[%s6359_s6] ss:$0 sm:$0xff] }
 0x26c   : > { %v3891_v55 = vunpack.c.l.b16 %v3799_v30  ;;  %v3892_v23 = vunpack.c.l.b16 %v3808_v51  ;;  %v2935_v53 = vmul.f32 %v6120_v54, %v2909_v38  ;;  %v2957_v22 = vadd.f32 %v2933_v3, %v2859_v31 }
 0x26d   : > { %v2958_v48 = vadd.f32 %v2934_v47, %v2860_v6  ;;  %v2977_v11 = vmul.f32 %v6128_v35, %v2909_v38  ;;  %v3015_v25 = vrot.slane %v2976_v17, 1  ;;  %v3106_v4 = vmul.f32 %v6135_v21, %v2909_v38 }
 0x26e   : > { %v3901_v34 = vpack.c.b16 %v3892_v23, %v3891_v55  ;;  %v2959_v42 = vadd.f32 %v2935_v53, %v2861_v56  ;;  %v3107_v12 = vmul.f32 %v6135_v21, %v3081_v46  ;;  %v3167_v62 = vrot.slane %v3105_v14, 2  ;;  %v3432_v21 = vld [vmem:[#allocation2 + $0x11c] sm:$0x1]  ;;  %v2427_v17 = vpop.f32.mrf.mxu3 }
 0x26f   : > { %v3016_v43 = vrot.slane %v2977_v11, 1  ;;  %v3063_v16 = vadd.f32 %v3015_v25, %v2957_v22  ;;  %v3266_v54 = vunpack.c.l.bf16 %v3242_v37  ;;  %v3168_v13 = vrot.slane %v3106_v4, 2  ;;  %v4103_v23 = vpop.f32.mrf.mxu1 }
 0x270   : > { %4130 = vmatmul.bf16.gmra.mxu1 %v3901_v34  ;;  %v3170_v33 = vrot.slane %v3107_v12, 2  ;;  %v3267_v35 = vunpack.c.l.bf16 %v3243_v20  ;;  %v3268_v41 = vunpack.c.h.bf16 %v3243_v20  ;;  %v3440_v28 = vunpack.c.l.bf16 %v3432_v21 }
 0x271   : > { %v3017_v15 = vsel %vm945_vm0, %v3015_v25, %v3016_v43  ;;  %v3065_v29 = vadd.f32 %v3016_v43, %v2959_v42  ;;  %v3217_v44 = vadd.f32 %v3167_v62, %v3063_v16  ;;  %v3292_v45 = vmul.f32 %v6148_v49, %v3266_v54  ;;  %v2386_v43 = vpop.f32.mrf.mxu2 }
 0x272   : > { %v3064_v63 = vadd.f32 %v3017_v15, %v2958_v48  ;;  %v3169_v19 = vsel %vm1084_vm1, %v3167_v62, %v3168_v13  ;;  %v3171_v10 = vsel %vm1084_vm1, %v3168_v13, %v3170_v33  ;;  %v3293_v58 = vmul.f32 %v6148_v49, %v3267_v35  ;;  %v4059_v42 = vpop.f32.mrf.mxu0 }
 0x273   : > { %v3219_v60 = vadd.f32 %v3171_v10, %v3065_v29  ;;  %v3294_v32 = vmul.f32 %v6148_v49, %v3268_v41  ;;  %v3316_v31 = vadd.f32 %v3292_v45, %v3217_v44  ;;  %v3335_v40 = vmul.f32 %v6156_v5, %v3267_v35 }
 0x274   : > { %v3218_v7 = vadd.f32 %v3169_v19, %v3064_v63  ;;  %v3336_v18 = vmul.f32 %v6156_v5, %v3268_v41  ;;  %v3464_v27 = vmul.f32 %v6165_v2, %v3267_v35  ;;  %v3465_v38 = vmul.f32 %v6165_v2, %v3268_v41 }
 0x275   : > { %v3318_v6 = vadd.f32 %v3294_v32, %v3219_v60  ;;  %v3374_v56 = vrot.slane %v3335_v40, 1  ;;  %v2426_v49 = vadd.f32 %v2425_v39, %v6236_v1  ;;  %v3466_v30 = vmul.f32 %v6165_v2, %v3440_v28 }
 0x276   : > { %v3317_v3 = vadd.f32 %v3293_v58, %v3218_v7  ;;  %v3375_v47 = vrot.slane %v3336_v18, 1  ;;  %v3526_v51 = vrot.slane %v3464_v27, 2  ;;  %v2379_v46 = vadd.f32 %v6076_v57, %v6242_v9  ;;  %v2430_v35 = vpop.f32.mrf.mxu3 }
 0x277   : > { %v3422_v55 = vadd.f32 %v3374_v56, %v3316_v31  ;;  %v3527_v5 = vrot.slane %v3465_v38, 2  ;;  %v4053_v53 = vadd.f32 %v6288_v36, %v6239_v52  ;;  %v3529_v48 = vrot.slane %v3466_v30, 2  ;;  %v4106_v44 = vpop.f32.mrf.mxu1 }
 0x278   : > { %v3376_v22 = vsel %vm945_vm0, %v3374_v56, %v3375_v47  ;;  %v3424_v37 = vadd.f32 %v3375_v47, %v3318_v6  ;;  %v2428_v2 = vadd.f32 %v2427_v17, %v2379_v46  ;;  %v4055_v14 = vadd.f32 %v6288_v36, %v6256_v50 }
 0x279   : > { %v3423_v1 = vadd.f32 %v3376_v22, %v3317_v3  ;;  %v3528_v11 = vsel %vm1084_vm1, %v3526_v51, %v3527_v5  ;;  %v3576_v25 = vadd.f32 %v3526_v51, %v3422_v55  ;;  %v3530_v9 = vsel %vm1084_vm1, %v3527_v5, %v3529_v48  ;;  %v2388_v38 = vpop.f32.mrf.mxu2 }
 0x27a   : > { %v2459_v20 = vmax.f32 %v2426_v49, 0.0  ;;  %v4102_v34 = vadd.f32 %v4101_v24, %v4053_v53  ;;  %v3578_v52 = vadd.f32 %v3530_v9, %v3424_v37  ;;  %v2460_v39 = vmax.f32 %v2428_v2, 0.0  ;;  %v4062_v7 = vpop.f32.mrf.mxu0 }
 0x27b   : > { %v3577_v4 = vadd.f32 %v3528_v11, %v3423_v1  ;;  %v3604_v12 = vadd.f32 %v6181_v8, %v3576_v25  ;;  %v4104_v16 = vadd.f32 %v4103_v23, %v4055_v14  ;;  %v2382_v10 = vadd.f32 %v6076_v57, %v6259_v61 }
 0x27c   : > { %v3606_v54 = vadd.f32 %v6181_v8, %v3578_v52  ;;  %v4719_v50 = vpack.c.bf16 %v2460_v39, %v2459_v20  ;;  %v4141_v33 = vmax.f32 %v4102_v34, 0.0  ;;  %v4058_v32 = vadd.f32 %v6288_v36, %v6274_v0 }
 0x27d   : > { %v3605_v62 = vadd.f32 %v6181_v8, %v3577_v4  ;;  %v3628_v13 = vmax.f32 %v3604_v12, 0.0  ;;  %v4142_v41 = vmax.f32 %v4104_v16, 0.0  ;;  %v2384_v31 = vadd.f32 %v6076_v57, %v6278_v59 }
 0x27e   : > { %v3630_v15 = vmax.f32 %v3606_v54, 0.0  ;;  %4787 = vst [vmem:[%s6191_s14 + $0x10] sm:$0xff] %v4719_v50   ;;  %v2431_v6 = vadd.f32 %v2430_v35, %v2382_v10  ;;  %v4060_v56 = vadd.f32 %v6288_v36, %v4059_v42  ;;  %v2432_v49 = vpop.f32.mrf.mxu3  ;;  %v4107_v61 = vadd.f32 %v4106_v44, %v4058_v32 }
 0x27f   : > { %v3629_v24 = vmax.f32 %v3605_v62, 0.0  ;;  %v3652_v29 = vpack.c.bf16 %v3628_v13, %v3628_v13  ;;  %v4749_v45 = vpack.c.bf16 %v4142_v41, %v4141_v33  ;;  %v2433_v51 = vadd.f32 %v2432_v49, %v2384_v31  ;;  %v4108_v0 = vpop.f32.mrf.mxu1 }
 0x280   : > { %v3654_v63 = vpack.c.bf16 %v3630_v15, %v3630_v15  ;;  %v4109_v17 = vadd.f32 %v4108_v0, %v4060_v56  ;;  %v2461_v55 = vmax.f32 %v2431_v6, 0.0  ;;  %v4143_v22 = vmax.f32 %v4107_v61, 0.0 }
 0x281   : > { %v3653_v21 = vpack.c.bf16 %v3629_v24, %v3629_v24  ;;  %v3810_v19 = vshrl.u32 %v3652_v29, 16  ;;  %4793 = vst [vmem:[%s6191_s14 + $0x40] sm:$0xff] %v4749_v45   ;;  %v2462_v5 = vmax.f32 %v2433_v51, 0.0  ;;  %v2391_v9 = vpop.f32.mrf.mxu2  ;;  %v2387_v20 = vadd.f32 %v6076_v57, %v2386_v43 }
 0x282   : > { %v3824_v60 = vshrl.u32 %v3654_v63, 16  ;;  %v3827_v40 = vshll.u32 %v3654_v63, 16  ;;  %v4144_v37 = vmax.f32 %v4109_v17, 0.0  ;;  %v4064_v2 = vpop.f32.mrf.mxu0  ;;  %v4063_v26 = vadd.f32 %v6288_v36, %v4062_v7 }
 0x283   : > { %v3815_v58 = vshrl.u32 %v3653_v21, 16  ;;  %v3818_v8 = vshll.u32 %v3653_v21, 16  ;;  %v4509_v18 = vrot.slane %v3810_v19, 11  ;;  %v4724_v48 = vpack.c.bf16 %v2462_v5, %v2461_v55  ;;  %v4892_v19 = vld [vmem:[%s6359_s6] ss:$0 sm:$0xff] }
 0x284   : > { %v3826_v27 = vrot.slane %v3824_v60, 7  ;;  %v4754_v11 = vpack.c.bf16 %v4144_v37, %v4143_v22  ;;  %v2389_v34 = vadd.f32 %v6076_v57, %v2388_v38  ;;  %v4065_v4 = vadd.f32 %v6288_v36, %v4064_v2 }
 0x285   : > { %v3817_v28 = vrot.slane %v3815_v58, 7  ;;  %4788 = vst [vmem:[%s6191_s14 + $0x18] sm:$0xff] %v4724_v48   ;;  %v2392_v44 = vadd.f32 %v6076_v57, %v2391_v9 }
 0x286   : > { %v3829_v30 = vor.u32 %v3827_v40, %v3826_v27  ;;  %v2435_v25 = vpop.f32.mrf.mxu3  ;;  %4794 = vst [vmem:[%s6191_s14 + $0x48] sm:$0xff] %v4754_v11  }
 0x287   : > { %v3820_v3 = vor.u32 %v3818_v8, %v3817_v28  ;;  %v3822_v47 = vrot.slane %v3817_v28, 4  ;;  %v4111_v14 = vpop.f32.mrf.mxu1  ;;  %v2436_v42 = vadd.f32 %v2435_v25, %v2387_v20 }
 0x288   : > { %v4112_v12 = vadd.f32 %v4111_v14, %v4063_v26 }
 0x289   : > { %v3821_v59 = vsel %vm5389_vm4, %v4509_v18, %v3820_v3  ;;  %v3830_v46 = vsel %vm5389_vm4, %v3822_v47, %v3829_v30  ;;  %v2463_v13 = vmax.f32 %v2436_v42, 0.0  ;;  %v2393_v33 = vpop.f32.mrf.mxu2 }
 0x28a   : > { %v3893_v23 = vunpack.c.l.b16 %v3821_v59  ;;  %v3894_v53 = vunpack.c.l.b16 %v3830_v46  ;;  %v4067_v54 = vpop.f32.mrf.mxu0  ;;  %v4145_v35 = vmax.f32 %v4112_v12, 0.0  ;;  %v2394_v10 = vadd.f32 %v4892_v19, %v2393_v33 }
 0x28b   : > { %v4068_v21 = vadd.f32 %v6288_v36, %v4067_v54 }
 0x28c   : > { %v3902_v1 = vpack.c.b16 %v3894_v53, %v3893_v23 }
 0x28e   : > { %4135 = vmatmul.bf16.gmra.mxu1 %v3902_v1  ;;  %v2437_v52 = vpop.f32.mrf.mxu3 }
 0x28f   : > { %v2438_v39 = vadd.f32 %v2437_v52, %v2389_v34  ;;  %v4113_v16 = vpop.f32.mrf.mxu1 }
 0x290   : > { %v4114_v62 = vadd.f32 %v4113_v16, %v4065_v4 }
 0x291   : > { %v2464_v50 = vmax.f32 %v2438_v39, 0.0  ;;  %v2396_v63 = vpop.f32.mrf.mxu2 }
 0x292   : > { %v4146_v43 = vmax.f32 %v4114_v62, 0.0  ;;  %v4069_v45 = vpop.f32.mrf.mxu0  ;;  %v2397_v3 = vadd.f32 %v4892_v19, %v2396_v63 }
 0x293   : > { %v4729_v41 = vpack.c.bf16 %v2464_v50, %v2463_v13  ;;  %v4070_v8 = vadd.f32 %v6288_v36, %v4069_v45 }
 0x294   : > { %v4759_v24 = vpack.c.bf16 %v4146_v43, %v4145_v35 }
 0x295   : > { %4789 = vst [vmem:[%s6191_s14 + $0x20] sm:$0xff] %v4729_v41  }
 0x296   : > { %v2440_v15 = vpop.f32.mrf.mxu3  ;;  %4795 = vst [vmem:[%s6191_s14 + $0x50] sm:$0xff] %v4759_v24  }
 0x297   : > { %v4116_v29 = vpop.f32.mrf.mxu1  ;;  %v2441_v58 = vadd.f32 %v2440_v15, %v2392_v44 }
 0x298   : > { %v4117_v32 = vadd.f32 %v4116_v29, %v4068_v21 }
 0x299   : > { %v2465_v57 = vmax.f32 %v2441_v58, 0.0  ;;  %v2398_v49 = vpop.f32.mrf.mxu2 }
 0x29a   : > { %v4147_v28 = vmax.f32 %v4117_v32, 0.0  ;;  %v4072_v38 = vpop.f32.mrf.mxu0  ;;  %v2399_v30 = vadd.f32 %v4892_v19, %v2398_v49 }
 0x29b   : > { %v4073_v55 = vadd.f32 %v6288_v36, %v4072_v38 }
 0x29e   : > { %v2442_v60 = vpop.f32.mrf.mxu3 }
 0x29f   : > { %v2443_v31 = vadd.f32 %v2442_v60, %v2394_v10  ;;  %v4118_v40 = vpop.f32.mrf.mxu1 }
 0x2a0   : > { %v4119_v7 = vadd.f32 %v4118_v40, %v4070_v8 }
 0x2a1   : > { %v2466_v18 = vmax.f32 %v2443_v31, 0.0  ;;  %v2401_v46 = vpop.f32.mrf.mxu2 }
 0x2a2   : > { %v4148_v27 = vmax.f32 %v4119_v7, 0.0  ;;  %v4074_v59 = vpop.f32.mrf.mxu0  ;;  %v2402_v20 = vadd.f32 %v4892_v19, %v2401_v46 }
 0x2a3   : > { %v4734_v6 = vpack.c.bf16 %v2466_v18, %v2465_v57  ;;  %v4075_v53 = vadd.f32 %v6288_v36, %v4074_v59 }
 0x2a4   : > { %v4764_v56 = vpack.c.bf16 %v4148_v27, %v4147_v28 }
 0x2a5   : > { %4790 = vst [vmem:[%s6191_s14 + $0x28] sm:$0xff] %v4734_v6  }
 0x2a6   : > { %v2445_v61 = vpop.f32.mrf.mxu3  ;;  %4796 = vst [vmem:[%s6191_s14 + $0x58] sm:$0xff] %v4764_v56  }
 0x2a7   : > { %v2446_v51 = vadd.f32 %v2445_v61, %v2397_v3 }
 0x2a9   : > { %v2467_v5 = vmax.f32 %v2446_v51, 0.0  ;;  %v2403_v9 = vpop.f32.mrf.mxu2 }
 0x2aa   : > { %v2404_v26 = vadd.f32 %v4892_v19, %v2403_v9  ;;  %v4077_v52 = vpop.f32.mrf.mxu0 }
 0x2ab   : > { %v4078_v13 = vadd.f32 %v6288_v36, %v4077_v52 }
 0x2ae   : > { %v2447_v0 = vpop.f32.mrf.mxu3 }
 0x2af   : > { %v2448_v17 = vadd.f32 %v2447_v0, %v2399_v30 }
 0x2b1   : > { %v2468_v23 = vmax.f32 %v2448_v17, 0.0 }
 0x2b2   : > { %v4079_v54 = vpop.f32.mrf.mxu0 }
 0x2b3   : > { %v4739_v22 = vpack.c.bf16 %v2468_v23, %v2467_v5  ;;  %v4080_v50 = vadd.f32 %v6288_v36, %v4079_v54 }
 0x2b5   : > { %v4121_v47 = vpop.f32.mrf.mxu1  ;;  %4791 = vst [vmem:[%s6191_s14 + $0x30] sm:$0xff] %v4739_v22  }
 0x2b6   : > { %v4122_v37 = vadd.f32 %v4121_v47, %v4073_v55  ;;  %v2450_v11 = vpop.f32.mrf.mxu3 }
 0x2b7   : > { %v2451_v34 = vadd.f32 %v2450_v11, %v2402_v20 }
 0x2b8   : > { %v4149_v25 = vmax.f32 %v4122_v37, 0.0 }
 0x2b9   : > { %v2469_v12 = vmax.f32 %v2451_v34, 0.0 }
 0x2ba   : > { %v4082_v29 = vpop.f32.mrf.mxu0 }
 0x2bb   : > { %v4083_v21 = vadd.f32 %v6288_v36, %v4082_v29 }
 0x2bd   : > { %v4123_v48 = vpop.f32.mrf.mxu1 }
 0x2be   : > { %v4124_v1 = vadd.f32 %v4123_v48, %v4075_v53  ;;  %v2452_v42 = vpop.f32.mrf.mxu3 }
 0x2bf   : > { %v2453_v4 = vadd.f32 %v2452_v42, %v2404_v26 }
 0x2c0   : > { %v4150_v2 = vmax.f32 %v4124_v1, 0.0 }
 0x2c1   : > { %v2470_v39 = vmax.f32 %v2453_v4, 0.0 }
 0x2c2   : > { %v4769_v14 = vpack.c.bf16 %v4150_v2, %v4149_v25  ;;  %v4084_v45 = vpop.f32.mrf.mxu0 }
 0x2c3   : > { %v4744_v16 = vpack.c.bf16 %v2470_v39, %v2469_v12  ;;  %v4085_v63 = vadd.f32 %v6288_v36, %v4084_v45 }
 0x2c4   : > { %4797 = vst [vmem:[%s6191_s14 + $0x60] sm:$0xff] %v4769_v14  }
 0x2c5   : > { %4792 = vst [vmem:[%s6191_s14 + $0x38] sm:$0xff] %v4744_v16  }
 0x2ca   : > { %v4087_v31 = vpop.f32.mrf.mxu0 }
 0x2cb   : > { %v4088_v57 = vadd.f32 %v6288_v36, %v4087_v31 }
 0x2d0   : > { %v4126_v62 = vpop.f32.mrf.mxu1 }
 0x2d1   : > { %v4127_v33 = vadd.f32 %v4126_v62, %v4078_v13 }
 0x2d2   : > { %v4089_v7 = vpop.f32.mrf.mxu0 }
 0x2d3   : > { %v4151_v41 = vmax.f32 %v4127_v33, 0.0  ;;  %v4090_v18 = vadd.f32 %v6288_v36, %v4089_v7 }
 0x2d8   : > { %v4128_v35 = vpop.f32.mrf.mxu1 }
 0x2d9   : > { %v4129_v43 = vadd.f32 %v4128_v35, %v4080_v50 }
 0x2db   : > { %v4152_v24 = vmax.f32 %v4129_v43, 0.0 }
 0x2dd   : > { %v4774_v15 = vpack.c.bf16 %v4152_v24, %v4151_v41 }
 0x2df   : > { %4798 = vst [vmem:[%s6191_s14 + $0x68] sm:$0xff] %v4774_v15  }
 0x2ed   : > { %v4131_v44 = vpop.f32.mrf.mxu1 }
 0x2ee   : > { %v4132_v19 = vadd.f32 %v4131_v44, %v4083_v21 }
 0x2f0   : > { %v4153_v8 = vmax.f32 %v4132_v19, 0.0 }
 0x2f5   : > { %v4133_v10 = vpop.f32.mrf.mxu1 }
 0x2f6   : > { %v4134_v58 = vadd.f32 %v4133_v10, %v4085_v63 }
 0x2f8   : > { %v4154_v60 = vmax.f32 %v4134_v58, 0.0 }
 0x2fa   : > { %v4779_v32 = vpack.c.bf16 %v4154_v60, %v4153_v8 }
 0x2fc   : > { %4799 = vst [vmem:[%s6191_s14 + $0x70] sm:$0xff] %v4779_v32  }
 0x30b   : > { %v4136_v40 = vpop.f32.mrf.mxu1 }
 0x30c   : > { %v4137_v28 = vadd.f32 %v4136_v40, %v4088_v57 }
 0x30e   : > { %v4155_v56 = vmax.f32 %v4137_v28, 0.0 }
 0x313   : > { %v4138_v27 = vpop.f32.mrf.mxu1 }
 0x314   : > { %v4139_v6 = vadd.f32 %v4138_v27, %v4090_v18 }
 0x316   : > { %v4156_v38 = vmax.f32 %v4139_v6, 0.0 }
 0x318   : > { %v4784_v49 = vpack.c.bf16 %v4156_v38, %v4155_v56 }
 0x31a   : > { %4800 = vst [vmem:[%s6191_s14 + $0x78] sm:$0xff] %v4784_v49  }
 0x31b PF: > { %s17_s24 = sadd.s32 1, %s4899_s24  }
 0x31c   : > { %p14_p4 = scmp.ge.s32.totalorder %s17_s24, 4  }
 0x31e   :  { %16 = sbr.rel (!%p14_p4) target bundleno = 1 (0x1), region = 85 }

</bundles_post_ra>
